<compile_context>
chip_gen: v5e
topology: v5e:2x2
jax: 0.10.0
libtpu: 0.0.40
codegen_flags: <defaults>
</compile_context>

<pallas_src>
import numpy as np
import jax
import jax.numpy as jnp
from jax.experimental import pallas as pl
from jax.experimental.pallas import tpu as pltpu


# ---------------------------------------------------------------------------
# Host-side graph + receptive-field structure (numpy glue).
# Builds the dense aggregation operator S per level:
#   S[(v,a,b), (w,p,q)] = sum_{j: nbr_j(v)=w} chi_vw[a,p] * chi_vw[b,q]
# so that   agg[g,v,c,a,b] = sum_{w,p,q} S[(v,a,b),(w,p,q)] * feat_prev[g,w,c,p,q].
# ---------------------------------------------------------------------------

def build_cycle_adjacency(num_vertices):
    a = np.zeros((num_vertices, num_vertices), np.float32)
    for v in range(num_vertices):
        a[v, (v + 1) % num_vertices] = 1.0
        a[v, (v - 1) % num_vertices] = 1.0
    return a


def receptive_field(v, radius, num_vertices):
    return sorted({(v + d) % num_vertices for d in range(-radius, radius + 1)})


def chi_matrix_np(v_rfield, w_rfield):
    v_rfield = sorted(v_rfield)
    w_rfield = sorted(w_rfield)
    mat = np.zeros((len(v_rfield), len(w_rfield)), np.float32)
    for i, a in enumerate(v_rfield):
        for j, b in enumerate(w_rfield):
            if a == b:
                mat[i, j] = 1.0
    return mat


def build_structure(lvls, num_vertices, adjacency):
    rfields = {0: {v: [v] for v in range(num_vertices)}}
    for lvl in range(1, lvls + 1):
        rfields[lvl] = {v: receptive_field(v, lvl, num_vertices)
                        for v in range(num_vertices)}

    structure = {}
    for lvl in range(1, lvls + 1):
        k = len(rfields[lvl][0])
        kp = len(rfields[lvl - 1][0])
        k2, kp2 = k * k, kp * kp
        s_dense = np.zeros((num_vertices * k2, num_vertices * kp2), np.float32)
        adj_flat = np.zeros((num_vertices * k2,), np.float32)
        chis, adjs, nbrs = [], [], []
        for v in range(num_vertices):
            v_rf = rfields[lvl][v]
            v_nbrs = receptive_field(v, 1, num_vertices)   # radius-1 neighbourhood (incl. v)
            chi_v = np.zeros((len(v_nbrs), k, kp), np.float32)
            for j, w in enumerate(v_nbrs):
                chi = chi_matrix_np(v_rf, rfields[lvl - 1][w])
                chi_v[j] = chi
                blk = np.einsum('ap,bq->abpq', chi, chi).reshape(k2, kp2)
                s_dense[v * k2:(v + 1) * k2, w * kp2:(w + 1) * kp2] += blk
            red_adj = adjacency[np.ix_(v_rf, v_rf)]
            adj_flat[v * k2:(v + 1) * k2] = red_adj.reshape(-1)
            chis.append(chi_v)
            adjs.append(red_adj)
            nbrs.append(v_nbrs)
        structure[lvl] = dict(
            s_t=jnp.asarray(s_dense.T),                       # (N*kp2, N*k2)  aggregation op
            adj_flat=jnp.asarray(adj_flat)[None, :],          # (1, N*k2)
            chi=jnp.asarray(np.stack(chis)),                  # (N, n, k, kp)  (reference only)
            adj=jnp.asarray(np.stack(adjs)),                  # (N, k, k)      (reference only)
            nbr_ids=jnp.asarray(np.array(nbrs, np.int32)),    # (N, n)         (reference only)
            k=k, kp=kp)
    return structure


# ---------------------------------------------------------------------------
# Pallas kernels (all single grid step; whole problem resident in VMEM)
# ---------------------------------------------------------------------------

def _agg_kernel(lam_ref, p_ref, st_ref, adj_ref, out_ref):
    """A = P @ S^T + lambda * adj_flat  for all graphs/vertices/channels at once.

    P (G*C_in, N*kp^2) | S^T (N*kp^2, N*k^2) | adj_flat (1, N*k^2) | out (G*C_in, N*k^2)
    """
    a = jnp.dot(p_ref[...], st_ref[...], preferred_element_type=jnp.float32)
    out_ref[...] = a + lam_ref[0] * adj_ref[...]


def aggregate_level(p, s_t, adj_flat, lam):
    rows, nkp2 = p.shape
    nk2 = s_t.shape[1]
    return pl.pallas_call(
        _agg_kernel,
        out_shape=jax.ShapeDtypeStruct((rows, nk2), jnp.float32),
        grid=(1,),
        in_specs=[
            pl.BlockSpec(memory_space=pltpu.MemorySpace.SMEM),     # lambda (1,)
            pl.BlockSpec((rows, nkp2), lambda i: (0, 0)),
            pl.BlockSpec((nkp2, nk2), lambda i: (0, 0)),
            pl.BlockSpec((1, nk2), lambda i: (0, 0)),
        ],
        out_specs=pl.BlockSpec((rows, nk2), lambda i: (0, 0)),
    )(lam, p, s_t, adj_flat)


def _linsig_kernel(x_ref, m_ref, b_ref, out_ref):
    """sigmoid(x_flat @ Mbd + b_flat) over all (graph, vertex) rows.

    x (G*N, C_in*k^2) raw per-vertex flat vectors | Mbd (C_in*k^2, k^2*C_out) block-diagonal
    expansion of the level's Linear weight (preserves PyTorch view(k*k,-1) aliasing exactly).
    """
    y = jnp.dot(x_ref[...], m_ref[...], preferred_element_type=jnp.float32) + b_ref[...]
    out_ref[...] = jax.nn.sigmoid(y)


def linear_sigmoid(x, m_bd, b_flat):
    rows, d_in = x.shape
    d_out = m_bd.shape[1]
    return pl.pallas_call(
        _linsig_kernel,
        out_shape=jax.ShapeDtypeStruct((rows, d_out), jnp.float32),
        grid=(1,),
        in_specs=[
            pl.BlockSpec((rows, d_in), lambda i: (0, 0)),
            pl.BlockSpec((d_in, d_out), lambda i: (0, 0)),
            pl.BlockSpec((1, d_out), lambda i: (0, 0)),
        ],
        out_specs=pl.BlockSpec((rows, d_out), lambda i: (0, 0)),
    )(x, m_bd, b_flat)


def _final_kernel(x_ref, m_ref, b_ref, rmat_ref, gmat_ref, fcw_ref, fcb_ref, out_ref):
    """Last level fused: linear + sigmoid + collapse over (vertices, spatial) + fc head.

    rmat (k^2*C_out, C_out): 0/1 matrix summing the k*k positions of each output channel.
    gmat (G, G*N): 0/1 matrix summing the vertices of each graph.
    """
    y = jax.nn.sigmoid(
        jnp.dot(x_ref[...], m_ref[...], preferred_element_type=jnp.float32) + b_ref[...])
    per_vtx = jnp.dot(y, rmat_ref[...], preferred_element_type=jnp.float32)        # (G*N, C)
    g_repr = jnp.dot(gmat_ref[...], per_vtx, preferred_element_type=jnp.float32)   # (G, C)
    out_ref[...] = jnp.dot(g_repr, fcw_ref[...],
                           preferred_element_type=jnp.float32) + fcb_ref[...]      # (G, 1)


def final_level(x, m_bd, b_flat, r_mat, g_mat, fc_w_t, fc_b):
    rows, d_in = x.shape
    d_out = m_bd.shape[1]
    c_out = r_mat.shape[1]
    n_graphs = g_mat.shape[0]
    return pl.pallas_call(
        _final_kernel,
        out_shape=jax.ShapeDtypeStruct((n_graphs, 1), jnp.float32),
        grid=(1,),
        in_specs=[
            pl.BlockSpec((rows, d_in), lambda i: (0, 0)),
            pl.BlockSpec((d_in, d_out), lambda i: (0, 0)),
            pl.BlockSpec((1, d_out), lambda i: (0, 0)),
            pl.BlockSpec((d_out, c_out), lambda i: (0, 0)),
            pl.BlockSpec((n_graphs, rows), lambda i: (0, 0)),
            pl.BlockSpec((c_out, 1), lambda i: (0, 0)),
            pl.BlockSpec((1, 1), lambda i: (0, 0)),
        ],
        out_specs=pl.BlockSpec((n_graphs, 1), lambda i: (0, 0)),
    )(x, m_bd, b_flat, r_mat, g_mat, fc_w_t, fc_b)


# ---------------------------------------------------------------------------
# Parameters (deterministic init; mirrors init_model_variables for mode='mix')
# and host-side pre-expansion of the weights into the kernels' operators.
# ---------------------------------------------------------------------------

def gen_w_sizes(input_features, hidden_size, lvls):
    w_sizes = {1: {'in': input_features, 'out': hidden_size}}
    for lvl in range(2, lvls + 1):
        w_sizes[lvl] = {'in': hidden_size, 'out': hidden_size}
    return w_sizes


def init_params(key, lvls, input_features, hidden_size):
    w_sizes = gen_w_sizes(input_features, hidden_size, lvls)
    params = {'w_t': {}, 'b': {}, 'adj_lambda': {}}
    for lvl in range(1, lvls + 1):
        key, kw, kb, kl = jax.random.split(key, 4)
        d_in, d_out = w_sizes[lvl]['in'], w_sizes[lvl]['out']
        w = 0.1 * jax.random.normal(kw, (d_out, d_in), jnp.float32)   # nn.Linear weight (out, in)
        params['w_t'][lvl] = w.T                                      # stored as (in, out)
        params['b'][lvl] = 0.1 * jax.random.normal(kb, (1, d_out), jnp.float32)
        params['adj_lambda'][lvl] = jax.random.normal(kl, (1,), jnp.float32)
    key, kw, kb = jax.random.split(key, 3)
    c_final = w_sizes[lvls]['out']
    params['fc_w_t'] = (0.1 * jax.random.normal(kw, (1, c_final), jnp.float32)).T  # (C_final, 1)
    params['fc_b'] = 0.1 * jax.random.normal(kb, (1, 1), jnp.float32)
    return params, w_sizes


def prepare_params(params, structure, lvls):
    """Expand weights into the block-diagonal / reduction operators used by the kernels."""
    prepared = {}
    for lvl in range(1, lvls + 1):
        k2 = structure[lvl]['k'] ** 2
        w_t = params['w_t'][lvl]                                        # (C_in, C_out)
        prepared[lvl] = dict(
            m_bd=jnp.kron(jnp.eye(k2, dtype=jnp.float32), w_t),         # (C_in*k2, k2*C_out)
            b_flat=jnp.tile(params['b'][lvl], (1, k2)),                  # (1, k2*C_out)
            lam=params['adj_lambda'][lvl],                               # (1,)
        )
    k2_last = structure[lvls]['k'] ** 2
    c_final = params['w_t'][lvls].shape[1]
    prepared['r_mat'] = jnp.kron(jnp.eye(c_final, dtype=jnp.float32),
                                 jnp.ones((k2_last, 1), jnp.float32))    # (C*k2, C)
    prepared['fc_w_t'] = params['fc_w_t']
    prepared['fc_b'] = params['fc_b']
    return prepared


# ---------------------------------------------------------------------------
# Steerable_2D forward (Pallas-backed)
# ---------------------------------------------------------------------------

def steerable_2d_forward(labels, structure, prepared, lvls):
    """labels: (G, N, C0)  ->  regression output (G, 1)."""
    G, N, C0 = labels.shape
    # level-0 features, channel-separated layout: rows (g, c), lanes w  (kp = 1)
    p = jnp.transpose(labels, (0, 2, 1)).reshape(G * C0, N).astype(jnp.float32)
    c_in = C0
    # graph-collapse matrix: 0/1 operator summing the vertices of each graph (constant under jit)
    g_mat = jnp.kron(jnp.eye(G, dtype=jnp.float32), jnp.ones((1, N), jnp.float32))   # (G, G*N)
    out = None
    for lvl in range(1, lvls + 1):
        s = structure[lvl]
        k2 = s['k'] ** 2
        pr = prepared[lvl]

        # fused aggregation for all graphs/vertices/channels: one MXU matmul (+ lambda*adj)
        agg = aggregate_level(p, s['s_t'], s['adj_flat'], pr['lam'])     # (G*c_in, N*k2)

        # corner turn (XLA, KB-sized layout plumbing, fused under jit):
        # rows (g,c) x lanes (v,ab)  ->  rows (g,v) x lanes flat (c,ab)
        # the flat (c,ab) order reproduces PyTorch's aggregate.view(k*k, -1) aliasing exactly.
        x = agg.reshape(G, c_in, N, k2).transpose(0, 2, 1, 3).reshape(G * N, c_in * k2)

        c_out = pr['b_flat'].shape[1] // k2
        if lvl < lvls:
            y = linear_sigmoid(x, pr['m_bd'], pr['b_flat'])              # (G*N, k2*c_out)
            # corner turn to the next level's channel-separated layout
            p = y.reshape(G, N, c_out, k2).transpose(0, 2, 1, 3).reshape(G * c_out, N * k2)
            c_in = c_out
        else:
            out = final_level(x, pr['m_bd'], pr['b_flat'], prepared['r_mat'],
                              g_mat, prepared['fc_w_t'], prepared['fc_b'])
    return out


# ---------------------------------------------------------------------------
# Pure-JAX reference (straightforward chi / einsum formulation, mirrors PyTorch)
# ---------------------------------------------------------------------------

def reference_forward(labels_per_graph, structure, params, lvls):
    g_reprs = []
    for g in range(labels_per_graph.shape[0]):
        feat = labels_per_graph[g][:, :, None, None].astype(jnp.float32)   # (N, C0, 1, 1)
        n_vtx = feat.shape[0]
        for lvl in range(1, lvls + 1):
            s = structure[lvl]
            c_in = feat.shape[1]
            nbrf = jnp.take(feat, s['nbr_ids'], axis=0)                    # (N, n, C_in, kp, kp)
            agg = jnp.einsum('vjap,vjcpq,vjbq->vcab', s['chi'], nbrf, s['chi'])
            agg = agg + params['adj_lambda'][lvl][0] * s['adj'][:, None, :, :]
            k = s['k']
            x = agg.reshape(n_vtx, k * k, c_in)                            # raw view(k*k, -1)
            y = jax.nn.sigmoid(x @ params['w_t'][lvl] + params['b'][lvl])
            feat = y.reshape(n_vtx, y.shape[-1], k, k)                     # raw view(C_out,k,k)
        g_reprs.append(jnp.sum(feat, axis=(0, 2, 3)))
    g_reprs = jnp.stack(g_reprs)
    return g_reprs @ params['fc_w_t'] + params['fc_b']


# ---------------------------------------------------------------------------

if __name__ == "__main__":
    LVLS = 2
    NUM_VERTICES = 8
    INPUT_FEATURES = 4
    HIDDEN = 32
    NUM_GRAPHS = 2

    key = jax.random.PRNGKey(0)
    key, pkey, lkey = jax.random.split(key, 3)

    params, w_sizes = init_params(pkey, LVLS, INPUT_FEATURES, HIDDEN)
    adjacency = build_cycle_adjacency(NUM_VERTICES)
    structure = build_structure(LVLS, NUM_VERTICES, adjacency)
    prepared = prepare_params(params, structure, LVLS)

    # vertex labels: two small graphs (same cycle topology, different labels)
    labels = jax.random.normal(lkey, (NUM_GRAPHS, NUM_VERTICES, INPUT_FEATURES), jnp.float32)

    # jit the whole forward: fuses the inter-kernel corner turns and removes per-call
    # Python dispatch overhead (structure/prepared are closed over -> compile-time constants,
    # so the k/kp Python ints stay static for reshapes).
    fwd = jax.jit(lambda lab: steerable_2d_forward(lab, structure, prepared, LVLS))

    out = fwd(labels)
    out = jax.block_until_ready(out)

    ref = reference_forward(labels, structure, params, LVLS)
    ref = jax.block_until_ready(ref)

    assert out.shape == (NUM_GRAPHS, 1), out.shape
    assert np.allclose(np.asarray(out), np.asarray(ref), rtol=1e-3, atol=1e-3), (out, ref)
    print("KERNEL_OK")
</pallas_src>

<mosaic_0001>
module attributes {stable_mosaic.version = 11 : i64} {
  func.func @_agg_kernel(%arg0: i32, %arg1: memref<1xf32, #tpu.memory_space<smem>>, %arg2: memref<8x8xf32, #tpu.memory_space<vmem>>, %arg3: memref<8x72xf32, #tpu.memory_space<vmem>>, %arg4: memref<1x72xf32, #tpu.memory_space<vmem>>, %arg5: memref<8x72xf32, #tpu.memory_space<vmem>>) attributes {dimension_semantics = [#tpu.dimension_semantics<arbitrary>], iteration_bounds = array<i64: 1>, scalar_prefetch = 0 : i64, scratch_operands = 0 : i64, tpu.core_type = #tpu.core_type<tc>, window_params = [{transform_indices = @transform_0, window_bounds = array<i64: 1>}, {pipeline_mode = #tpu.pipeline_mode<synchronous>, transform_indices = @transform_1, window_bounds = array<i64: 8, 8>}, {pipeline_mode = #tpu.pipeline_mode<synchronous>, transform_indices = @transform_2, window_bounds = array<i64: 8, 72>}, {pipeline_mode = #tpu.pipeline_mode<synchronous>, transform_indices = @transform_3, window_bounds = array<i64: 1, 72>}, {pipeline_mode = #tpu.pipeline_mode<synchronous>, transform_indices = @transform_4, window_bounds = array<i64: 8, 72>}]} {
    %c0 = arith.constant 0 : index
    %c0_0 = arith.constant 0 : index
    %0 = vector.load %arg2[%c0, %c0_0] : memref<8x8xf32, #tpu.memory_space<vmem>>, vector<8x8xf32>
    %c0_1 = arith.constant 0 : index
    %c0_2 = arith.constant 0 : index
    %1 = vector.load %arg3[%c0_1, %c0_2] : memref<8x72xf32, #tpu.memory_space<vmem>>, vector<8x72xf32>
    %cst = arith.constant dense<0.000000e+00> : vector<8x72xf32>
    %2 = tpu.matmul %0, %1, %cst {dimension_numbers = #tpu.dot_dimension_numbers<[1], [0], [0], [1], [0, 0, 1, 1], [], []>} : vector<8x8xf32>, vector<8x72xf32>, vector<8x72xf32> -> vector<8x72xf32>
    %c0_3 = arith.constant 0 : index
    %3 = memref.load %arg1[%c0_3] : memref<1xf32, #tpu.memory_space<smem>>
    %c0_4 = arith.constant 0 : index
    %c0_5 = arith.constant 0 : index
    %4 = vector.load %arg4[%c0_4, %c0_5] : memref<1x72xf32, #tpu.memory_space<vmem>>, vector<1x72xf32>
    %5 = vector.broadcast %3 : f32 to vector<1x72xf32>
    %6 = arith.mulf %5, %4 : vector<1x72xf32>
    %7 = vector.broadcast %6 : vector<1x72xf32> to vector<8x72xf32>
    %8 = arith.addf %2, %7 : vector<8x72xf32>
    %c0_6 = arith.constant 0 : index
    %c0_7 = arith.constant 0 : index
    %9 = vector.load %arg5[%c0_6, %c0_7] : memref<8x72xf32, #tpu.memory_space<vmem>>, vector<8x72xf32>
    tpu.vector_store %arg5[%c0_6, %c0_7], %8 {strides = array<i32>} : memref<8x72xf32, #tpu.memory_space<vmem>>, vector<8x72xf32>,
    return
  }
  func.func @transform_0(%arg0: i32) -> i32 {
    %c0_i32 = arith.constant 0 : i32
    %c0_i32_0 = arith.constant 0 : i32
    return %c0_i32 : i32
  }
  func.func @transform_1(%arg0: i32) -> (i32, i32) {
    %c0_i32 = arith.constant 0 : i32
    %c0_i32_0 = arith.constant 0 : i32
    %c0_i32_1 = arith.constant 0 : i32
    return %c0_i32, %c0_i32_0 : i32, i32
  }
  func.func @transform_2(%arg0: i32) -> (i32, i32) {
    %c0_i32 = arith.constant 0 : i32
    %c0_i32_0 = arith.constant 0 : i32
    %c0_i32_1 = arith.constant 0 : i32
    return %c0_i32, %c0_i32_0 : i32, i32
  }
  func.func @transform_3(%arg0: i32) -> (i32, i32) {
    %c0_i32 = arith.constant 0 : i32
    %c0_i32_0 = arith.constant 0 : i32
    %c0_i32_1 = arith.constant 0 : i32
    return %c0_i32, %c0_i32_0 : i32, i32
  }
  func.func @transform_4(%arg0: i32) -> (i32, i32) {
    %c0_i32 = arith.constant 0 : i32
    %c0_i32_0 = arith.constant 0 : i32
    %c0_i32_1 = arith.constant 0 : i32
    return %c0_i32, %c0_i32_0 : i32, i32
  }
}

module attributes {stable_mosaic.version = 11 : i64} {
  func.func @_linsig_kernel(%arg0: i32, %arg1: memref<16x36xf32, #tpu.memory_space<vmem>>, %arg2: memref<36x288xf32, #tpu.memory_space<vmem>>, %arg3: memref<1x288xf32, #tpu.memory_space<vmem>>, %arg4: memref<16x288xf32, #tpu.memory_space<vmem>>) attributes {dimension_semantics = [#tpu.dimension_semantics<arbitrary>], iteration_bounds = array<i64: 1>, scalar_prefetch = 0 : i64, scratch_operands = 0 : i64, tpu.core_type = #tpu.core_type<tc>, window_params = [{pipeline_mode = #tpu.pipeline_mode<synchronous>, transform_indices = @transform_0, window_bounds = array<i64: 16, 36>}, {pipeline_mode = #tpu.pipeline_mode<synchronous>, transform_indices = @transform_1, window_bounds = array<i64: 36, 288>}, {pipeline_mode = #tpu.pipeline_mode<synchronous>, transform_indices = @transform_2, window_bounds = array<i64: 1, 288>}, {pipeline_mode = #tpu.pipeline_mode<synchronous>, transform_indices = @transform_3, window_bounds = array<i64: 16, 288>}]} {
    %c0 = arith.constant 0 : index
    %c0_0 = arith.constant 0 : index
    %0 = vector.load %arg1[%c0, %c0_0] : memref<16x36xf32, #tpu.memory_space<vmem>>, vector<16x36xf32>
    %c0_1 = arith.constant 0 : index
    %c0_2 = arith.constant 0 : index
    %1 = vector.load %arg2[%c0_1, %c0_2] : memref<36x288xf32, #tpu.memory_space<vmem>>, vector<36x288xf32>
    %cst = arith.constant dense<0.000000e+00> : vector<16x288xf32>
    %2 = tpu.matmul %0, %1, %cst {dimension_numbers = #tpu.dot_dimension_numbers<[1], [0], [0], [1], [0, 0, 1, 1], [], []>} : vector<16x36xf32>, vector<36x288xf32>, vector<16x288xf32> -> vector<16x288xf32>
    %c0_3 = arith.constant 0 : index
    %c0_4 = arith.constant 0 : index
    %3 = vector.load %arg3[%c0_3, %c0_4] : memref<1x288xf32, #tpu.memory_space<vmem>>, vector<1x288xf32>
    %4 = vector.broadcast %3 : vector<1x288xf32> to vector<16x288xf32>
    %5 = arith.addf %2, %4 : vector<16x288xf32>
    %6 = arith.negf %5 : vector<16x288xf32>
    %7 = math.exp %6 : vector<16x288xf32>
    %cst_5 = arith.constant 1.000000e+00 : f32
    %8 = vector.broadcast %cst_5 : f32 to vector<16x288xf32>
    %9 = arith.addf %8, %7 : vector<16x288xf32>
    %10 = arith.divf %8, %9 : vector<16x288xf32>
    %c0_6 = arith.constant 0 : index
    %c0_7 = arith.constant 0 : index
    %11 = vector.load %arg4[%c0_6, %c0_7] : memref<16x288xf32, #tpu.memory_space<vmem>>, vector<16x288xf32>
    tpu.vector_store %arg4[%c0_6, %c0_7], %10 {strides = array<i32>} : memref<16x288xf32, #tpu.memory_space<vmem>>, vector<16x288xf32>,
    return
  }
  func.func @transform_0(%arg0: i32) -> (i32, i32) {
    %c0_i32 = arith.constant 0 : i32
    %c0_i32_0 = arith.constant 0 : i32
    %c0_i32_1 = arith.constant 0 : i32
    return %c0_i32, %c0_i32_0 : i32, i32
  }
  func.func @transform_1(%arg0: i32) -> (i32, i32) {
    %c0_i32 = arith.constant 0 : i32
    %c0_i32_0 = arith.constant 0 : i32
    %c0_i32_1 = arith.constant 0 : i32
    return %c0_i32, %c0_i32_0 : i32, i32
  }
  func.func @transform_2(%arg0: i32) -> (i32, i32) {
    %c0_i32 = arith.constant 0 : i32
    %c0_i32_0 = arith.constant 0 : i32
    %c0_i32_1 = arith.constant 0 : i32
    return %c0_i32, %c0_i32_0 : i32, i32
  }
  func.func @transform_3(%arg0: i32) -> (i32, i32) {
    %c0_i32 = arith.constant 0 : i32
    %c0_i32_0 = arith.constant 0 : i32
    %c0_i32_1 = arith.constant 0 : i32
    return %c0_i32, %c0_i32_0 : i32, i32
  }
}

module attributes {stable_mosaic.version = 11 : i64} {
  func.func @_agg_kernel(%arg0: i32, %arg1: memref<1xf32, #tpu.memory_space<smem>>, %arg2: memref<64x72xf32, #tpu.memory_space<vmem>>, %arg3: memref<72x200xf32, #tpu.memory_space<vmem>>, %arg4: memref<1x200xf32, #tpu.memory_space<vmem>>, %arg5: memref<64x200xf32, #tpu.memory_space<vmem>>) attributes {dimension_semantics = [#tpu.dimension_semantics<arbitrary>], iteration_bounds = array<i64: 1>, scalar_prefetch = 0 : i64, scratch_operands = 0 : i64, tpu.core_type = #tpu.core_type<tc>, window_params = [{transform_indices = @transform_0, window_bounds = array<i64: 1>}, {pipeline_mode = #tpu.pipeline_mode<synchronous>, transform_indices = @transform_1, window_bounds = array<i64: 64, 72>}, {pipeline_mode = #tpu.pipeline_mode<synchronous>, transform_indices = @transform_2, window_bounds = array<i64: 72, 200>}, {pipeline_mode = #tpu.pipeline_mode<synchronous>, transform_indices = @transform_3, window_bounds = array<i64: 1, 200>}, {pipeline_mode = #tpu.pipeline_mode<synchronous>, transform_indices = @transform_4, window_bounds = array<i64: 64, 200>}]} {
    %c0 = arith.constant 0 : index
    %c0_0 = arith.constant 0 : index
    %0 = vector.load %arg2[%c0, %c0_0] : memref<64x72xf32, #tpu.memory_space<vmem>>, vector<64x72xf32>
    %c0_1 = arith.constant 0 : index
    %c0_2 = arith.constant 0 : index
    %1 = vector.load %arg3[%c0_1, %c0_2] : memref<72x200xf32, #tpu.memory_space<vmem>>, vector<72x200xf32>
    %cst = arith.constant dense<0.000000e+00> : vector<64x200xf32>
    %2 = tpu.matmul %0, %1, %cst {dimension_numbers = #tpu.dot_dimension_numbers<[1], [0], [0], [1], [0, 0, 1, 1], [], []>} : vector<64x72xf32>, vector<72x200xf32>, vector<64x200xf32> -> vector<64x200xf32>
    %c0_3 = arith.constant 0 : index
    %3 = memref.load %arg1[%c0_3] : memref<1xf32, #tpu.memory_space<smem>>
    %c0_4 = arith.constant 0 : index
    %c0_5 = arith.constant 0 : index
    %4 = vector.load %arg4[%c0_4, %c0_5] : memref<1x200xf32, #tpu.memory_space<vmem>>, vector<1x200xf32>
    %5 = vector.broadcast %3 : f32 to vector<1x200xf32>
    %6 = arith.mulf %5, %4 : vector<1x200xf32>
    %7 = vector.broadcast %6 : vector<1x200xf32> to vector<64x200xf32>
    %8 = arith.addf %2, %7 : vector<64x200xf32>
    %c0_6 = arith.constant 0 : index
    %c0_7 = arith.constant 0 : index
    %9 = vector.load %arg5[%c0_6, %c0_7] : memref<64x200xf32, #tpu.memory_space<vmem>>, vector<64x200xf32>
    tpu.vector_store %arg5[%c0_6, %c0_7], %8 {strides = array<i32>} : memref<64x200xf32, #tpu.memory_space<vmem>>, vector<64x200xf32>,
    return
  }
  func.func @transform_0(%arg0: i32) -> i32 {
    %c0_i32 = arith.constant 0 : i32
    %c0_i32_0 = arith.constant 0 : i32
    return %c0_i32 : i32
  }
  func.func @transform_1(%arg0: i32) -> (i32, i32) {
    %c0_i32 = arith.constant 0 : i32
    %c0_i32_0 = arith.constant 0 : i32
    %c0_i32_1 = arith.constant 0 : i32
    return %c0_i32, %c0_i32_0 : i32, i32
  }
  func.func @transform_2(%arg0: i32) -> (i32, i32) {
    %c0_i32 = arith.constant 0 : i32
    %c0_i32_0 = arith.constant 0 : i32
    %c0_i32_1 = arith.constant 0 : i32
    return %c0_i32, %c0_i32_0 : i32, i32
  }
  func.func @transform_3(%arg0: i32) -> (i32, i32) {
    %c0_i32 = arith.constant 0 : i32
    %c0_i32_0 = arith.constant 0 : i32
    %c0_i32_1 = arith.constant 0 : i32
    return %c0_i32, %c0_i32_0 : i32, i32
  }
  func.func @transform_4(%arg0: i32) -> (i32, i32) {
    %c0_i32 = arith.constant 0 : i32
    %c0_i32_0 = arith.constant 0 : i32
    %c0_i32_1 = arith.constant 0 : i32
    return %c0_i32, %c0_i32_0 : i32, i32
  }
}

module attributes {stable_mosaic.version = 11 : i64} {
  func.func @_final_kernel(%arg0: i32, %arg1: memref<16x800xf32, #tpu.memory_space<vmem>>, %arg2: memref<800x800xf32, #tpu.memory_space<vmem>>, %arg3: memref<1x800xf32, #tpu.memory_space<vmem>>, %arg4: memref<800x32xf32, #tpu.memory_space<vmem>>, %arg5: memref<2x16xf32, #tpu.memory_space<vmem>>, %arg6: memref<32x1xf32, #tpu.memory_space<vmem>>, %arg7: memref<1x1xf32, #tpu.memory_space<vmem>>, %arg8: memref<2x1xf32, #tpu.memory_space<vmem>>) attributes {dimension_semantics = [#tpu.dimension_semantics<arbitrary>], iteration_bounds = array<i64: 1>, scalar_prefetch = 0 : i64, scratch_operands = 0 : i64, tpu.core_type = #tpu.core_type<tc>, window_params = [{pipeline_mode = #tpu.pipeline_mode<synchronous>, transform_indices = @transform_0, window_bounds = array<i64: 16, 800>}, {pipeline_mode = #tpu.pipeline_mode<synchronous>, transform_indices = @transform_1, window_bounds = array<i64: 800, 800>}, {pipeline_mode = #tpu.pipeline_mode<synchronous>, transform_indices = @transform_2, window_bounds = array<i64: 1, 800>}, {pipeline_mode = #tpu.pipeline_mode<synchronous>, transform_indices = @transform_3, window_bounds = array<i64: 800, 32>}, {pipeline_mode = #tpu.pipeline_mode<synchronous>, transform_indices = @transform_4, window_bounds = array<i64: 2, 16>}, {pipeline_mode = #tpu.pipeline_mode<synchronous>, transform_indices = @transform_5, window_bounds = array<i64: 32, 1>}, {pipeline_mode = #tpu.pipeline_mode<synchronous>, transform_indices = @transform_6, window_bounds = array<i64: 1, 1>}, {pipeline_mode = #tpu.pipeline_mode<synchronous>, transform_indices = @transform_7, window_bounds = array<i64: 2, 1>}]} {
    %c0 = arith.constant 0 : index
    %c0_0 = arith.constant 0 : index
    %0 = vector.load %arg1[%c0, %c0_0] : memref<16x800xf32, #tpu.memory_space<vmem>>, vector<16x800xf32>
    %c0_1 = arith.constant 0 : index
    %c0_2 = arith.constant 0 : index
    %1 = vector.load %arg2[%c0_1, %c0_2] : memref<800x800xf32, #tpu.memory_space<vmem>>, vector<800x800xf32>
    %cst = arith.constant dense<0.000000e+00> : vector<16x800xf32>
    %2 = tpu.matmul %0, %1, %cst {dimension_numbers = #tpu.dot_dimension_numbers<[1], [0], [0], [1], [0, 0, 1, 1], [], []>} : vector<16x800xf32>, vector<800x800xf32>, vector<16x800xf32> -> vector<16x800xf32>
    %c0_3 = arith.constant 0 : index
    %c0_4 = arith.constant 0 : index
    %3 = vector.load %arg3[%c0_3, %c0_4] : memref<1x800xf32, #tpu.memory_space<vmem>>, vector<1x800xf32>
    %4 = vector.broadcast %3 : vector<1x800xf32> to vector<16x800xf32>
    %5 = arith.addf %2, %4 : vector<16x800xf32>
    %6 = arith.negf %5 : vector<16x800xf32>
    %7 = math.exp %6 : vector<16x800xf32>
    %cst_5 = arith.constant 1.000000e+00 : f32
    %8 = vector.broadcast %cst_5 : f32 to vector<16x800xf32>
    %9 = arith.addf %8, %7 : vector<16x800xf32>
    %10 = arith.divf %8, %9 : vector<16x800xf32>
    %c0_6 = arith.constant 0 : index
    %c0_7 = arith.constant 0 : index
    %11 = vector.load %arg4[%c0_6, %c0_7] : memref<800x32xf32, #tpu.memory_space<vmem>>, vector<800x32xf32>
    %cst_8 = arith.constant dense<0.000000e+00> : vector<16x32xf32>
    %12 = tpu.matmul %10, %11, %cst_8 {dimension_numbers = #tpu.dot_dimension_numbers<[1], [0], [0], [1], [0, 0, 1, 1], [], []>} : vector<16x800xf32>, vector<800x32xf32>, vector<16x32xf32> -> vector<16x32xf32>
    %c0_9 = arith.constant 0 : index
    %c0_10 = arith.constant 0 : index
    %13 = vector.load %arg5[%c0_9, %c0_10] : memref<2x16xf32, #tpu.memory_space<vmem>>, vector<2x16xf32>
    %cst_11 = arith.constant dense<0.000000e+00> : vector<2x32xf32>
    %14 = tpu.matmul %13, %12, %cst_11 {dimension_numbers = #tpu.dot_dimension_numbers<[1], [0], [0], [1], [0, 0, 1, 1], [], []>} : vector<2x16xf32>, vector<16x32xf32>, vector<2x32xf32> -> vector<2x32xf32>
    %c0_12 = arith.constant 0 : index
    %c0_13 = arith.constant 0 : index
    %15 = vector.load %arg6[%c0_12, %c0_13] : memref<32x1xf32, #tpu.memory_space<vmem>>, vector<32x1xf32>
    %cst_14 = arith.constant dense<0.000000e+00> : vector<2x1xf32>
    %16 = tpu.matmul %14, %15, %cst_14 {dimension_numbers = #tpu.dot_dimension_numbers<[1], [0], [0], [1], [0, 0, 1, 1], [], []>} : vector<2x32xf32>, vector<32x1xf32>, vector<2x1xf32> -> vector<2x1xf32>
    %c0_15 = arith.constant 0 : index
    %c0_16 = arith.constant 0 : index
    %17 = vector.load %arg7[%c0_15, %c0_16] : memref<1x1xf32, #tpu.memory_space<vmem>>, vector<1x1xf32>
    %18 = vector.broadcast %17 : vector<1x1xf32> to vector<2x1xf32>
    %19 = arith.addf %16, %18 : vector<2x1xf32>
    %c0_17 = arith.constant 0 : index
    %c0_18 = arith.constant 0 : index
    %20 = vector.load %arg8[%c0_17, %c0_18] : memref<2x1xf32, #tpu.memory_space<vmem>>, vector<2x1xf32>
    tpu.vector_store %arg8[%c0_17, %c0_18], %19 {strides = array<i32>} : memref<2x1xf32, #tpu.memory_space<vmem>>, vector<2x1xf32>,
    return
  }
  func.func @transform_0(%arg0: i32) -> (i32, i32) {
    %c0_i32 = arith.constant 0 : i32
    %c0_i32_0 = arith.constant 0 : i32
    %c0_i32_1 = arith.constant 0 : i32
    return %c0_i32, %c0_i32_0 : i32, i32
  }
  func.func @transform_1(%arg0: i32) -> (i32, i32) {
    %c0_i32 = arith.constant 0 : i32
    %c0_i32_0 = arith.constant 0 : i32
    %c0_i32_1 = arith.constant 0 : i32
    return %c0_i32, %c0_i32_0 : i32, i32
  }
  func.func @transform_2(%arg0: i32) -> (i32, i32) {
    %c0_i32 = arith.constant 0 : i32
    %c0_i32_0 = arith.constant 0 : i32
    %c0_i32_1 = arith.constant 0 : i32
    return %c0_i32, %c0_i32_0 : i32, i32
  }
  func.func @transform_3(%arg0: i32) -> (i32, i32) {
    %c0_i32 = arith.constant 0 : i32
    %c0_i32_0 = arith.constant 0 : i32
    %c0_i32_1 = arith.constant 0 : i32
    return %c0_i32, %c0_i32_0 : i32, i32
  }
  func.func @transform_4(%arg0: i32) -> (i32, i32) {
    %c0_i32 = arith.constant 0 : i32
    %c0_i32_0 = arith.constant 0 : i32
    %c0_i32_1 = arith.constant 0 : i32
    return %c0_i32, %c0_i32_0 : i32, i32
  }
  func.func @transform_5(%arg0: i32) -> (i32, i32) {
    %c0_i32 = arith.constant 0 : i32
    %c0_i32_0 = arith.constant 0 : i32
    %c0_i32_1 = arith.constant 0 : i32
    return %c0_i32, %c0_i32_0 : i32, i32
  }
  func.func @transform_6(%arg0: i32) -> (i32, i32) {
    %c0_i32 = arith.constant 0 : i32
    %c0_i32_0 = arith.constant 0 : i32
    %c0_i32_1 = arith.constant 0 : i32
    return %c0_i32, %c0_i32_0 : i32, i32
  }
  func.func @transform_7(%arg0: i32) -> (i32, i32) {
    %c0_i32 = arith.constant 0 : i32
    %c0_i32_0 = arith.constant 0 : i32
    %c0_i32_1 = arith.constant 0 : i32
    return %c0_i32, %c0_i32_0 : i32, i32
  }
}

</mosaic_0001>

<bundles_post_ra>
// kernel: _lambda_.4
= control target key start
LH: loop header
LB: loop body
LE: loop exit
PB: predicated region body
PF: predicated region fallthrough
CT: control target
= control target key end

     0   :  { %10 = vsyncpa [#allocation4], 0  ;;  %s223_s0 = inlined_call_operand.<no memory space> [shape: f32[1], index: 0, kind: input, shape index: {}]   ;;  %s224_s1 = inlined_call_operand.hbm [shape: f32[8,8], index: 1, kind: input, shape index: {}]   ;;  %s225_s2 = inlined_call_operand.hbm [shape: f32[8,72], index: 2, kind: input, shape index: {}]   ;;  %s226_s3 = inlined_call_operand.hbm [shape: f32[1,72], index: 3, kind: input, shape index: {}]   ;;  %s227_s4 = inlined_call_operand.vmem [shape: f32[8,72], index: 4, kind: output, shape index: {}]  }
   0x1   :  { %11 = vsyncpa [#allocation6], 0  ;;  %s30_s17 = sshll.u32 %s225_s2, 4  ;;  %s180_s18 = smov [#allocation5]   ;;  %s31_s17 = int_to_ptr.hbm [resolvable:$true] %s30_s17 }
   0x2   :  { %s32_s19 = sshll.u32 %s180_s18, 4  ;;  %s19_s22 = sshll.u32 %s224_s1, 4  ;;  %s33_s19 = int_to_ptr.vmem [resolvable:$true] %s32_s19  ;;  %s20_s22 = int_to_ptr.hbm [resolvable:$true] %s19_s22 }
   0x3   :  { %35 = dma.hbm_to_vmem [thread:$0]  %s31_s17, 128, %s33_s19, [#allocation6]  }
   0x4   :  { %s181_s23 = smov [#allocation3]   ;;  %s41_s27 = sshll.u32 %s226_s3, 4  ;;  %s42_s27 = int_to_ptr.hbm [resolvable:$true] %s41_s27 }
   0x5   :  { %s21_s24 = sshll.u32 %s181_s23, 4  ;;  %s182_s2 = smov [#allocation7]   ;;  %s22_s24 = int_to_ptr.vmem [resolvable:$true] %s21_s24 }
   0x6   :  { %24 = dma.hbm_to_vmem [thread:$0]  %s20_s22, 128, %s22_s24, [#allocation4]  }
   0x7   :  { %s43_s28 = sshll.u32 %s182_s2, 4  ;;  %s44_s28 = int_to_ptr.vmem [resolvable:$true] %s43_s28 }
   0x8   :  { %46 = dma.hbm_to_vmem [thread:$0]  %s42_s27, 16, %s44_s28, [#allocation6]  }
   0x9   :  { %176 = dma.done.wait [#allocation4], 128  }
   0xa   :  { %177 = vsyncadd [#allocation4], 4294967168 }
   0xb   :  { %178 = dma.done.wait [#allocation6], 144  }
   0xc   :  { %179 = vsyncadd [#allocation6], 4294967152  ;;  %vm68_vm0 = vcmask 64512   ;;  %v60_v0 = vld [vmem:[#allocation5] sm:$0xff]  ;;  %v59_v1 = vld [vmem:[#allocation3] sm:$0xff]  ;;  %v63_v3 = vstv %s223_s0  ;;  %vm92_vm1 = vcmask 588800  }
   0xd   :  { %87 = vmatpush.msra.mxu0 %v60_v0  ;;  %v62_v2 = vld [vmem:[#allocation7] sm:$0x1] }
   0xe   :  { %100 = vmatmul.msk.f32.vlgmr.msra.gmra.mxu0 %vm68_vm0, %v59_v1  ;;  %v64_v4 = vmul.f32 %v63_v3, %v62_v2 }
  0x10   :  { %v66_v5 = vperm.slane %v64_v4, 0 }
  0x8b   :  { %v89_v6 = vpop.f32.mrf.mxu0 }
  0x8c   :  { %v90_v7 = vadd.f32 %v89_v6, %v66_v5 }
  0x8e   :  { %93 = vst.msk [vmem:[%s227_s4] sm:$0xff] %vm92_vm1, %v90_v7 }
  0x8f   :  { %98 = vsyncpa [#allocation4], 1 }
  0x90   :  { %99 = vsyncpa [#allocation6], 1 }

// kernel: _lambda_.5
= control target key start
LH: loop header
LB: loop body
LE: loop exit
PB: predicated region body
PF: predicated region fallthrough
CT: control target
= control target key end

     0   :  { %8 = vsyncpa [#allocation3], 0  ;;  %s479_s0 = inlined_call_operand.vmem [shape: f32[16,36], index: 0, kind: input, shape index: {}]   ;;  %s480_s1 = inlined_call_operand.hbm [shape: f32[36,288], index: 1, kind: input, shape index: {}]   ;;  %s481_s2 = inlined_call_operand.hbm [shape: f32[1,288], index: 2, kind: input, shape index: {}]   ;;  %s482_s3 = inlined_call_operand.vmem [shape: f32[16,288], index: 3, kind: output, shape index: {}]  }
   0x1   :  { %s16_s14 = sshll.u32 %s480_s1, 4  ;;  %s17_s14 = int_to_ptr.hbm [resolvable:$true] %s16_s14 }
   0x2   :  { %9 = vsyncpa [#allocation5], 0  ;;  %s382_s15 = smov [#allocation2]   ;;  %s30_s19 = sshll.u32 %s481_s2, 4  ;;  %s31_s19 = int_to_ptr.hbm [resolvable:$true] %s30_s19 }
   0x3   :  { %s18_s16 = sshll.u32 %s382_s15, 4  ;;  %s383_s20 = smov 384   ;;  %s19_s16 = int_to_ptr.vmem [resolvable:$true] %s18_s16 }
   0x4   :  { %s384_s21 = smov 24   ;;  %s385_s22 = smov [#allocation4]  }
   0x5   :  { %24 = dma.hbm_to_vmem [thread:$0]  %s17_s14, 1920, %s19_s16, [#allocation3], %s383_s20, %s383_s20, %s384_s21  }
   0x6   :  { %s32_s23 = sshll.u32 %s385_s22, 4  ;;  %s33_s23 = int_to_ptr.vmem [resolvable:$true] %s32_s23 }
   0x7   :  { %35 = dma.hbm_to_vmem [thread:$0]  %s31_s19, 48, %s33_s23, [#allocation5]  }
   0x8   :  { %378 = dma.done.wait [#allocation3], 1920  }
   0x9   :  { %379 = vsyncadd [#allocation3], 4294965376 }
   0xa   :  { %380 = dma.done.wait [#allocation5], 48  }
   0xb   :  { %381 = vsyncadd [#allocation5], 4294967248  ;;  %vm76_vm0 = vcmask 1043456   ;;  %v58_v0 = vld [vmem:[#allocation2 + $0x60] sm:$0xf]  ;;  %v55_v3 = vld [vmem:[#allocation2 + $0x48] sm:$0xff] }
   0xc   :  { %v59_v1 = vld [vmem:[#allocation2 + $0x68] sm:$0xf]  ;;  %v60_v2 = vld [vmem:[#allocation2 + $0x70] sm:$0xf]  ;;  %297 = vmatpush.msk.msra.mxu3 %vm76_vm0, %v58_v0  ;;  %v57_v5 = vld [vmem:[#allocation2 + $0x58] sm:$0xff]  ;;  %282 = vmatpush.msk.msra.mxu0 %vm76_vm0, %v58_v0  ;;  %vm69_vm1 = vcmask 293888  }
   0xd   :  { %285 = vmatpush.msk.msra.mxu1 %vm76_vm0, %v59_v1  ;;  %v56_v4 = vld [vmem:[#allocation2 + $0x50] sm:$0xff]  ;;  %288 = vmatpush.msk.msra.mxu2 %vm76_vm0, %v60_v2  ;;  %v53_v7 = vld [vmem:[#allocation2 + $0x38] sm:$0xff]  ;;  %v54_v8 = vld [vmem:[#allocation2 + $0x40] sm:$0xff]  ;;  %vm271_vm9 = vcmask 261120  }
   0xe   :  { %v52_v6 = vld [vmem:[#allocation2 + $0x30] sm:$0xff]  ;;  %298 = vmatpush.msra.mxu3 %v55_v3  ;;  %98 = vmatpush.msra.mxu0 %v55_v3  ;;  %v49_v9 = vld [vmem:[#allocation2 + $0x18] sm:$0xff]  ;;  %v50_v10 = vld [vmem:[#allocation2 + $0x20] sm:$0xff] }
   0xf   :  { %121 = vmatpush.msra.mxu1 %v56_v4  ;;  %144 = vmatpush.msra.mxu2 %v57_v5  ;;  %v51_v11 = vld [vmem:[#allocation2 + $0x28] sm:$0xff]  ;;  %v46_v12 = vld [vmem:[#allocation2] sm:$0xff]  ;;  %v48_v14 = vld [vmem:[#allocation2 + $0x10] sm:$0xff] }
  0x10   :  { %299 = vmatpush.msra.mxu3 %v52_v6  ;;  %99 = vmatpush.msra.mxu0 %v52_v6  ;;  %v47_v13 = vld [vmem:[#allocation2 + $0x8] sm:$0xff]  ;;  %v44_v16 = vld [vmem:[%s479_s0] sm:$0xff]  ;;  %v61_v17 = vld [vmem:[#allocation4] sm:$0x7] }
  0x11   :  { %122 = vmatpush.msra.mxu1 %v53_v7  ;;  %145 = vmatpush.msra.mxu2 %v54_v8  ;;  %v45_v15 = vld [vmem:[%s479_s0 + $0x8] sm:$0xff]  ;;  %v64_v18 = vperm.slane %v61_v17, 1  ;;  %v63_v19 = vperm.slane %v61_v17, 0  ;;  %v65_v26 = vperm.slane %v61_v17, 2 }
  0x12   :  { %300 = vmatpush.msra.mxu3 %v49_v9  ;;  %100 = vmatpush.msra.mxu0 %v49_v9 }
  0x13   :  { %123 = vmatpush.msra.mxu1 %v50_v10  ;;  %146 = vmatpush.msra.mxu2 %v51_v11 }
  0x14   :  { %301 = vmatpush.msra.mxu3 %v46_v12  ;;  %101 = vmatpush.msra.mxu0 %v46_v12 }
  0x15   :  { %124 = vmatpush.msra.mxu1 %v47_v13  ;;  %147 = vmatpush.msra.mxu2 %v48_v14 }
  0x16   :  { %284 = vmatmul.msk.f32.vlgmr.msra.gmra.mxu3 %vm69_vm1, %v45_v15  ;;  %286 = vmatmul.msk.f32.vlgmr.msra.gmra.mxu1 %vm69_vm1, %v44_v16 }
  0x17   :  { %289 = vmatmul.msk.f32.vlgmr.msra.gmra.mxu2 %vm69_vm1, %v44_v16  ;;  %283 = vmatmul.msk.f32.vlgmr.msra.gmra.mxu0 %vm69_vm1, %v44_v16 }
  0x1e   :  { %287 = vmatmul.msk.f32.gmra.mxu1 %vm69_vm1, %v45_v15 }
  0x1f   :  { %290 = vmatmul.msk.f32.gmra.mxu2 %vm69_vm1, %v45_v15 }
  0x93   :  { %v126_v20 = vpop.f32.mrf.mxu1 }
  0x94   :  { %v127_v21 = vadd.f32 %v126_v20, %v64_v18  ;;  %v103_v22 = vpop.f32.mrf.mxu0 }
  0x95   :  { %v104_v23 = vadd.f32 %v103_v22, %v63_v19 }
  0x96   :  { %v292_v24 = vmul.f32 -1.442695, %v127_v21 }
  0x97   :  { %v291_v25 = vmul.f32 -1.442695, %v104_v23 }
  0x98   :  { %306 = vpow2.f32 %v292_v24 }
  0x99   :  { %308 = vpow2.f32 %v291_v25  ;;  %v106_v27 = vpop.f32.mrf.mxu3 }
  0x9a   :  { %v107_v28 = vadd.f32 %v106_v27, %v63_v19  ;;  %v149_v29 = vpop.f32.mrf.mxu2 }
  0x9b   :  { %v150_v30 = vadd.f32 %v149_v29, %v65_v26  ;;  %v129_v31 = vpop.f32.mrf.mxu1 }
  0x9c   :  { %v294_v32 = vmul.f32 -1.442695, %v107_v28  ;;  %v130_v33 = vadd.f32 %v129_v31, %v64_v18 }
  0x9d   :  { %v293_v34 = vmul.f32 -1.442695, %v150_v30 }
  0x9e   :  { %v307_v35 = vpop.eup %306  ;;  %310 = vpow2.f32 %v294_v32  ;;  %v295_v36 = vmul.f32 -1.442695, %v130_v33 }
  0x9f   :  { %v309_v37 = vpop.eup %308  ;;  %v174_v38 = vadd.f32 1.0, %v307_v35  ;;  %312 = vpow2.f32 %v293_v34 }
  0xa0   :  { %v173_v39 = vadd.f32 1.0, %v309_v37  ;;  %314 = vpow2.f32 %v295_v36 }
  0xa1   :  { %316 = vrcp.f32 %v174_v38  ;;  %v203_v51 = vand.u32 2147483647, %v174_v38  ;;  %v205_v52 = vand.u32 2147483648, %v174_v38  ;;  %vm199_vm4 = vweird.f32 %v174_v38 }
  0xa2   :  { %318 = vrcp.f32 %v173_v39  ;;  %v152_v40 = vpop.f32.mrf.mxu2  ;;  %v188_v55 = vand.u32 2147483647, %v173_v39  ;;  %v190_v56 = vand.u32 2147483648, %v173_v39  ;;  %vm184_vm2 = vweird.f32 %v173_v39 }
  0xa3   :  { %v153_v41 = vadd.f32 %v152_v40, %v65_v26  ;;  %vm427_vm6 = vcmp.eq.f32.partialorder %v203_v51, 8.507059e+37  ;;  %v206_v62 = vor.u32 1.1754944e-38, %v205_v52 }
  0xa4   :  { %v311_v42 = vpop.eup %310  ;;  %vm435_vm8 = vcmp.eq.f32.partialorder %v188_v55, 8.507059e+37  ;;  %v191_v4 = vor.u32 1.1754944e-38, %v190_v56 }
  0xa5   :  { %v313_v43 = vpop.eup %312  ;;  %v418_v44 = vadd.f32 1.0, %v311_v42  ;;  %v296_v48 = vmul.f32 -1.442695, %v153_v41 }
  0xa6   :  { %v315_v45 = vpop.eup %314  ;;  %v420_v46 = vadd.f32 1.0, %v313_v43 }
  0xa7   :  { %v317_v47 = vpop.eup %316  ;;  %320 = vrcp.f32 %v418_v44  ;;  %v424_v57 = vadd.f32 1.0, %v315_v45  ;;  %vm229_vm11 = vweird.f32 %v418_v44  ;;  %v233_v7 = vand.u32 2147483647, %v418_v44 }
  0xa8   :  { %v319_v49 = vpop.eup %318  ;;  %v195_v50 = vmul.f32 %v317_v47, %v174_v38  ;;  %322 = vrcp.f32 %v420_v46  ;;  %vm200_vm5 = vweird.f32 %v317_v47  ;;  %v235_v11 = vand.u32 2147483648, %v418_v44 }
  0xa9   :  { %v180_v53 = vmul.f32 %v319_v49, %v173_v39  ;;  %vm185_vm3 = vweird.f32 %v319_v49  ;;  %324 = vpow2.f32 %v296_v48  ;;  %vm201_vm10 = vmor %vm199_vm4, %vm200_vm5  ;;  %v218_v12 = vand.u32 2147483647, %v420_v46 }
  0xaa   :  { %v196_v54 = vsub.f32 1.0, %v195_v50  ;;  %326 = vrcp.f32 %v424_v57  ;;  %vm431_vm7 = vmor %vm184_vm2, %vm185_vm3  ;;  %v220_v17 = vand.u32 2147483648, %v420_v46  ;;  %vm214_vm13 = vweird.f32 %v420_v46 }
  0xab   :  { %v181_v58 = vsub.f32 1.0, %v180_v53  ;;  %vm234_vm15 = vcmp.eq.f32.partialorder %v233_v7, 8.507059e+37  ;;  %v236_v25 = vor.u32 1.1754944e-38, %v235_v11  ;;  %vm219_vm1 = vcmp.eq.f32.partialorder %v218_v12, 8.507059e+37 }
  0xac   :  { %v197_v59 = vmul.f32 %v317_v47, %v196_v54  ;;  %v221_v27 = vor.u32 1.1754944e-38, %v220_v17  ;;  %vm244_vm3 = vweird.f32 %v424_v57  ;;  %v248_v30 = vand.u32 2147483647, %v424_v57 }
  0xad   :  { %v321_v60 = vpop.eup %320  ;;  %v182_v63 = vmul.f32 %v319_v49, %v181_v58  ;;  %v250_v31 = vand.u32 2147483648, %v424_v57 }
  0xae   :  { %v323_v0 = vpop.eup %322  ;;  %v198_v1 = vadd.f32 %v317_v47, %v197_v59  ;;  %v225_v5 = vmul.f32 %v321_v60, %v418_v44  ;;  %vm230_vm12 = vweird.f32 %v321_v60 }
  0xaf   :  { %v183_v6 = vadd.f32 %v319_v49, %v182_v63  ;;  %v210_v8 = vmul.f32 %v323_v0, %v420_v46  ;;  %v325_v13 = vpop.eup %324  ;;  %vm215_vm14 = vweird.f32 %v323_v0  ;;  %vm231_vm0 = vmor %vm229_vm11, %vm230_vm12  ;;  %v251_v38 = vor.u32 1.1754944e-38, %v250_v31 }
  0xb0   :  { %v202_v9 = vsel %vm201_vm10, %v317_v47, %v198_v1  ;;  %v226_v10 = vsub.f32 1.0, %v225_v5  ;;  %v327_v18 = vpop.eup %326  ;;  %v178_v21 = vadd.f32 1.0, %v325_v13  ;;  %vm216_vm2 = vmor %vm214_vm13, %vm215_vm14 }
  0xb1   :  { %v207_v14 = vsel %vm427_vm6, %v206_v62, %v202_v9  ;;  %v187_v15 = vsel %vm431_vm7, %v319_v49, %v183_v6  ;;  %v211_v16 = vsub.f32 1.0, %v210_v8  ;;  %v240_v23 = vmul.f32 %v327_v18, %v424_v57 }
  0xb2   :  { %270 = vst [vmem:[%s482_s3 + $0x8] sm:$0xff] %v207_v14  ;;  %v192_v19 = vsel %vm435_vm8, %v191_v4, %v187_v15  ;;  %v227_v20 = vmul.f32 %v321_v60, %v226_v10  ;;  %328 = vrcp.f32 %v178_v21  ;;  %vm245_vm4 = vweird.f32 %v327_v18 }
  0xb3   :  { %269 = vst [vmem:[%s482_s3] sm:$0xff] %v192_v19  ;;  %v212_v22 = vmul.f32 %v323_v0, %v211_v16  ;;  %v241_v28 = vsub.f32 1.0, %v240_v23  ;;  %vm246_vm5 = vmor %vm244_vm3, %vm245_vm4  ;;  %vm249_vm6 = vcmp.eq.f32.partialorder %v248_v30, 8.507059e+37  ;;  %v265_v43 = vand.u32 2147483648, %v178_v21 }
  0xb4   :  { %v228_v24 = vadd.f32 %v321_v60, %v227_v20  ;;  %v263_v45 = vand.u32 2147483647, %v178_v21  ;;  %vm259_vm8 = vweird.f32 %v178_v21 }
  0xb5   :  { %v213_v26 = vadd.f32 %v323_v0, %v212_v22  ;;  %v242_v34 = vmul.f32 %v327_v18, %v241_v28  ;;  %v266_v47 = vor.u32 1.1754944e-38, %v265_v43 }
  0xb6   :  { %v232_v29 = vsel %vm231_vm0, %v321_v60, %v228_v24  ;;  %vm264_vm11 = vcmp.eq.f32.partialorder %v263_v45, 8.507059e+37 }
  0xb7   :  { %v237_v32 = vsel %vm234_vm15, %v236_v25, %v232_v29  ;;  %v217_v33 = vsel %vm216_vm2, %v323_v0, %v213_v26  ;;  %v243_v36 = vadd.f32 %v327_v18, %v242_v34 }
  0xb8   :  { %273 = vst [vmem:[%s482_s3 + $0x18] sm:$0xff] %v237_v32  ;;  %v222_v35 = vsel %vm219_vm1, %v221_v27, %v217_v33  ;;  %v329_v37 = vpop.eup %328 }
  0xb9   :  { %272 = vst.msk [vmem:[%s482_s3 + $0x10] sm:$0xff] %vm271_vm9, %v222_v35  ;;  %v247_v39 = vsel %vm246_vm5, %v327_v18, %v243_v36  ;;  %v255_v40 = vmul.f32 %v329_v37, %v178_v21  ;;  %vm260_vm7 = vweird.f32 %v329_v37 }
  0xba   :  { %v252_v41 = vsel %vm249_vm6, %v251_v38, %v247_v39  ;;  %vm261_vm10 = vmor %vm259_vm8, %vm260_vm7 }
  0xbb   :  { %274 = vst [vmem:[%s482_s3 + $0x20] sm:$0xff] %v252_v41  ;;  %v256_v42 = vsub.f32 1.0, %v255_v40 }
  0xbd   :  { %v257_v44 = vmul.f32 %v329_v37, %v256_v42 }
  0xbf   :  { %v258_v46 = vadd.f32 %v329_v37, %v257_v44 }
  0xc1   :  { %v262_v48 = vsel %vm261_vm10, %v329_v37, %v258_v46 }
  0xc2   :  { %v267_v49 = vsel %vm264_vm11, %v266_v47, %v262_v48 }
  0xc3   :  { %275 = vst.msk [vmem:[%s482_s3 + $0x28] sm:$0xff] %vm271_vm9, %v267_v49 }
  0xc4   :  { %280 = vsyncpa [#allocation3], 1 }
  0xc5   :  { %281 = vsyncpa [#allocation5], 1 }

// kernel: _lambda_.6
= control target key start
LH: loop header
LB: loop body
LE: loop exit
PB: predicated region body
PF: predicated region fallthrough
CT: control target
= control target key end

     0   :  { %10 = vsyncpa [#allocation4], 0  ;;  %s436_s0 = inlined_call_operand.<no memory space> [shape: f32[1], index: 0, kind: input, shape index: {}]   ;;  %s437_s1 = inlined_call_operand.vmem [shape: f32[64,72], index: 1, kind: input, shape index: {}]   ;;  %s438_s2 = inlined_call_operand.hbm [shape: f32[72,200], index: 2, kind: input, shape index: {}]   ;;  %s439_s3 = inlined_call_operand.hbm [shape: f32[1,200], index: 3, kind: input, shape index: {}]   ;;  %s440_s4 = inlined_call_operand.vmem [shape: f32[64,200], index: 4, kind: output, shape index: {}]  }
   0x1   :  { %s20_s17 = sshll.u32 %s438_s2, 4  ;;  %s21_s17 = int_to_ptr.hbm [resolvable:$true] %s20_s17 }
   0x2   :  { %11 = vsyncpa [#allocation6], 0  ;;  %s302_s18 = smov [#allocation3]   ;;  %s34_s22 = sshll.u32 %s439_s3, 4  ;;  %s35_s22 = int_to_ptr.hbm [resolvable:$true] %s34_s22 }
   0x3   :  { %s22_s19 = sshll.u32 %s302_s18, 4  ;;  %s303_s23 = smov 256   ;;  %s23_s19 = int_to_ptr.vmem [resolvable:$true] %s22_s19 }
   0x4   :  { %s304_s24 = smov 16   ;;  %s305_s25 = smov [#allocation5]  }
   0x5   :  { %28 = dma.hbm_to_vmem [thread:$0]  %s21_s17, 2304, %s23_s19, [#allocation4], %s303_s23, %s303_s23, %s304_s24  }
   0x6   :  { %s36_s26 = sshll.u32 %s305_s25, 4  ;;  %s37_s26 = int_to_ptr.vmem [resolvable:$true] %s36_s26 }
   0x7   :  { %39 = dma.hbm_to_vmem [thread:$0]  %s35_s22, 32, %s37_s26, [#allocation6]  }
   0x8   :  { %298 = dma.done.wait [#allocation4], 2304  }
   0x9   :  { %299 = vsyncadd [#allocation4], 4294964992 }
   0xa   :  { %300 = dma.done.wait [#allocation6], 32  }
   0xb   :  { %301 = vsyncadd [#allocation6], 4294967264  ;;  %v72_v0 = vld [vmem:[#allocation3 + $0x80] sm:$0xff]  ;;  %v73_v1 = vld [vmem:[#allocation3 + $0x88] sm:$0xff]  ;;  %vm83_vm0 = vcmask 588800   ;;  %v76_v27 = vstv %s436_s0 }
   0xc   :  { %v70_v2 = vld [vmem:[#allocation3 + $0x70] sm:$0xff]  ;;  %228 = vmatpush.msra.mxu2 %v72_v0  ;;  %237 = vmatpush.msra.mxu3 %v73_v1  ;;  %v71_v3 = vld [vmem:[#allocation3 + $0x78] sm:$0xff]  ;;  %v68_v4 = vld [vmem:[#allocation3 + $0x60] sm:$0xff] }
   0xd   :  { %v69_v5 = vld [vmem:[#allocation3 + $0x68] sm:$0xff]  ;;  %115 = vmatpush.msra.mxu0 %v72_v0  ;;  %156 = vmatpush.msra.mxu1 %v73_v1  ;;  %v66_v6 = vld [vmem:[#allocation3 + $0x50] sm:$0xff]  ;;  %v67_v7 = vld [vmem:[#allocation3 + $0x58] sm:$0xff] }
   0xe   :  { %229 = vmatpush.msra.mxu2 %v70_v2  ;;  %238 = vmatpush.msra.mxu3 %v71_v3  ;;  %v64_v8 = vld [vmem:[#allocation3 + $0x40] sm:$0xff]  ;;  %v65_v9 = vld [vmem:[#allocation3 + $0x48] sm:$0xff]  ;;  %v62_v10 = vld [vmem:[#allocation3 + $0x30] sm:$0xff] }
   0xf   :  { %116 = vmatpush.msra.mxu0 %v70_v2  ;;  %157 = vmatpush.msra.mxu1 %v71_v3  ;;  %v63_v11 = vld [vmem:[#allocation3 + $0x38] sm:$0xff]  ;;  %v60_v12 = vld [vmem:[#allocation3 + $0x20] sm:$0xff]  ;;  %v61_v13 = vld [vmem:[#allocation3 + $0x28] sm:$0xff] }
  0x10   :  { %230 = vmatpush.msra.mxu2 %v68_v4  ;;  %239 = vmatpush.msra.mxu3 %v69_v5  ;;  %v58_v14 = vld [vmem:[#allocation3 + $0x10] sm:$0xff]  ;;  %v59_v15 = vld [vmem:[#allocation3 + $0x18] sm:$0xff]  ;;  %v56_v16 = vld [vmem:[#allocation3] sm:$0xff] }
  0x11   :  { %117 = vmatpush.msra.mxu0 %v68_v4  ;;  %158 = vmatpush.msra.mxu1 %v69_v5  ;;  %v57_v17 = vld [vmem:[#allocation3 + $0x8] sm:$0xff]  ;;  %v52_v18 = vld [vmem:[%s437_s1 + $0x20] sm:$0xff]  ;;  %v54_v22 = vld [vmem:[%s437_s1 + $0x30] sm:$0xff] }
  0x12   :  { %231 = vmatpush.msra.mxu2 %v66_v6  ;;  %240 = vmatpush.msra.mxu3 %v67_v7  ;;  %v48_v19 = vld [vmem:[%s437_s1] sm:$0xff]  ;;  %v53_v20 = vld [vmem:[%s437_s1 + $0x28] sm:$0xff]  ;;  %v50_v23 = vld [vmem:[%s437_s1 + $0x10] sm:$0xff] }
  0x13   :  { %118 = vmatpush.msra.mxu0 %v66_v6  ;;  %159 = vmatpush.msra.mxu1 %v67_v7  ;;  %v49_v21 = vld [vmem:[%s437_s1 + $0x8] sm:$0xff]  ;;  %v55_v24 = vld [vmem:[%s437_s1 + $0x38] sm:$0xff]  ;;  %v75_v26 = vld [vmem:[#allocation5] sm:$0x3] }
  0x14   :  { %232 = vmatpush.msra.mxu2 %v64_v8  ;;  %241 = vmatpush.msra.mxu3 %v65_v9  ;;  %v51_v25 = vld [vmem:[%s437_s1 + $0x18] sm:$0xff]  ;;  %v77_v28 = vmul.f32 %v76_v27, %v75_v26 }
  0x15   :  { %119 = vmatpush.msra.mxu0 %v64_v8  ;;  %160 = vmatpush.msra.mxu1 %v65_v9 }
  0x16   :  { %233 = vmatpush.msra.mxu2 %v62_v10  ;;  %242 = vmatpush.msra.mxu3 %v63_v11  ;;  %v79_v29 = vperm.slane %v77_v28, 0  ;;  %v80_v30 = vperm.slane %v77_v28, 1 }
  0x17   :  { %120 = vmatpush.msra.mxu0 %v62_v10  ;;  %161 = vmatpush.msra.mxu1 %v63_v11 }
  0x18   :  { %234 = vmatpush.msra.mxu2 %v60_v12  ;;  %243 = vmatpush.msra.mxu3 %v61_v13 }
  0x19   :  { %121 = vmatpush.msra.mxu0 %v60_v12  ;;  %162 = vmatpush.msra.mxu1 %v61_v13 }
  0x1a   :  { %235 = vmatpush.msra.mxu2 %v58_v14  ;;  %244 = vmatpush.msra.mxu3 %v59_v15 }
  0x1b   :  { %122 = vmatpush.msra.mxu0 %v58_v14  ;;  %163 = vmatpush.msra.mxu1 %v59_v15 }
  0x1c   :  { %236 = vmatpush.msra.mxu2 %v56_v16  ;;  %245 = vmatpush.msra.mxu3 %v57_v17 }
  0x1d   :  { %216 = vmatmul.msk.f32.vlgmr.msra.gmra.mxu2 %vm83_vm0, %v52_v18  ;;  %224 = vmatmul.msk.f32.vlgmr.msra.gmra.mxu3 %vm83_vm0, %v52_v18 }
  0x1e   :  { %123 = vmatpush.msra.mxu0 %v56_v16  ;;  %164 = vmatpush.msra.mxu1 %v57_v17 }
  0x1f   :  { %212 = vmatmul.msk.f32.vlgmr.msra.gmra.mxu0 %vm83_vm0, %v48_v19  ;;  %220 = vmatmul.msk.f32.vlgmr.msra.gmra.mxu1 %vm83_vm0, %v48_v19 }
  0x25   :  { %217 = vmatmul.msk.f32.gmra.mxu2 %vm83_vm0, %v53_v20  ;;  %225 = vmatmul.msk.f32.gmra.mxu3 %vm83_vm0, %v53_v20 }
  0x27   :  { %213 = vmatmul.msk.f32.gmra.mxu0 %vm83_vm0, %v49_v21  ;;  %221 = vmatmul.msk.f32.gmra.mxu1 %vm83_vm0, %v49_v21 }
  0x2d   :  { %218 = vmatmul.msk.f32.gmra.mxu2 %vm83_vm0, %v54_v22  ;;  %226 = vmatmul.msk.f32.gmra.mxu3 %vm83_vm0, %v54_v22 }
  0x2f   :  { %214 = vmatmul.msk.f32.gmra.mxu0 %vm83_vm0, %v50_v23  ;;  %222 = vmatmul.msk.f32.gmra.mxu1 %vm83_vm0, %v50_v23 }
  0x35   :  { %219 = vmatmul.msk.f32.gmra.mxu2 %vm83_vm0, %v55_v24  ;;  %227 = vmatmul.msk.f32.gmra.mxu3 %vm83_vm0, %v55_v24 }
  0x37   :  { %215 = vmatmul.msk.f32.gmra.mxu0 %vm83_vm0, %v51_v25  ;;  %223 = vmatmul.msk.f32.gmra.mxu1 %vm83_vm0, %v51_v25 }
  0x9c   :  { %v125_v31 = vpop.f32.mrf.mxu0  ;;  %v166_v32 = vpop.f32.mrf.mxu1 }
  0x9d   :  { %v126_v33 = vadd.f32 %v125_v31, %v79_v29  ;;  %v167_v34 = vadd.f32 %v166_v32, %v80_v30 }
  0x9f   :  { %190 = vst [vmem:[%s440_s4] sm:$0xff] %v126_v33 }
  0xa0   :  { %v137_v35 = vpop.f32.mrf.mxu2  ;;  %191 = vst.msk [vmem:[%s440_s4 + $0x8] sm:$0xff] %vm83_vm0, %v167_v34  ;;  %v178_v36 = vpop.f32.mrf.mxu3 }
  0xa1   :  { %v138_v37 = vadd.f32 %v137_v35, %v79_v29  ;;  %v179_v38 = vadd.f32 %v178_v36, %v80_v30 }
  0xa3   :  { %198 = vst [vmem:[%s440_s4 + $0x40] sm:$0xff] %v138_v37 }
  0xa4   :  { %199 = vst.msk [vmem:[%s440_s4 + $0x48] sm:$0xff] %vm83_vm0, %v179_v38  ;;  %v128_v39 = vpop.f32.mrf.mxu0  ;;  %v169_v40 = vpop.f32.mrf.mxu1 }
  0xa5   :  { %v129_v41 = vadd.f32 %v128_v39, %v79_v29  ;;  %v170_v42 = vadd.f32 %v169_v40, %v80_v30 }
  0xa7   :  { %192 = vst [vmem:[%s440_s4 + $0x10] sm:$0xff] %v129_v41 }
  0xa8   :  { %v140_v43 = vpop.f32.mrf.mxu2  ;;  %193 = vst.msk [vmem:[%s440_s4 + $0x18] sm:$0xff] %vm83_vm0, %v170_v42  ;;  %v181_v44 = vpop.f32.mrf.mxu3 }
  0xa9   :  { %v141_v45 = vadd.f32 %v140_v43, %v79_v29  ;;  %v182_v46 = vadd.f32 %v181_v44, %v80_v30 }
  0xab   :  { %200 = vst [vmem:[%s440_s4 + $0x50] sm:$0xff] %v141_v45 }
  0xac   :  { %201 = vst.msk [vmem:[%s440_s4 + $0x58] sm:$0xff] %vm83_vm0, %v182_v46  ;;  %v131_v47 = vpop.f32.mrf.mxu0  ;;  %v172_v48 = vpop.f32.mrf.mxu1 }
  0xad   :  { %v132_v49 = vadd.f32 %v131_v47, %v79_v29  ;;  %v173_v50 = vadd.f32 %v172_v48, %v80_v30 }
  0xaf   :  { %194 = vst [vmem:[%s440_s4 + $0x20] sm:$0xff] %v132_v49 }
  0xb0   :  { %v143_v51 = vpop.f32.mrf.mxu2  ;;  %195 = vst.msk [vmem:[%s440_s4 + $0x28] sm:$0xff] %vm83_vm0, %v173_v50  ;;  %v184_v52 = vpop.f32.mrf.mxu3 }
  0xb1   :  { %v144_v53 = vadd.f32 %v143_v51, %v79_v29  ;;  %v185_v54 = vadd.f32 %v184_v52, %v80_v30 }
  0xb3   :  { %202 = vst [vmem:[%s440_s4 + $0x60] sm:$0xff] %v144_v53 }
  0xb4   :  { %203 = vst.msk [vmem:[%s440_s4 + $0x68] sm:$0xff] %vm83_vm0, %v185_v54  ;;  %v134_v55 = vpop.f32.mrf.mxu0  ;;  %v175_v56 = vpop.f32.mrf.mxu1 }
  0xb5   :  { %v135_v57 = vadd.f32 %v134_v55, %v79_v29  ;;  %v176_v58 = vadd.f32 %v175_v56, %v80_v30 }
  0xb7   :  { %196 = vst [vmem:[%s440_s4 + $0x30] sm:$0xff] %v135_v57 }
  0xb8   :  { %v146_v59 = vpop.f32.mrf.mxu2  ;;  %197 = vst.msk [vmem:[%s440_s4 + $0x38] sm:$0xff] %vm83_vm0, %v176_v58  ;;  %v187_v60 = vpop.f32.mrf.mxu3 }
  0xb9   :  { %v147_v61 = vadd.f32 %v146_v59, %v79_v29  ;;  %v188_v62 = vadd.f32 %v187_v60, %v80_v30 }
  0xbb   :  { %204 = vst [vmem:[%s440_s4 + $0x70] sm:$0xff] %v147_v61 }
  0xbc   :  { %205 = vst.msk [vmem:[%s440_s4 + $0x78] sm:$0xff] %vm83_vm0, %v188_v62 }
  0xbd   :  { %210 = vsyncpa [#allocation4], 1 }
  0xbe   :  { %211 = vsyncpa [#allocation6], 1 }

// kernel: _lambda_.7
= control target key start
LH: loop header
LB: loop body
LE: loop exit
PB: predicated region body
PF: predicated region fallthrough
CT: control target
= control target key end

     0   :  { %s3501_s0 = inlined_call_operand.vmem [shape: f32[16,800], index: 0, kind: input, shape index: {}]   ;;  %s3502_s1 = inlined_call_operand.hbm [shape: f32[800,800], index: 1, kind: input, shape index: {}]   ;;  %s3503_s2 = inlined_call_operand.hbm [shape: f32[1,800], index: 2, kind: input, shape index: {}]   ;;  %s3504_s3 = inlined_call_operand.hbm [shape: f32[800,32], index: 3, kind: input, shape index: {}]   ;;  %s3505_s4 = inlined_call_operand.vmem [shape: f32[2,16], index: 4, kind: input, shape index: {}]   ;;  %s3506_s5 = inlined_call_operand.hbm [shape: f32[32,1], index: 5, kind: input, shape index: {}]   ;;  %s3507_s6 = inlined_call_operand.<no memory space> [shape: f32[1,1], index: 6, kind: input, shape index: {}]   ;;  %s3508_s7 = inlined_call_operand.vmem [shape: f32[2,1], index: 7, kind: output, shape index: {}]  }
   0x1   :  { %v12_v0 = vstv %s3507_s6 }
   0x2   :  { %13 = vst [vmem:[#allocation2] sm:$0x1] %v12_v0 }
   0x3   :  { %14 = vsyncpa [#allocation4], 0 }
   0x4   :  { %15 = vsyncpa [#allocation6], 0  ;;  %s37_s28 = sshll.u32 %s3503_s2, 4  ;;  %s38_s28 = int_to_ptr.hbm [resolvable:$true] %s37_s28 }
   0x5   :  { %16 = vsyncpa [#allocation9], 0  ;;  %s2779_s29 = smov [#allocation5]   ;;  %s23_s10 = sshll.u32 %s3502_s1, 4  ;;  %s24_s10 = int_to_ptr.hbm [resolvable:$true] %s23_s10 }
   0x6   :  { %s39_s30 = sshll.u32 %s2779_s29, 4  ;;  %s2780_s11 = smov [#allocation3]   ;;  %s40_s30 = int_to_ptr.vmem [resolvable:$true] %s39_s30 }
   0x7   :  { %42 = dma.hbm_to_vmem [thread:$0]  %s38_s28, 112, %s40_s30, [#allocation6]  }
   0x8   :  { %s25_s6 = sshll.u32 %s2780_s11, 4  ;;  %s2781_s12 = smov 896   ;;  %s26_s6 = int_to_ptr.vmem [resolvable:$true] %s25_s6 }
   0x9   :  { %s2782_s13 = smov 56   ;;  %s47_s2 = sshll.u32 %s3504_s3, 4  ;;  %s48_s2 = int_to_ptr.hbm [resolvable:$true] %s47_s2 }
   0xa   :  { %31 = dma.hbm_to_vmem [thread:$0]  %s24_s10, 89600, %s26_s6, [#allocation4], %s2781_s12, %s2781_s12, %s2782_s13  }
   0xb   :  { %s2783_s16 = smov [#allocation7]   ;;  %s62_s1 = sshll.u32 %s3506_s5, 4  ;;  %s63_s1 = int_to_ptr.hbm [resolvable:$true] %s62_s1 }
   0xc   :  { %s49_s17 = sshll.u32 %s2783_s16, 4  ;;  %s2784_s20 = smov 128   ;;  %s50_s17 = int_to_ptr.vmem [resolvable:$true] %s49_s17 }
   0xd   :  { %s2785_s21 = smov 8   ;;  %s2786_s22 = smov [#allocation8]  }
   0xe   :  { %55 = dma.hbm_to_vmem [thread:$0]  %s48_s2, 12800, %s50_s17, [#allocation6], %s2784_s20, %s2784_s20, %s2785_s21  }
   0xf   :  { %s64_s23 = sshll.u32 %s2786_s22, 4  ;;  %s65_s23 = int_to_ptr.vmem [resolvable:$true] %s64_s23 }
  0x10   :  { %70 = dma.hbm_to_vmem [thread:$0]  %s63_s1, 512, %s65_s23, [#allocation9], %s2784_s20, %s2784_s20, %s2785_s21  }
  0x11   :  { %2773 = dma.done.wait [#allocation4], 89600  }
  0x12   :  { %2774 = vsyncadd [#allocation4], 4294877696 }
  0x13   :  { %2775 = dma.done.wait [#allocation6], 12912  }
  0x14   :  { %2776 = vsyncadd [#allocation6], 4294954384 }
  0x15   :  { %2777 = dma.done.wait [#allocation9], 512  }
  0x16   :  { %2778 = vsyncadd [#allocation9], 4294966784  ;;  %v208_v1 = vld [vmem:[#allocation3 + $0x348] sm:$0xff]  ;;  %v201_v5 = vld [vmem:[#allocation3 + $0x310] sm:$0xff]  ;;  %vm819_vm0 = vcmask 261120  }
  0x17   :  { %v320_v2 = vld [vmem:[#allocation3 + $0x6c8] sm:$0xff]  ;;  %826 = vmatpush.msra.mxu0 %v208_v1  ;;  %v313_v6 = vld [vmem:[#allocation3 + $0x690] sm:$0xff]  ;;  %v194_v9 = vld [vmem:[#allocation3 + $0x2d8] sm:$0xff] }
  0x18   :  { %v432_v3 = vld [vmem:[#allocation3 + $0xa48] sm:$0xff]  ;;  %849 = vmatpush.msra.mxu1 %v320_v2  ;;  %v425_v7 = vld [vmem:[#allocation3 + $0xa10] sm:$0xff]  ;;  %v306_v10 = vld [vmem:[#allocation3 + $0x658] sm:$0xff] }
  0x19   :  { %v544_v4 = vld [vmem:[#allocation3 + $0xdc8] sm:$0xff]  ;;  %872 = vmatpush.msra.mxu2 %v432_v3  ;;  %v537_v8 = vld [vmem:[#allocation3 + $0xd90] sm:$0xff]  ;;  %827 = vmatpush.msra.mxu0 %v201_v5  ;;  %v418_v11 = vld [vmem:[#allocation3 + $0x9d8] sm:$0xff] }
  0x1a   :  { %895 = vmatpush.msra.mxu3 %v544_v4  ;;  %850 = vmatpush.msra.mxu1 %v313_v6  ;;  %v530_v12 = vld [vmem:[#allocation3 + $0xd58] sm:$0xff]  ;;  %v187_v13 = vld [vmem:[#allocation3 + $0x2a0] sm:$0xff]  ;;  %v180_v17 = vld [vmem:[#allocation3 + $0x268] sm:$0xff] }
  0x1b   :  { %873 = vmatpush.msra.mxu2 %v425_v7  ;;  %v299_v14 = vld [vmem:[#allocation3 + $0x620] sm:$0xff]  ;;  %828 = vmatpush.msra.mxu0 %v194_v9  ;;  %v292_v18 = vld [vmem:[#allocation3 + $0x5e8] sm:$0xff]  ;;  %v173_v21 = vld [vmem:[#allocation3 + $0x230] sm:$0xff] }
  0x1c   :  { %896 = vmatpush.msra.mxu3 %v537_v8  ;;  %851 = vmatpush.msra.mxu1 %v306_v10  ;;  %v411_v15 = vld [vmem:[#allocation3 + $0x9a0] sm:$0xff]  ;;  %v404_v19 = vld [vmem:[#allocation3 + $0x968] sm:$0xff]  ;;  %v285_v22 = vld [vmem:[#allocation3 + $0x5b0] sm:$0xff] }
  0x1d   :  { %v523_v16 = vld [vmem:[#allocation3 + $0xd20] sm:$0xff]  ;;  %874 = vmatpush.msra.mxu2 %v418_v11  ;;  %829 = vmatpush.msra.mxu0 %v187_v13  ;;  %v516_v20 = vld [vmem:[#allocation3 + $0xce8] sm:$0xff]  ;;  %v397_v23 = vld [vmem:[#allocation3 + $0x930] sm:$0xff] }
  0x1e   :  { %897 = vmatpush.msra.mxu3 %v530_v12  ;;  %852 = vmatpush.msra.mxu1 %v299_v14  ;;  %v509_v24 = vld [vmem:[#allocation3 + $0xcb0] sm:$0xff]  ;;  %v166_v25 = vld [vmem:[#allocation3 + $0x1f8] sm:$0xff]  ;;  %v159_v29 = vld [vmem:[#allocation3 + $0x1c0] sm:$0xff] }
  0x1f   :  { %875 = vmatpush.msra.mxu2 %v411_v15  ;;  %830 = vmatpush.msra.mxu0 %v180_v17  ;;  %v278_v26 = vld [vmem:[#allocation3 + $0x578] sm:$0xff]  ;;  %v271_v30 = vld [vmem:[#allocation3 + $0x540] sm:$0xff]  ;;  %v152_v33 = vld [vmem:[#allocation3 + $0x188] sm:$0xff] }
  0x20   :  { %898 = vmatpush.msra.mxu3 %v523_v16  ;;  %853 = vmatpush.msra.mxu1 %v292_v18  ;;  %v390_v27 = vld [vmem:[#allocation3 + $0x8f8] sm:$0xff]  ;;  %v383_v31 = vld [vmem:[#allocation3 + $0x8c0] sm:$0xff]  ;;  %v264_v34 = vld [vmem:[#allocation3 + $0x508] sm:$0xff] }
  0x21   :  { %876 = vmatpush.msra.mxu2 %v404_v19  ;;  %831 = vmatpush.msra.mxu0 %v173_v21  ;;  %v502_v28 = vld [vmem:[#allocation3 + $0xc78] sm:$0xff]  ;;  %v495_v32 = vld [vmem:[#allocation3 + $0xc40] sm:$0xff]  ;;  %v376_v35 = vld [vmem:[#allocation3 + $0x888] sm:$0xff] }
  0x22   :  { %899 = vmatpush.msra.mxu3 %v516_v20  ;;  %854 = vmatpush.msra.mxu1 %v285_v22  ;;  %v488_v36 = vld [vmem:[#allocation3 + $0xc08] sm:$0xff]  ;;  %v145_v37 = vld [vmem:[#allocation3 + $0x150] sm:$0xff]  ;;  %v138_v41 = vld [vmem:[#allocation3 + $0x118] sm:$0xff] }
  0x23   :  { %877 = vmatpush.msra.mxu2 %v397_v23  ;;  %832 = vmatpush.msra.mxu0 %v166_v25  ;;  %v257_v38 = vld [vmem:[#allocation3 + $0x4d0] sm:$0xff]  ;;  %v250_v42 = vld [vmem:[#allocation3 + $0x498] sm:$0xff]  ;;  %v131_v45 = vld [vmem:[#allocation3 + $0xe0] sm:$0xff] }
  0x24   :  { %900 = vmatpush.msra.mxu3 %v509_v24  ;;  %855 = vmatpush.msra.mxu1 %v278_v26  ;;  %v369_v39 = vld [vmem:[#allocation3 + $0x850] sm:$0xff]  ;;  %v362_v43 = vld [vmem:[#allocation3 + $0x818] sm:$0xff]  ;;  %v243_v46 = vld [vmem:[#allocation3 + $0x460] sm:$0xff] }
  0x25   :  { %878 = vmatpush.msra.mxu2 %v390_v27  ;;  %833 = vmatpush.msra.mxu0 %v159_v29  ;;  %v481_v40 = vld [vmem:[#allocation3 + $0xbd0] sm:$0xff]  ;;  %v474_v44 = vld [vmem:[#allocation3 + $0xb98] sm:$0xff]  ;;  %v355_v47 = vld [vmem:[#allocation3 + $0x7e0] sm:$0xff] }
  0x26   :  { %901 = vmatpush.msra.mxu3 %v502_v28  ;;  %856 = vmatpush.msra.mxu1 %v271_v30  ;;  %v467_v48 = vld [vmem:[#allocation3 + $0xb60] sm:$0xff]  ;;  %v124_v49 = vld [vmem:[#allocation3 + $0xa8] sm:$0xff]  ;;  %v117_v53 = vld [vmem:[#allocation3 + $0x70] sm:$0xff] }
  0x27   :  { %879 = vmatpush.msra.mxu2 %v383_v31  ;;  %834 = vmatpush.msra.mxu0 %v152_v33  ;;  %v236_v50 = vld [vmem:[#allocation3 + $0x428] sm:$0xff]  ;;  %v229_v54 = vld [vmem:[#allocation3 + $0x3f0] sm:$0xff]  ;;  %v110_v57 = vld [vmem:[#allocation3 + $0x38] sm:$0xff] }
  0x28   :  { %902 = vmatpush.msra.mxu3 %v495_v32  ;;  %857 = vmatpush.msra.mxu1 %v264_v34  ;;  %v348_v51 = vld [vmem:[#allocation3 + $0x7a8] sm:$0xff]  ;;  %v341_v55 = vld [vmem:[#allocation3 + $0x770] sm:$0xff]  ;;  %v222_v58 = vld [vmem:[#allocation3 + $0x3b8] sm:$0xff] }
  0x29   :  { %880 = vmatpush.msra.mxu2 %v376_v35  ;;  %835 = vmatpush.msra.mxu0 %v145_v37  ;;  %v460_v52 = vld [vmem:[#allocation3 + $0xb28] sm:$0xff]  ;;  %v453_v56 = vld [vmem:[#allocation3 + $0xaf0] sm:$0xff]  ;;  %v334_v59 = vld [vmem:[#allocation3 + $0x738] sm:$0xff] }
  0x2a   :  { %903 = vmatpush.msra.mxu3 %v488_v36  ;;  %858 = vmatpush.msra.mxu1 %v257_v38  ;;  %v446_v60 = vld [vmem:[#allocation3 + $0xab8] sm:$0xff]  ;;  %v103_v61 = vld [vmem:[#allocation3] sm:$0xff]  ;;  %v656_v1 = vld [vmem:[#allocation3 + $0x1148] sm:$0xff] }
  0x2b   :  { %881 = vmatpush.msra.mxu2 %v369_v39  ;;  %836 = vmatpush.msra.mxu0 %v138_v41  ;;  %v215_v62 = vld [vmem:[#allocation3 + $0x380] sm:$0xff]  ;;  %v768_v2 = vld [vmem:[#allocation3 + $0x14c8] sm:$0xff]  ;;  %v209_v4 = vld [vmem:[#allocation3 + $0x350] sm:$0xff] }
  0x2c   :  { %904 = vmatpush.msra.mxu3 %v481_v40  ;;  %859 = vmatpush.msra.mxu1 %v250_v42  ;;  %v327_v63 = vld [vmem:[#allocation3 + $0x700] sm:$0xff]  ;;  %v796_v3 = vld [vmem:[#allocation3 + $0x15a8] sm:$0xff]  ;;  %v649_v5 = vld [vmem:[#allocation3 + $0x1110] sm:$0xff] }
  0x2d   :  { %882 = vmatpush.msra.mxu2 %v362_v43  ;;  %837 = vmatpush.msra.mxu0 %v131_v45  ;;  %v439_v0 = vld [vmem:[#allocation3 + $0xa80] sm:$0xff]  ;;  %v761_v6 = vld [vmem:[#allocation3 + $0x1490] sm:$0xff]  ;;  %v202_v8 = vld [vmem:[#allocation3 + $0x318] sm:$0xff] }
  0x2e   :  { %905 = vmatpush.msra.mxu3 %v474_v44  ;;  %860 = vmatpush.msra.mxu1 %v243_v46  ;;  %v789_v7 = vld [vmem:[#allocation3 + $0x1570] sm:$0xff]  ;;  %v642_v9 = vld [vmem:[#allocation3 + $0x10d8] sm:$0xff]  ;;  %v195_v12 = vld [vmem:[#allocation3 + $0x2e0] sm:$0xff] }
  0x2f   :  { %883 = vmatpush.msra.mxu2 %v355_v47  ;;  %838 = vmatpush.msra.mxu0 %v124_v49  ;;  %v754_v10 = vld [vmem:[#allocation3 + $0x1458] sm:$0xff]  ;;  %v635_v13 = vld [vmem:[#allocation3 + $0x10a0] sm:$0xff]  ;;  %v188_v16 = vld [vmem:[#allocation3 + $0x2a8] sm:$0xff] }
  0x30   :  { %906 = vmatpush.msra.mxu3 %v467_v48  ;;  %861 = vmatpush.msra.mxu1 %v236_v50  ;;  %v782_v11 = vld [vmem:[#allocation3 + $0x1538] sm:$0xff]  ;;  %v747_v14 = vld [vmem:[#allocation3 + $0x1420] sm:$0xff]  ;;  %v2845_v17 = vld [vmem:[%s3501_s0 + $0x10] sm:$0xff] }
  0x31   :  { %884 = vmatpush.msra.mxu2 %v348_v51  ;;  %839 = vmatpush.msra.mxu0 %v117_v53  ;;  %v775_v15 = vld [vmem:[#allocation3 + $0x1500] sm:$0xff]  ;;  %v628_v18 = vld [vmem:[#allocation3 + $0x1068] sm:$0xff]  ;;  %v321_v19 = vld [vmem:[#allocation3 + $0x6d0] sm:$0xff] }
  0x32   :  { %907 = vmatpush.msra.mxu3 %v460_v52  ;;  %862 = vmatpush.msra.mxu1 %v229_v54  ;;  %v740_v20 = vld [vmem:[#allocation3 + $0x13e8] sm:$0xff]  ;;  %v181_v21 = vld [vmem:[#allocation3 + $0x270] sm:$0xff]  ;;  %v314_v23 = vld [vmem:[#allocation3 + $0x698] sm:$0xff] }
  0x33   :  { %885 = vmatpush.msra.mxu2 %v341_v55  ;;  %840 = vmatpush.msra.mxu0 %v110_v57  ;;  %v621_v22 = vld [vmem:[#allocation3 + $0x1030] sm:$0xff]  ;;  %v174_v25 = vld [vmem:[#allocation3 + $0x238] sm:$0xff]  ;;  %v307_v27 = vld [vmem:[#allocation3 + $0x660] sm:$0xff] }
  0x34   :  { %908 = vmatpush.msra.mxu3 %v453_v56  ;;  %863 = vmatpush.msra.mxu1 %v222_v58  ;;  %v733_v24 = vld [vmem:[#allocation3 + $0x13b0] sm:$0xff]  ;;  %v614_v26 = vld [vmem:[#allocation3 + $0xff8] sm:$0xff]  ;;  %v167_v29 = vld [vmem:[#allocation3 + $0x200] sm:$0xff] }
  0x35   :  { %886 = vmatpush.msra.mxu2 %v334_v59  ;;  %841 = vmatpush.msra.mxu0 %v103_v61  ;;  %v726_v28 = vld [vmem:[#allocation3 + $0x1378] sm:$0xff]  ;;  %v607_v30 = vld [vmem:[#allocation3 + $0xfc0] sm:$0xff]  ;;  %v300_v31 = vld [vmem:[#allocation3 + $0x628] sm:$0xff] }
  0x36   :  { %909 = vmatpush.msra.mxu3 %v446_v60  ;;  %864 = vmatpush.msra.mxu1 %v215_v62  ;;  %v719_v32 = vld [vmem:[#allocation3 + $0x1340] sm:$0xff]  ;;  %v160_v33 = vld [vmem:[#allocation3 + $0x1c8] sm:$0xff]  ;;  %v293_v35 = vld [vmem:[#allocation3 + $0x5f0] sm:$0xff] }
  0x37   :  { %887 = vmatpush.msra.mxu2 %v327_v63  ;;  %918 = vmatpush.msrb.mxu0 %v656_v1  ;;  %v2851_v34 = vld [vmem:[%s3501_s0] sm:$0xff]  ;;  %v600_v36 = vld [vmem:[#allocation3 + $0xf88] sm:$0xff]  ;;  %v153_v38 = vld [vmem:[#allocation3 + $0x190] sm:$0xff] }
  0x38   :  { %910 = vmatpush.msra.mxu3 %v439_v0  ;;  %941 = vmatpush.msrb.mxu1 %v768_v2  ;;  %v712_v37 = vld [vmem:[#allocation3 + $0x1308] sm:$0xff]  ;;  %v286_v40 = vld [vmem:[#allocation3 + $0x5b8] sm:$0xff]  ;;  %v593_v41 = vld [vmem:[#allocation3 + $0xf50] sm:$0xff] }
  0x39   :  { %976 = vmatpush.msrb.mxu2 %v796_v3  ;;  %919 = vmatpush.msrb.mxu0 %v649_v5  ;;  %v2857_v39 = vld [vmem:[%s3501_s0 + $0x8] sm:$0xff]  ;;  %v705_v42 = vld [vmem:[#allocation3 + $0x12d0] sm:$0xff]  ;;  %v146_v43 = vld [vmem:[#allocation3 + $0x158] sm:$0xff] }
  0x3a   :  { %987 = vmatpush.msrb.mxu3 %v209_v4  ;;  %942 = vmatpush.msrb.mxu1 %v761_v6  ;;  %v279_v44 = vld [vmem:[#allocation3 + $0x580] sm:$0xff]  ;;  %v586_v45 = vld [vmem:[#allocation3 + $0xf18] sm:$0xff]  ;;  %v272_v49 = vld [vmem:[#allocation3 + $0x548] sm:$0xff] }
  0x3b   :  { %977 = vmatpush.msrb.mxu2 %v789_v7  ;;  %920 = vmatpush.msrb.mxu0 %v642_v9  ;;  %v698_v46 = vld [vmem:[#allocation3 + $0x1298] sm:$0xff]  ;;  %v139_v47 = vld [vmem:[#allocation3 + $0x120] sm:$0xff]  ;;  %v132_v52 = vld [vmem:[#allocation3 + $0xe8] sm:$0xff] }
  0x3c   :  { %988 = vmatpush.msrb.mxu3 %v202_v8  ;;  %943 = vmatpush.msrb.mxu1 %v754_v10  ;;  %v2863_v48 = vld [vmem:[%s3501_s0 + $0x48] sm:$0xff]  ;;  %v2869_v53 = vld [vmem:[%s3501_s0 + $0x38] sm:$0xff]  ;;  %v2881_v59 = vld [vmem:[%s3501_s0 + $0x40] sm:$0xff] }
  0x3d   :  { %978 = vmatpush.msrb.mxu2 %v782_v11  ;;  %921 = vmatpush.msrb.mxu0 %v635_v13  ;;  %v579_v50 = vld [vmem:[#allocation3 + $0xee0] sm:$0xff]  ;;  %v2874_v54 = vld [vmem:[%s3501_s0 + $0x18] sm:$0xff]  ;;  %v572_v56 = vld [vmem:[#allocation3 + $0xea8] sm:$0xff] }
  0x3e   :  { %989 = vmatpush.msrb.mxu3 %v195_v12  ;;  %944 = vmatpush.msrb.mxu1 %v747_v14  ;;  %v691_v51 = vld [vmem:[#allocation3 + $0x1260] sm:$0xff]  ;;  %v265_v55 = vld [vmem:[#allocation3 + $0x510] sm:$0xff]  ;;  %v684_v57 = vld [vmem:[#allocation3 + $0x1228] sm:$0xff] }
  0x3f   :  { %979 = vmatpush.msrb.mxu2 %v775_v15  ;;  %922 = vmatpush.msrb.mxu0 %v628_v18  ;;  %v125_v58 = vld [vmem:[#allocation3 + $0xb0] sm:$0xff]  ;;  %v258_v60 = vld [vmem:[#allocation3 + $0x4d8] sm:$0xff]  ;;  %v251_v0 = vld [vmem:[#allocation3 + $0x4a0] sm:$0xff] }
  0x40   :  { %990 = vmatpush.msrb.mxu3 %v188_v16  ;;  %888 = vmatmul.f32.vlgmr.msra.gmra.mxu2 %v2845_v17  ;;  %v565_v61 = vld [vmem:[#allocation3 + $0xe70] sm:$0xff]  ;;  %v118_v63 = vld [vmem:[#allocation3 + $0x78] sm:$0xff]  ;;  %v111_v3 = vld [vmem:[#allocation3 + $0x40] sm:$0xff] }
  0x41   :  { %1010 = vmatpush.msra.mxu2 %v321_v19  ;;  %945 = vmatpush.msrb.mxu1 %v740_v20  ;;  %v677_v62 = vld [vmem:[#allocation3 + $0x11f0] sm:$0xff]  ;;  %v558_v1 = vld [vmem:[#allocation3 + $0xe38] sm:$0xff]  ;;  %v244_v5 = vld [vmem:[#allocation3 + $0x468] sm:$0xff] }
  0x42   :  { %991 = vmatpush.msrb.mxu3 %v181_v21  ;;  %923 = vmatpush.msrb.mxu0 %v621_v22  ;;  %v670_v2 = vld [vmem:[#allocation3 + $0x11b8] sm:$0xff]  ;;  %v2887_v4 = vld [vmem:[%s3501_s0 + $0x30] sm:$0xff]  ;;  %v551_v6 = vld [vmem:[#allocation3 + $0xe00] sm:$0xff] }
  0x43   :  { %1011 = vmatpush.msra.mxu2 %v314_v23  ;;  %946 = vmatpush.msrb.mxu1 %v733_v24  ;;  %v663_v7 = vld [vmem:[#allocation3 + $0x1180] sm:$0xff]  ;;  %v104_v8 = vld [vmem:[#allocation3 + $0x8] sm:$0xff]  ;;  %v237_v10 = vld [vmem:[#allocation3 + $0x430] sm:$0xff] }
  0x44   :  { %992 = vmatpush.msrb.mxu3 %v174_v25  ;;  %924 = vmatpush.msrb.mxu0 %v614_v26  ;;  %v2894_v9 = vld [vmem:[%s3501_s0 + $0x20] sm:$0xff]  ;;  %v433_v11 = vld [vmem:[#allocation3 + $0xa50] sm:$0xff]  ;;  %v2899_v14 = vld [vmem:[%s3501_s0 + $0x28] sm:$0xff] }
  0x45   :  { %1012 = vmatpush.msra.mxu2 %v307_v27  ;;  %947 = vmatpush.msrb.mxu1 %v726_v28  ;;  %v545_v12 = vld [vmem:[#allocation3 + $0xdd0] sm:$0xff]  ;;  %v230_v15 = vld [vmem:[#allocation3 + $0x3f8] sm:$0xff]  ;;  %v223_v20 = vld [vmem:[#allocation3 + $0x3c0] sm:$0xff] }
  0x46   :  { %993 = vmatpush.msrb.mxu3 %v167_v29  ;;  %925 = vmatpush.msrb.mxu0 %v607_v30  ;;  %v657_v13 = vld [vmem:[#allocation3 + $0x1150] sm:$0xff]  ;;  %v426_v16 = vld [vmem:[#allocation3 + $0xa18] sm:$0xff]  ;;  %v419_v21 = vld [vmem:[#allocation3 + $0x9e0] sm:$0xff] }
  0x47   :  { %1013 = vmatpush.msra.mxu2 %v300_v31  ;;  %948 = vmatpush.msrb.mxu1 %v719_v32  ;;  %v538_v18 = vld [vmem:[#allocation3 + $0xd98] sm:$0xff]  ;;  %v531_v22 = vld [vmem:[#allocation3 + $0xd60] sm:$0xff]  ;;  %v216_v24 = vld [vmem:[#allocation3 + $0x388] sm:$0xff] }
  0x48   :  { %994 = vmatpush.msrb.mxu3 %v160_v33  ;;  %842 = vmatmul.f32.vlgmr.msra.gmra.mxu0 %v2851_v34  ;;  %v650_v19 = vld [vmem:[#allocation3 + $0x1118] sm:$0xff]  ;;  %v643_v23 = vld [vmem:[#allocation3 + $0x10e0] sm:$0xff]  ;;  %v412_v25 = vld [vmem:[#allocation3 + $0x9a8] sm:$0xff] }
  0x49   :  { %1014 = vmatpush.msra.mxu2 %v293_v35  ;;  %926 = vmatpush.msrb.mxu0 %v600_v36  ;;  %v524_v26 = vld [vmem:[#allocation3 + $0xd28] sm:$0xff]  ;;  %v769_v28 = vld [vmem:[#allocation3 + $0x14d0] sm:$0xff]  ;;  %v762_v33 = vld [vmem:[#allocation3 + $0x1498] sm:$0xff] }
  0x4a   :  { %949 = vmatpush.msrb.mxu1 %v712_v37  ;;  %995 = vmatpush.msrb.mxu3 %v153_v38  ;;  %v636_v27 = vld [vmem:[#allocation3 + $0x10a8] sm:$0xff]  ;;  %v405_v30 = vld [vmem:[#allocation3 + $0x970] sm:$0xff]  ;;  %v398_v35 = vld [vmem:[#allocation3 + $0x938] sm:$0xff] }
  0x4b   :  { %865 = vmatmul.f32.vlgmr.msra.gmra.mxu1 %v2857_v39  ;;  %1015 = vmatpush.msra.mxu2 %v286_v40  ;;  %v2906_v29 = vld [vmem:[%s3501_s0 + $0x50] sm:$0xff]  ;;  %v510_v36 = vld [vmem:[#allocation3 + $0xcb8] sm:$0xff]  ;;  %v755_v38 = vld [vmem:[#allocation3 + $0x1460] sm:$0xff] }
  0x4c   :  { %927 = vmatpush.msrb.mxu0 %v593_v41  ;;  %950 = vmatpush.msrb.mxu1 %v705_v42  ;;  %v517_v31 = vld [vmem:[#allocation3 + $0xcf0] sm:$0xff]  ;;  %v622_v37 = vld [vmem:[#allocation3 + $0x1038] sm:$0xff]  ;;  %v391_v40 = vld [vmem:[#allocation3 + $0x900] sm:$0xff] }
  0x4d   :  { %996 = vmatpush.msrb.mxu3 %v146_v43  ;;  %1016 = vmatpush.msra.mxu2 %v279_v44  ;;  %v629_v32 = vld [vmem:[#allocation3 + $0x1070] sm:$0xff]  ;;  %v503_v41 = vld [vmem:[#allocation3 + $0xc80] sm:$0xff]  ;;  %v748_v43 = vld [vmem:[#allocation3 + $0x1428] sm:$0xff] }
  0x4e   :  { %928 = vmatpush.msrb.mxu0 %v586_v45  ;;  %951 = vmatpush.msrb.mxu1 %v698_v46  ;;  %v615_v42 = vld [vmem:[#allocation3 + $0x1000] sm:$0xff]  ;;  %v384_v45 = vld [vmem:[#allocation3 + $0x8c8] sm:$0xff] }
  0x4f   :  { %997 = vmatpush.msrb.mxu3 %v139_v47  ;;  %891 = vmatmul.f32.gmra.mxu2 %v2863_v48  ;;  %v2912_v44 = vld [vmem:[%s3501_s0 + $0x68] sm:$0xff] }
  0x50   :  { %1017 = vmatpush.msra.mxu2 %v272_v49  ;;  %929 = vmatpush.msrb.mxu0 %v579_v50  ;;  %v496_v46 = vld [vmem:[#allocation3 + $0xc48] sm:$0xff]  ;;  %v741_v49 = vld [vmem:[#allocation3 + $0x13f0] sm:$0xff] }
  0x51   :  { %952 = vmatpush.msrb.mxu1 %v691_v51  ;;  %998 = vmatpush.msrb.mxu3 %v132_v52  ;;  %v608_v47 = vld [vmem:[#allocation3 + $0xfc8] sm:$0xff]  ;;  %v2917_v50 = vld [vmem:[%s3501_s0 + $0x58] sm:$0xff] }
  0x52   :  { %845 = vmatmul.f32.gmra.mxu0 %v2869_v53  ;;  %911 = vmatmul.f32.vlgmr.msra.gmra.mxu3 %v2874_v54  ;;  %v377_v51 = vld [vmem:[#allocation3 + $0x890] sm:$0xff] }
  0x53   :  { %1018 = vmatpush.msra.mxu2 %v265_v55  ;;  %930 = vmatpush.msrb.mxu0 %v572_v56  ;;  %v489_v52 = vld [vmem:[#allocation3 + $0xc10] sm:$0xff]  ;;  %v734_v56 = vld [vmem:[#allocation3 + $0x13b8] sm:$0xff] }
  0x54   :  { %953 = vmatpush.msrb.mxu1 %v684_v57  ;;  %999 = vmatpush.msrb.mxu3 %v125_v58  ;;  %v601_v55 = vld [vmem:[#allocation3 + $0xf90] sm:$0xff]  ;;  %v2925_v57 = vld [vmem:[%s3501_s0 + $0x60] sm:$0xff] }
  0x55   :  { %868 = vmatmul.f32.gmra.mxu1 %v2881_v59  ;;  %1019 = vmatpush.msra.mxu2 %v258_v60  ;;  %v370_v58 = vld [vmem:[#allocation3 + $0x858] sm:$0xff] }
  0x56   :  { %931 = vmatpush.msrb.mxu0 %v565_v61  ;;  %954 = vmatpush.msrb.mxu1 %v677_v62  ;;  %v482_v60 = vld [vmem:[#allocation3 + $0xbd8] sm:$0xff]  ;;  %v727_v62 = vld [vmem:[#allocation3 + $0x1380] sm:$0xff] }
  0x57   :  { %1000 = vmatpush.msrb.mxu3 %v118_v63  ;;  %1020 = vmatpush.msra.mxu2 %v251_v0  ;;  %v594_v61 = vld [vmem:[#allocation3 + $0xf58] sm:$0xff]  ;;  %v363_v63 = vld [vmem:[#allocation3 + $0x820] sm:$0xff] }
  0x58   :  { %932 = vmatpush.msrb.mxu0 %v558_v1  ;;  %955 = vmatpush.msrb.mxu1 %v670_v2  ;;  %v475_v0 = vld [vmem:[#allocation3 + $0xba0] sm:$0xff]  ;;  %v720_v2 = vld [vmem:[#allocation3 + $0x1348] sm:$0xff] }
  0x59   :  { %1001 = vmatpush.msrb.mxu3 %v111_v3  ;;  %2551 = vmatmul.msk.f32.vlgmr.msrb.gmra.mxu2 %vm819_vm0, %v2887_v4  ;;  %v587_v1 = vld [vmem:[#allocation3 + $0xf20] sm:$0xff]  ;;  %v356_v3 = vld [vmem:[#allocation3 + $0x7e8] sm:$0xff] }
  0x5a   :  { %1021 = vmatpush.msra.mxu2 %v244_v5  ;;  %933 = vmatpush.msrb.mxu0 %v551_v6  ;;  %v468_v5 = vld [vmem:[#allocation3 + $0xb68] sm:$0xff] }
  0x5b   :  { %956 = vmatpush.msrb.mxu1 %v663_v7  ;;  %1002 = vmatpush.msrb.mxu3 %v104_v8  ;;  %v580_v6 = vld [vmem:[#allocation3 + $0xee8] sm:$0xff]  ;;  %v713_v7 = vld [vmem:[#allocation3 + $0x1310] sm:$0xff] }
  0x5c   :  { %934 = vmatmul.f32.vlgmr.msrb.gmra.mxu0 %v2894_v9  ;;  %1022 = vmatpush.msra.mxu2 %v237_v10  ;;  %v349_v8 = vld [vmem:[#allocation3 + $0x7b0] sm:$0xff] }
  0x5d   :  { %1033 = vmatpush.msra.mxu0 %v433_v11  ;;  %1056 = vmatpush.msra.mxu1 %v545_v12  ;;  %v461_v10 = vld [vmem:[#allocation3 + $0xb30] sm:$0xff]  ;;  %v706_v12 = vld [vmem:[#allocation3 + $0x12d8] sm:$0xff] }
  0x5e   :  { %1079 = vmatpush.msra.mxu3 %v657_v13  ;;  %957 = vmatmul.f32.vlgmr.msrb.gmra.mxu1 %v2899_v14  ;;  %v573_v11 = vld [vmem:[#allocation3 + $0xeb0] sm:$0xff]  ;;  %v342_v13 = vld [vmem:[#allocation3 + $0x778] sm:$0xff] }
  0x5f   :  { %1023 = vmatpush.msra.mxu2 %v230_v15  ;;  %1034 = vmatpush.msra.mxu0 %v426_v16  ;;  %v454_v15 = vld [vmem:[#allocation3 + $0xaf8] sm:$0xff] }
  0x60   :  { %1057 = vmatpush.msra.mxu1 %v538_v18  ;;  %1080 = vmatpush.msra.mxu3 %v650_v19  ;;  %v566_v16 = vld [vmem:[#allocation3 + $0xe78] sm:$0xff]  ;;  %v699_v18 = vld [vmem:[#allocation3 + $0x12a0] sm:$0xff] }
  0x61   :  { %1024 = vmatpush.msra.mxu2 %v223_v20  ;;  %1035 = vmatpush.msra.mxu0 %v419_v21  ;;  %v335_v19 = vld [vmem:[#allocation3 + $0x740] sm:$0xff] }
  0x62   :  { %1058 = vmatpush.msra.mxu1 %v531_v22  ;;  %1081 = vmatpush.msra.mxu3 %v643_v23  ;;  %v447_v20 = vld [vmem:[#allocation3 + $0xac0] sm:$0xff]  ;;  %v692_v22 = vld [vmem:[#allocation3 + $0x1268] sm:$0xff] }
  0x63   :  { %1025 = vmatpush.msra.mxu2 %v216_v24  ;;  %1036 = vmatpush.msra.mxu0 %v412_v25  ;;  %v559_v21 = vld [vmem:[#allocation3 + $0xe40] sm:$0xff]  ;;  %v328_v23 = vld [vmem:[#allocation3 + $0x708] sm:$0xff] }
  0x64   :  { %1059 = vmatpush.msra.mxu1 %v524_v26  ;;  %1082 = vmatpush.msra.mxu3 %v636_v27  ;;  %v440_v24 = vld [vmem:[#allocation3 + $0xa88] sm:$0xff]  ;;  %v685_v26 = vld [vmem:[#allocation3 + $0x1230] sm:$0xff] }
  0x65   :  { %1102 = vmatpush.msrb.mxu2 %v769_v28  ;;  %914 = vmatmul.f32.gmra.mxu3 %v2906_v29  ;;  %v552_v25 = vld [vmem:[#allocation3 + $0xe08] sm:$0xff]  ;;  %v797_v27 = vld [vmem:[#allocation3 + $0x15b0] sm:$0xff]  ;;  %v210_v28 = vld [vmem:[#allocation3 + $0x358] sm:$0xff] }
  0x66   :  { %1037 = vmatpush.msra.mxu0 %v405_v30  ;;  %1060 = vmatpush.msra.mxu1 %v517_v31  ;;  %v322_v30 = vld [vmem:[#allocation3 + $0x6d8] sm:$0xff] }
  0x67   :  { %1083 = vmatpush.msra.mxu3 %v629_v32  ;;  %1103 = vmatpush.msrb.mxu2 %v762_v33  ;;  %v678_v31 = vld [vmem:[#allocation3 + $0x11f8] sm:$0xff]  ;;  %v203_v33 = vld [vmem:[#allocation3 + $0x320] sm:$0xff] }
  0x68   :  { %1038 = vmatpush.msra.mxu0 %v398_v35  ;;  %1061 = vmatpush.msra.mxu1 %v510_v36  ;;  %v790_v32 = vld [vmem:[#allocation3 + $0x1578] sm:$0xff]  ;;  %v315_v35 = vld [vmem:[#allocation3 + $0x6a0] sm:$0xff] }
  0x69   :  { %1084 = vmatpush.msra.mxu3 %v622_v37  ;;  %1104 = vmatpush.msrb.mxu2 %v755_v38  ;;  %v671_v36 = vld [vmem:[#allocation3 + $0x11c0] sm:$0xff]  ;;  %v196_v38 = vld [vmem:[#allocation3 + $0x2e8] sm:$0xff] }
  0x6a   :  { %1039 = vmatpush.msra.mxu0 %v391_v40  ;;  %1062 = vmatpush.msra.mxu1 %v503_v41  ;;  %v783_v37 = vld [vmem:[#allocation3 + $0x1540] sm:$0xff]  ;;  %v308_v40 = vld [vmem:[#allocation3 + $0x668] sm:$0xff] }
  0x6b   :  { %1085 = vmatpush.msra.mxu3 %v615_v42  ;;  %1105 = vmatpush.msrb.mxu2 %v748_v43  ;;  %v664_v41 = vld [vmem:[#allocation3 + $0x1188] sm:$0xff]  ;;  %v189_v43 = vld [vmem:[#allocation3 + $0x2b0] sm:$0xff] }
  0x6c   :  { %2552 = vmatmul.msk.f32.gmra.mxu2 %vm819_vm0, %v2912_v44  ;;  %1040 = vmatpush.msra.mxu0 %v384_v45  ;;  %v776_v42 = vld [vmem:[#allocation3 + $0x1508] sm:$0xff]  ;;  %v301_v45 = vld [vmem:[#allocation3 + $0x630] sm:$0xff] }
  0x6d   :  { %1063 = vmatpush.msra.mxu1 %v496_v46  ;;  %1086 = vmatpush.msra.mxu3 %v608_v47  ;;  %v434_v46 = vld [vmem:[#allocation3 + $0xa58] sm:$0xff] }
  0x6e   :  { %1106 = vmatpush.msrb.mxu2 %v741_v49  ;;  %937 = vmatmul.f32.gmra.mxu0 %v2917_v50  ;;  %v546_v47 = vld [vmem:[#allocation3 + $0xdd8] sm:$0xff] }
  0x6f   :  { %1041 = vmatpush.msra.mxu0 %v377_v51  ;;  %1064 = vmatpush.msra.mxu1 %v489_v52  ;;  %v182_v49 = vld [vmem:[#allocation3 + $0x278] sm:$0xff]  ;;  %v427_v52 = vld [vmem:[#allocation3 + $0xa20] sm:$0xff] }
  0x70   :  { %1087 = vmatpush.msra.mxu3 %v601_v55  ;;  %1107 = vmatpush.msrb.mxu2 %v734_v56  ;;  %v294_v51 = vld [vmem:[#allocation3 + $0x5f8] sm:$0xff]  ;;  %v539_v55 = vld [vmem:[#allocation3 + $0xda0] sm:$0xff] }
  0x71   :  { %960 = vmatmul.f32.gmra.mxu1 %v2925_v57  ;;  %1042 = vmatpush.msra.mxu0 %v370_v58  ;;  %v287_v56 = vld [vmem:[#allocation3 + $0x5c0] sm:$0xff] }
  0x72   :  { %1065 = vmatpush.msra.mxu1 %v482_v60  ;;  %1088 = vmatpush.msra.mxu3 %v594_v61  ;;  %v175_v58 = vld [vmem:[#allocation3 + $0x240] sm:$0xff]  ;;  %v420_v60 = vld [vmem:[#allocation3 + $0x9e8] sm:$0xff] }
  0x73   :  { %1108 = vmatpush.msrb.mxu2 %v727_v62  ;;  %1043 = vmatpush.msra.mxu0 %v363_v63  ;;  %v532_v61 = vld [vmem:[#allocation3 + $0xd68] sm:$0xff] }
  0x74   :  { %1066 = vmatpush.msra.mxu1 %v475_v0  ;;  %1089 = vmatpush.msra.mxu3 %v587_v1  ;;  %v280_v62 = vld [vmem:[#allocation3 + $0x588] sm:$0xff]  ;;  %v413_v0 = vld [vmem:[#allocation3 + $0x9b0] sm:$0xff] }
  0x75   :  { %1003 = vmatmul.f32.vlgmr.msrb.gmra.mxu3 %v2851_v34  ;;  %1109 = vmatpush.msrb.mxu2 %v720_v2  ;;  %v168_v63 = vld [vmem:[#allocation3 + $0x208] sm:$0xff]  ;;  %v525_v1 = vld [vmem:[#allocation3 + $0xd30] sm:$0xff] }
  0x76   :  { %1044 = vmatpush.msra.mxu0 %v356_v3  ;;  %1067 = vmatpush.msra.mxu1 %v468_v5  ;;  %v273_v2 = vld [vmem:[#allocation3 + $0x550] sm:$0xff]  ;;  %v406_v5 = vld [vmem:[#allocation3 + $0x978] sm:$0xff] }
  0x77   :  { %1090 = vmatpush.msra.mxu3 %v580_v6  ;;  %1026 = vmatmul.f32.vlgmr.msra.gmra.mxu2 %v2857_v39  ;;  %v161_v3 = vld [vmem:[#allocation3 + $0x1d0] sm:$0xff]  ;;  %v518_v6 = vld [vmem:[#allocation3 + $0xcf8] sm:$0xff] }
  0x78   :  { %1110 = vmatpush.msrb.mxu2 %v713_v7  ;;  %1045 = vmatpush.msra.mxu0 %v349_v8  ;;  %v154_v7 = vld [vmem:[#allocation3 + $0x198] sm:$0xff] }
  0x79   :  { %1068 = vmatpush.msra.mxu1 %v461_v10  ;;  %1091 = vmatpush.msra.mxu3 %v573_v11  ;;  %v266_v8 = vld [vmem:[#allocation3 + $0x518] sm:$0xff]  ;;  %v399_v10 = vld [vmem:[#allocation3 + $0x940] sm:$0xff] }
  0x7a   :  { %1111 = vmatpush.msrb.mxu2 %v706_v12  ;;  %1046 = vmatpush.msra.mxu0 %v342_v13  ;;  %v511_v11 = vld [vmem:[#allocation3 + $0xcc0] sm:$0xff] }
  0x7b   :  { %1069 = vmatpush.msra.mxu1 %v454_v15  ;;  %1092 = vmatpush.msra.mxu3 %v566_v16  ;;  %v147_v12 = vld [vmem:[#allocation3 + $0x160] sm:$0xff]  ;;  %v392_v15 = vld [vmem:[#allocation3 + $0x908] sm:$0xff] }
  0x7c   :  { %1112 = vmatpush.msrb.mxu2 %v699_v18  ;;  %1047 = vmatpush.msra.mxu0 %v335_v19  ;;  %v259_v13 = vld [vmem:[#allocation3 + $0x4e0] sm:$0xff]  ;;  %v504_v16 = vld [vmem:[#allocation3 + $0xc88] sm:$0xff] }
  0x7d   :  { %1070 = vmatpush.msra.mxu1 %v447_v20  ;;  %1093 = vmatpush.msra.mxu3 %v559_v21  ;;  %v140_v18 = vld [vmem:[#allocation3 + $0x128] sm:$0xff]  ;;  %v385_v20 = vld [vmem:[#allocation3 + $0x8d0] sm:$0xff] }
  0x7e   :  { %1006 = vmatmul.f32.gmra.mxu3 %v2869_v53  ;;  %1113 = vmatpush.msrb.mxu2 %v692_v22  ;;  %v252_v19 = vld [vmem:[#allocation3 + $0x4a8] sm:$0xff]  ;;  %v497_v21 = vld [vmem:[#allocation3 + $0xc50] sm:$0xff] }
  0x7f   :  { %1048 = vmatpush.msra.mxu0 %v328_v23  ;;  %1071 = vmatpush.msra.mxu1 %v440_v24  ;;  %v245_v22 = vld [vmem:[#allocation3 + $0x470] sm:$0xff]  ;;  %v378_v24 = vld [vmem:[#allocation3 + $0x898] sm:$0xff] }
  0x80   :  { %1094 = vmatpush.msra.mxu3 %v552_v25  ;;  %1029 = vmatmul.f32.gmra.mxu2 %v2881_v59  ;;  %v133_v23 = vld [vmem:[#allocation3 + $0xf0] sm:$0xff]  ;;  %v490_v25 = vld [vmem:[#allocation3 + $0xc18] sm:$0xff] }
  0x81   :  { %1049 = vmatmul.f32.vlgmr.msra.gmra.mxu0 %v2845_v17  ;;  %1114 = vmatpush.msrb.mxu2 %v685_v26  ;;  %v238_v26 = vld [vmem:[#allocation3 + $0x438] sm:$0xff] }
  0x82   :  { %1137 = vmatpush.msrb.mxu0 %v797_v27  ;;  %1148 = vmatpush.msrb.mxu1 %v210_v28  ;;  %v126_v27 = vld [vmem:[#allocation3 + $0xb8] sm:$0xff]  ;;  %v371_v28 = vld [vmem:[#allocation3 + $0x860] sm:$0xff] }
  0x83   :  { %1171 = vmatpush.msrb.mxu3 %v322_v30  ;;  %1115 = vmatpush.msrb.mxu2 %v678_v31  ;;  %v483_v30 = vld [vmem:[#allocation3 + $0xbe0] sm:$0xff] }
  0x84   :  { %1138 = vmatpush.msrb.mxu0 %v790_v32  ;;  %1149 = vmatpush.msrb.mxu1 %v203_v33  ;;  %v231_v31 = vld [vmem:[#allocation3 + $0x400] sm:$0xff]  ;;  %v364_v33 = vld [vmem:[#allocation3 + $0x828] sm:$0xff] }
  0x85   :  { %1172 = vmatpush.msrb.mxu3 %v315_v35  ;;  %1116 = vmatpush.msrb.mxu2 %v671_v36  ;;  %v119_v32 = vld [vmem:[#allocation3 + $0x80] sm:$0xff]  ;;  %v476_v35 = vld [vmem:[#allocation3 + $0xba8] sm:$0xff] }
  0x86   :  { %1139 = vmatpush.msrb.mxu0 %v783_v37  ;;  %1150 = vmatpush.msrb.mxu1 %v196_v38  ;;  %v112_v36 = vld [vmem:[#allocation3 + $0x48] sm:$0xff]  ;;  %v357_v38 = vld [vmem:[#allocation3 + $0x7f0] sm:$0xff] }
  0x87   :  { %1173 = vmatpush.msrb.mxu3 %v308_v40  ;;  %1117 = vmatpush.msrb.mxu2 %v664_v41  ;;  %v224_v37 = vld [vmem:[#allocation3 + $0x3c8] sm:$0xff]  ;;  %v469_v40 = vld [vmem:[#allocation3 + $0xb70] sm:$0xff] }
  0x88   :  { %1095 = vmatmul.f32.vlgmr.msra.gmra.mxu3 %v2894_v9  ;;  %1140 = vmatpush.msrb.mxu0 %v776_v42  ;;  %v105_v41 = vld [vmem:[#allocation3 + $0x10] sm:$0xff] }
  0x89   :  { %1151 = vmatpush.msrb.mxu1 %v189_v43  ;;  %1174 = vmatpush.msrb.mxu3 %v301_v45  ;;  %v217_v42 = vld [vmem:[#allocation3 + $0x390] sm:$0xff]  ;;  %v350_v43 = vld [vmem:[#allocation3 + $0x7b8] sm:$0xff] }
  0x8a   :  { %1194 = vmatpush.msra.mxu0 %v434_v46  ;;  %1217 = vmatpush.msra.mxu2 %v546_v47  ;;  %v462_v45 = vld [vmem:[#allocation3 + $0xb38] sm:$0xff] }
  0x8b   :  { %1052 = vmatmul.f32.gmra.mxu0 %v2863_v48  ;;  %1118 = vmatmul.f32.vlgmr.msrb.gmra.mxu2 %v2899_v14  ;;  %v658_v46 = vld [vmem:[#allocation3 + $0x1158] sm:$0xff] }
  0x8c   :  { %1152 = vmatpush.msrb.mxu1 %v182_v49  ;;  %1175 = vmatpush.msrb.mxu3 %v294_v51  ;;  %v770_v47 = vld [vmem:[#allocation3 + $0x14d8] sm:$0xff]  ;;  %v343_v49 = vld [vmem:[#allocation3 + $0x780] sm:$0xff] }
  0x8d   :  { %1195 = vmatpush.msra.mxu0 %v427_v52  ;;  %1218 = vmatpush.msra.mxu2 %v539_v55  ;;  %v455_v51 = vld [vmem:[#allocation3 + $0xb00] sm:$0xff] }
  0x8e   :  { %1072 = vmatmul.f32.vlgmr.msra.gmra.mxu1 %v2874_v54  ;;  %1176 = vmatpush.msrb.mxu3 %v287_v56  ;;  %v651_v52 = vld [vmem:[#allocation3 + $0x1120] sm:$0xff]  ;;  %v336_v56 = vld [vmem:[#allocation3 + $0x748] sm:$0xff] }
  0x8f   :  { %1153 = vmatpush.msrb.mxu1 %v175_v58  ;;  %1196 = vmatpush.msra.mxu0 %v420_v60  ;;  %v763_v55 = vld [vmem:[#allocation3 + $0x14a0] sm:$0xff]  ;;  %v448_v58 = vld [vmem:[#allocation3 + $0xac8] sm:$0xff] }
  0x90   :  { %1219 = vmatpush.msra.mxu2 %v532_v61  ;;  %1177 = vmatpush.msrb.mxu3 %v280_v62  ;;  %v644_v60 = vld [vmem:[#allocation3 + $0x10e8] sm:$0xff]  ;;  %v329_v62 = vld [vmem:[#allocation3 + $0x710] sm:$0xff] }
  0x91   :  { %1154 = vmatpush.msrb.mxu1 %v168_v63  ;;  %1197 = vmatpush.msra.mxu0 %v413_v0  ;;  %v756_v61 = vld [vmem:[#allocation3 + $0x1468] sm:$0xff]  ;;  %v441_v63 = vld [vmem:[#allocation3 + $0xa90] sm:$0xff] }
  0x92   :  { %1220 = vmatpush.msra.mxu2 %v525_v1  ;;  %1178 = vmatpush.msrb.mxu3 %v273_v2  ;;  %v637_v0 = vld [vmem:[#allocation3 + $0x10b0] sm:$0xff]  ;;  %v798_v2 = vld [vmem:[#allocation3 + $0x15b8] sm:$0xff] }
  0x93   :  { %1155 = vmatpush.msrb.mxu1 %v161_v3  ;;  %1198 = vmatpush.msra.mxu0 %v406_v5  ;;  %v749_v1 = vld [vmem:[#allocation3 + $0x1430] sm:$0xff]  ;;  %v211_v3 = vld [vmem:[#allocation3 + $0x360] sm:$0xff]  ;;  %v630_v5 = vld [vmem:[#allocation3 + $0x1078] sm:$0xff] }
  0x94   :  { %1221 = vmatpush.msra.mxu2 %v518_v6  ;;  %2553 = vmatmul.msk.f32.vlgmr.msrb.gmra.mxu0 %vm819_vm0, %v2887_v4  ;;  %v742_v6 = vld [vmem:[#allocation3 + $0x13f8] sm:$0xff] }
  0x95   :  { %1156 = vmatpush.msrb.mxu1 %v154_v7  ;;  %1179 = vmatpush.msrb.mxu3 %v266_v8  ;;  %v791_v7 = vld [vmem:[#allocation3 + $0x1580] sm:$0xff]  ;;  %v204_v8 = vld [vmem:[#allocation3 + $0x328] sm:$0xff] }
  0x96   :  { %1199 = vmatpush.msra.mxu0 %v399_v10  ;;  %1222 = vmatpush.msra.mxu2 %v511_v11  ;;  %v623_v10 = vld [vmem:[#allocation3 + $0x1040] sm:$0xff] }
  0x97   :  { %1098 = vmatmul.f32.gmra.mxu3 %v2917_v50  ;;  %1157 = vmatpush.msrb.mxu1 %v147_v12  ;;  %v735_v11 = vld [vmem:[#allocation3 + $0x13c0] sm:$0xff]  ;;  %v784_v12 = vld [vmem:[#allocation3 + $0x1548] sm:$0xff] }
  0x98   :  { %1180 = vmatpush.msrb.mxu3 %v259_v13  ;;  %1200 = vmatpush.msra.mxu0 %v392_v15  ;;  %v197_v13 = vld [vmem:[#allocation3 + $0x2f0] sm:$0xff]  ;;  %v616_v15 = vld [vmem:[#allocation3 + $0x1008] sm:$0xff] }
  0x99   :  { %1223 = vmatpush.msra.mxu2 %v504_v16  ;;  %1158 = vmatpush.msrb.mxu1 %v140_v18  ;;  %v728_v16 = vld [vmem:[#allocation3 + $0x1388] sm:$0xff]  ;;  %v777_v18 = vld [vmem:[#allocation3 + $0x1510] sm:$0xff] }
  0x9a   :  { %1121 = vmatmul.f32.gmra.mxu2 %v2925_v57  ;;  %1181 = vmatpush.msrb.mxu3 %v252_v19  ;;  %v190_v19 = vld [vmem:[#allocation3 + $0x2b8] sm:$0xff] }
  0x9b   :  { %1201 = vmatpush.msra.mxu0 %v385_v20  ;;  %1224 = vmatpush.msra.mxu2 %v497_v21  ;;  %v609_v20 = vld [vmem:[#allocation3 + $0xfd0] sm:$0xff] }
  0x9c   :  { %1075 = vmatmul.f32.gmra.mxu1 %v2906_v29  ;;  %1182 = vmatpush.msrb.mxu3 %v245_v22  ;;  %v721_v21 = vld [vmem:[#allocation3 + $0x1350] sm:$0xff]  ;;  %v323_v22 = vld [vmem:[#allocation3 + $0x6e0] sm:$0xff] }
  0x9d   :  { %1159 = vmatpush.msrb.mxu1 %v133_v23  ;;  %1202 = vmatpush.msra.mxu0 %v378_v24  ;;  %v183_v23 = vld [vmem:[#allocation3 + $0x280] sm:$0xff]  ;;  %v602_v24 = vld [vmem:[#allocation3 + $0xf98] sm:$0xff] }
  0x9e   :  { %1225 = vmatpush.msra.mxu2 %v490_v25  ;;  %1183 = vmatpush.msrb.mxu3 %v238_v26  ;;  %v714_v25 = vld [vmem:[#allocation3 + $0x1318] sm:$0xff]  ;;  %v316_v26 = vld [vmem:[#allocation3 + $0x6a8] sm:$0xff] }
  0x9f   :  { %1160 = vmatpush.msrb.mxu1 %v126_v27  ;;  %1203 = vmatpush.msra.mxu0 %v371_v28  ;;  %v176_v27 = vld [vmem:[#allocation3 + $0x248] sm:$0xff]  ;;  %v707_v28 = vld [vmem:[#allocation3 + $0x12e0] sm:$0xff] }
  0xa0   :  { %1226 = vmatpush.msra.mxu2 %v483_v30  ;;  %1184 = vmatpush.msrb.mxu3 %v231_v31  ;;  %v595_v30 = vld [vmem:[#allocation3 + $0xf60] sm:$0xff]  ;;  %v309_v31 = vld [vmem:[#allocation3 + $0x670] sm:$0xff] }
  0xa1   :  { %1161 = vmatpush.msrb.mxu1 %v119_v32  ;;  %1204 = vmatpush.msra.mxu0 %v364_v33  ;;  %v169_v32 = vld [vmem:[#allocation3 + $0x210] sm:$0xff]  ;;  %v700_v33 = vld [vmem:[#allocation3 + $0x12a8] sm:$0xff] }
  0xa2   :  { %1227 = vmatpush.msra.mxu2 %v476_v35  ;;  %2554 = vmatmul.msk.f32.gmra.mxu0 %vm819_vm0, %v2912_v44  ;;  %v302_v35 = vld [vmem:[#allocation3 + $0x638] sm:$0xff] }
  0xa3   :  { %1162 = vmatpush.msrb.mxu1 %v112_v36  ;;  %1185 = vmatpush.msrb.mxu3 %v224_v37  ;;  %v162_v36 = vld [vmem:[#allocation3 + $0x1d8] sm:$0xff]  ;;  %v693_v37 = vld [vmem:[#allocation3 + $0x1270] sm:$0xff] }
  0xa4   :  { %1205 = vmatpush.msra.mxu0 %v357_v38  ;;  %1228 = vmatpush.msra.mxu2 %v469_v40  ;;  %v295_v38 = vld [vmem:[#allocation3 + $0x600] sm:$0xff] }
  0xa5   :  { %1163 = vmatpush.msrb.mxu1 %v105_v41  ;;  %1186 = vmatpush.msrb.mxu3 %v217_v42  ;;  %v155_v40 = vld [vmem:[#allocation3 + $0x1a0] sm:$0xff]  ;;  %v574_v41 = vld [vmem:[#allocation3 + $0xeb8] sm:$0xff] }
  0xa6   :  { %1206 = vmatpush.msra.mxu0 %v350_v43  ;;  %1229 = vmatpush.msra.mxu2 %v462_v45  ;;  %v686_v42 = vld [vmem:[#allocation3 + $0x1238] sm:$0xff]  ;;  %v148_v43 = vld [vmem:[#allocation3 + $0x168] sm:$0xff]  ;;  %v567_v45 = vld [vmem:[#allocation3 + $0xe80] sm:$0xff] }
  0xa7   :  { %1240 = vmatpush.msra.mxu1 %v658_v46  ;;  %1263 = vmatpush.msra.mxu3 %v770_v47  ;;  %v679_v46 = vld [vmem:[#allocation3 + $0x1200] sm:$0xff]  ;;  %v281_v47 = vld [vmem:[#allocation3 + $0x590] sm:$0xff] }
  0xa8   :  { %1207 = vmatpush.msra.mxu0 %v343_v49  ;;  %1230 = vmatpush.msra.mxu2 %v455_v51  ;;  %v141_v49 = vld [vmem:[#allocation3 + $0x130] sm:$0xff]  ;;  %v560_v51 = vld [vmem:[#allocation3 + $0xe48] sm:$0xff] }
  0xa9   :  { %1241 = vmatpush.msra.mxu1 %v651_v52  ;;  %1264 = vmatpush.msra.mxu3 %v763_v55  ;;  %v672_v52 = vld [vmem:[#allocation3 + $0x11c8] sm:$0xff]  ;;  %v274_v55 = vld [vmem:[#allocation3 + $0x558] sm:$0xff] }
  0xaa   :  { %1208 = vmatpush.msra.mxu0 %v336_v56  ;;  %1231 = vmatpush.msra.mxu2 %v448_v58  ;;  %v134_v56 = vld [vmem:[#allocation3 + $0xf8] sm:$0xff]  ;;  %v665_v58 = vld [vmem:[#allocation3 + $0x1190] sm:$0xff] }
  0xab   :  { %1242 = vmatpush.msra.mxu1 %v644_v60  ;;  %1265 = vmatpush.msra.mxu3 %v756_v61  ;;  %v267_v60 = vld [vmem:[#allocation3 + $0x520] sm:$0xff] }
  0xac   :  { %1209 = vmatpush.msra.mxu0 %v329_v62  ;;  %1232 = vmatpush.msra.mxu2 %v441_v63  ;;  %v127_v61 = vld [vmem:[#allocation3 + $0xc0] sm:$0xff]  ;;  %v260_v62 = vld [vmem:[#allocation3 + $0x4e8] sm:$0xff] }
  0xad   :  { %1243 = vmatpush.msra.mxu1 %v637_v0  ;;  %1266 = vmatpush.msra.mxu3 %v749_v1  ;;  %v120_v63 = vld [vmem:[#allocation3 + $0x88] sm:$0xff] }
  0xae   :  { %1298 = vmatpush.msrb.mxu0 %v798_v2  ;;  %1309 = vmatpush.msrb.mxu2 %v211_v3  ;;  %v428_v0 = vld [vmem:[#allocation3 + $0xa28] sm:$0xff]  ;;  %v253_v2 = vld [vmem:[#allocation3 + $0x4b0] sm:$0xff] }
  0xaf   :  { %1244 = vmatpush.msra.mxu1 %v630_v5  ;;  %1267 = vmatpush.msra.mxu3 %v742_v6  ;;  %v540_v1 = vld [vmem:[#allocation3 + $0xda8] sm:$0xff]  ;;  %v113_v3 = vld [vmem:[#allocation3 + $0x50] sm:$0xff] }
  0xb0   :  { %1299 = vmatpush.msrb.mxu0 %v791_v7  ;;  %1310 = vmatpush.msrb.mxu2 %v204_v8  ;;  %v421_v5 = vld [vmem:[#allocation3 + $0x9f0] sm:$0xff]  ;;  %v106_v7 = vld [vmem:[#allocation3 + $0x18] sm:$0xff] }
  0xb1   :  { %1245 = vmatpush.msra.mxu1 %v623_v10  ;;  %1268 = vmatpush.msra.mxu3 %v735_v11  ;;  %v533_v6 = vld [vmem:[#allocation3 + $0xd70] sm:$0xff]  ;;  %v526_v8 = vld [vmem:[#allocation3 + $0xd38] sm:$0xff]  ;;  %v239_v10 = vld [vmem:[#allocation3 + $0x440] sm:$0xff] }
  0xb2   :  { %1300 = vmatpush.msrb.mxu0 %v784_v12  ;;  %1311 = vmatpush.msrb.mxu2 %v197_v13  ;;  %v659_v11 = vld [vmem:[#allocation3 + $0x1160] sm:$0xff] }
  0xb3   :  { %1246 = vmatpush.msra.mxu1 %v616_v15  ;;  %1269 = vmatpush.msra.mxu3 %v728_v16  ;;  %v407_v12 = vld [vmem:[#allocation3 + $0x980] sm:$0xff]  ;;  %v232_v15 = vld [vmem:[#allocation3 + $0x408] sm:$0xff] }
  0xb4   :  { %1301 = vmatpush.msrb.mxu0 %v777_v18  ;;  %1312 = vmatpush.msrb.mxu2 %v190_v19  ;;  %v519_v13 = vld [vmem:[#allocation3 + $0xd00] sm:$0xff]  ;;  %v400_v16 = vld [vmem:[#allocation3 + $0x948] sm:$0xff]  ;;  %v645_v19 = vld [vmem:[#allocation3 + $0x10f0] sm:$0xff] }
  0xb5   :  { %1210 = vmatmul.f32.vlgmr.msra.gmra.mxu0 %v2845_v17  ;;  %1247 = vmatpush.msra.mxu1 %v609_v20  ;;  %v588_v17 = vld [vmem:[#allocation3 + $0xf28] sm:$0xff]  ;;  %v393_v20 = vld [vmem:[#allocation3 + $0x910] sm:$0xff] }
  0xb6   :  { %1270 = vmatpush.msra.mxu3 %v721_v21  ;;  %1332 = vmatpush.msra.mxu0 %v323_v22  ;;  %v512_v18 = vld [vmem:[#allocation3 + $0xcc8] sm:$0xff]  ;;  %v505_v21 = vld [vmem:[#allocation3 + $0xc90] sm:$0xff]  ;;  %v218_v22 = vld [vmem:[#allocation3 + $0x398] sm:$0xff] }
  0xb7   :  { %1187 = vmatmul.f32.vlgmr.msrb.gmra.mxu3 %v2857_v39  ;;  %1313 = vmatpush.msrb.mxu2 %v183_v23  ;;  %v581_v39 = vld [vmem:[#allocation3 + $0xef0] sm:$0xff]  ;;  %v638_v23 = vld [vmem:[#allocation3 + $0x10b8] sm:$0xff] }
  0xb8   :  { %1248 = vmatpush.msra.mxu1 %v602_v24  ;;  %1271 = vmatpush.msra.mxu3 %v714_v25  ;;  %v386_v24 = vld [vmem:[#allocation3 + $0x8d8] sm:$0xff]  ;;  %v771_v25 = vld [vmem:[#allocation3 + $0x14e0] sm:$0xff] }
  0xb9   :  { %1333 = vmatpush.msra.mxu0 %v316_v26  ;;  %1314 = vmatpush.msrb.mxu2 %v176_v27  ;;  %v631_v26 = vld [vmem:[#allocation3 + $0x1080] sm:$0xff] }
  0xba   :  { %1164 = vmatmul.f32.vlgmr.msrb.gmra.mxu1 %v2851_v34  ;;  %1272 = vmatpush.msra.mxu3 %v707_v28  ;;  %v288_v34 = vld [vmem:[#allocation3 + $0x5c8] sm:$0xff]  ;;  %v379_v27 = vld [vmem:[#allocation3 + $0x8a0] sm:$0xff] }
  0xbb   :  { %1249 = vmatpush.msra.mxu1 %v595_v30  ;;  %1334 = vmatpush.msra.mxu0 %v309_v31  ;;  %v764_v28 = vld [vmem:[#allocation3 + $0x14a8] sm:$0xff] }
  0xbc   :  { %1315 = vmatpush.msrb.mxu2 %v169_v32  ;;  %1273 = vmatpush.msra.mxu3 %v700_v33  ;;  %v624_v30 = vld [vmem:[#allocation3 + $0x1048] sm:$0xff]  ;;  %v757_v33 = vld [vmem:[#allocation3 + $0x1470] sm:$0xff] }
  0xbd   :  { %1250 = vmatpush.msra.mxu1 %v588_v17  ;;  %1335 = vmatpush.msra.mxu0 %v302_v35  ;;  %v372_v31 = vld [vmem:[#allocation3 + $0x868] sm:$0xff]  ;;  %v617_v17 = vld [vmem:[#allocation3 + $0x1010] sm:$0xff] }
  0xbe   :  { %1316 = vmatpush.msrb.mxu2 %v162_v36  ;;  %1274 = vmatpush.msra.mxu3 %v693_v37  ;;  %v484_v32 = vld [vmem:[#allocation3 + $0xbe8] sm:$0xff]  ;;  %v477_v35 = vld [vmem:[#allocation3 + $0xbb0] sm:$0xff]  ;;  %v750_v36 = vld [vmem:[#allocation3 + $0x1438] sm:$0xff] }
  0xbf   :  { %1251 = vmatpush.msra.mxu1 %v581_v39  ;;  %1336 = vmatpush.msra.mxu0 %v295_v38  ;;  %v610_v37 = vld [vmem:[#allocation3 + $0xfd8] sm:$0xff] }
  0xc0   :  { %1190 = vmatmul.f32.gmra.mxu3 %v2881_v59  ;;  %1317 = vmatpush.msrb.mxu2 %v155_v40  ;;  %v553_v59 = vld [vmem:[#allocation3 + $0xe10] sm:$0xff]  ;;  %v358_v39 = vld [vmem:[#allocation3 + $0x7f8] sm:$0xff]  ;;  %v743_v40 = vld [vmem:[#allocation3 + $0x1400] sm:$0xff] }
  0xc1   :  { %1252 = vmatpush.msra.mxu1 %v574_v41  ;;  %1275 = vmatpush.msra.mxu3 %v686_v42  ;;  %v470_v38 = vld [vmem:[#allocation3 + $0xb78] sm:$0xff]  ;;  %v603_v41 = vld [vmem:[#allocation3 + $0xfa0] sm:$0xff] }
  0xc2   :  { %1337 = vmatpush.msra.mxu0 %v288_v34  ;;  %1318 = vmatpush.msrb.mxu2 %v148_v43  ;;  %v351_v42 = vld [vmem:[#allocation3 + $0x7c0] sm:$0xff]  ;;  %v736_v43 = vld [vmem:[#allocation3 + $0x13c8] sm:$0xff] }
  0xc3   :  { %1167 = vmatmul.f32.gmra.mxu1 %v2869_v53  ;;  %1233 = vmatmul.f32.vlgmr.msra.gmra.mxu2 %v2874_v54  ;;  %v435_v53 = vld [vmem:[#allocation3 + $0xa60] sm:$0xff] }
  0xc4   :  { %1253 = vmatpush.msra.mxu1 %v567_v45  ;;  %1276 = vmatpush.msra.mxu3 %v679_v46  ;;  %v547_v54 = vld [vmem:[#allocation3 + $0xde0] sm:$0xff]  ;;  %v596_v45 = vld [vmem:[#allocation3 + $0xf68] sm:$0xff] }
  0xc5   :  { %1338 = vmatpush.msra.mxu0 %v281_v47  ;;  %1319 = vmatpush.msrb.mxu2 %v141_v49  ;;  %v463_v34 = vld [vmem:[#allocation3 + $0xb40] sm:$0xff]  ;;  %v344_v46 = vld [vmem:[#allocation3 + $0x788] sm:$0xff]  ;;  %v729_v49 = vld [vmem:[#allocation3 + $0x1390] sm:$0xff] }
  0xc6   :  { %1254 = vmatpush.msra.mxu1 %v560_v51  ;;  %1277 = vmatpush.msra.mxu3 %v672_v52  ;;  %v456_v47 = vld [vmem:[#allocation3 + $0xb08] sm:$0xff]  ;;  %v589_v51 = vld [vmem:[#allocation3 + $0xf30] sm:$0xff] }
  0xc7   :  { %1339 = vmatpush.msra.mxu0 %v274_v55  ;;  %1320 = vmatpush.msrb.mxu2 %v134_v56  ;;  %v337_v52 = vld [vmem:[#allocation3 + $0x750] sm:$0xff]  ;;  %v722_v56 = vld [vmem:[#allocation3 + $0x1358] sm:$0xff] }
  0xc8   :  { %1255 = vmatpush.msra.mxu1 %v553_v59  ;;  %1278 = vmatpush.msra.mxu3 %v665_v58  ;;  %v449_v55 = vld [vmem:[#allocation3 + $0xad0] sm:$0xff]  ;;  %v582_v59 = vld [vmem:[#allocation3 + $0xef8] sm:$0xff] }
  0xc9   :  { %1340 = vmatpush.msra.mxu0 %v267_v60  ;;  %1279 = vmatmul.f32.vlgmr.msra.gmra.mxu3 %v2899_v14  ;;  %v246_v14 = vld [vmem:[#allocation3 + $0x478] sm:$0xff] }
  0xca   :  { %1213 = vmatmul.f32.gmra.mxu0 %v2863_v48  ;;  %1321 = vmatpush.msrb.mxu2 %v127_v61  ;;  %v414_v48 = vld [vmem:[#allocation3 + $0x9b8] sm:$0xff]  ;;  %v715_v61 = vld [vmem:[#allocation3 + $0x1320] sm:$0xff] }
  0xcb   :  { %1355 = vmatpush.msrb.mxu1 %v435_v53  ;;  %1378 = vmatpush.msrb.mxu3 %v547_v54  ;;  %v330_v58 = vld [vmem:[#allocation3 + $0x718] sm:$0xff]  ;;  %v2969_v53 = vld [vmem:[%s3501_s0 + $0x8] sm:$0xff] }
  0xcc   :  { %1341 = vmatpush.msra.mxu0 %v260_v62  ;;  %1322 = vmatpush.msrb.mxu2 %v120_v63  ;;  %v442_v60 = vld [vmem:[#allocation3 + $0xa98] sm:$0xff]  ;;  %v575_v54 = vld [vmem:[#allocation3 + $0xec0] sm:$0xff] }
  0xcd   :  { %1356 = vmatpush.msrb.mxu1 %v428_v0  ;;  %1379 = vmatpush.msrb.mxu3 %v540_v1  ;;  %v799_v62 = vld [vmem:[#allocation3 + $0x15c0] sm:$0xff]  ;;  %v2975_v63 = vld [vmem:[%s3501_s0 + $0x38] sm:$0xff]  ;;  %v212_v0 = vld [vmem:[#allocation3 + $0x368] sm:$0xff] }
  0xce   :  { %1256 = vmatmul.f32.vlgmr.msra.gmra.mxu1 %v2894_v9  ;;  %1342 = vmatpush.msra.mxu0 %v253_v2  ;;  %v652_v9 = vld [vmem:[#allocation3 + $0x1128] sm:$0xff] }
  0xcf   :  { %1323 = vmatpush.msrb.mxu2 %v113_v3  ;;  %1357 = vmatpush.msrb.mxu1 %v421_v5  ;;  %v708_v1 = vld [vmem:[#allocation3 + $0x12e8] sm:$0xff]  ;;  %v205_v5 = vld [vmem:[#allocation3 + $0x330] sm:$0xff] }
  0xd0   :  { %1380 = vmatpush.msrb.mxu3 %v533_v6  ;;  %1236 = vmatmul.f32.gmra.mxu2 %v2906_v29  ;;  %v225_v29 = vld [vmem:[#allocation3 + $0x3d0] sm:$0xff]  ;;  %v568_v2 = vld [vmem:[#allocation3 + $0xe88] sm:$0xff] }
  0xd1   :  { %1343 = vmatpush.msra.mxu0 %v246_v14  ;;  %1324 = vmatpush.msrb.mxu2 %v106_v7  ;;  %v792_v3 = vld [vmem:[#allocation3 + $0x1588] sm:$0xff]  ;;  %v701_v14 = vld [vmem:[#allocation3 + $0x12b0] sm:$0xff] }
  0xd2   :  { %1358 = vmatpush.msrb.mxu1 %v414_v48  ;;  %1381 = vmatpush.msrb.mxu3 %v526_v8  ;;  %v2981_v6 = vld [vmem:[%s3501_s0 + $0x10] sm:$0xff]  ;;  %v198_v8 = vld [vmem:[#allocation3 + $0x2f8] sm:$0xff] }
  0xd3   :  { %1344 = vmatpush.msra.mxu0 %v239_v10  ;;  %1401 = vmatpush.msra.mxu2 %v659_v11  ;;  %v561_v7 = vld [vmem:[#allocation3 + $0xe50] sm:$0xff]  ;;  %v694_v10 = vld [vmem:[#allocation3 + $0x1278] sm:$0xff] }
  0xd4   :  { %2555 = vmatmul.msk.f32.vlgmr.msrb.gmra.mxu0 %vm819_vm0, %v2887_v4  ;;  %1359 = vmatpush.msrb.mxu1 %v407_v12  ;;  %v498_v4 = vld [vmem:[#allocation3 + $0xc58] sm:$0xff]  ;;  %v785_v48 = vld [vmem:[#allocation3 + $0x1550] sm:$0xff] }
  0xd5   :  { %1382 = vmatpush.msrb.mxu3 %v519_v13  ;;  %1345 = vmatpush.msra.mxu0 %v232_v15  ;;  %v554_v11 = vld [vmem:[#allocation3 + $0xe18] sm:$0xff]  ;;  %v191_v13 = vld [vmem:[#allocation3 + $0x2c0] sm:$0xff] }
  0xd6   :  { %1282 = vmatmul.f32.gmra.mxu3 %v2925_v57  ;;  %1402 = vmatpush.msra.mxu2 %v652_v9  ;;  %v491_v57 = vld [vmem:[#allocation3 + $0xc20] sm:$0xff]  ;;  %v778_v12 = vld [vmem:[#allocation3 + $0x1518] sm:$0xff] }
  0xd7   :  { %1360 = vmatpush.msrb.mxu1 %v400_v16  ;;  %1383 = vmatpush.msrb.mxu3 %v512_v18  ;;  %v2987_v15 = vld [vmem:[%s3501_s0 + $0x18] sm:$0xff]  ;;  %v687_v9 = vld [vmem:[#allocation3 + $0x1240] sm:$0xff]  ;;  %v324_v16 = vld [vmem:[#allocation3 + $0x6e8] sm:$0xff] }
  0xd8   :  { %1346 = vmatpush.msra.mxu0 %v225_v29  ;;  %1403 = vmatpush.msra.mxu2 %v645_v19  ;;  %v436_v18 = vld [vmem:[#allocation3 + $0xa68] sm:$0xff]  ;;  %v2993_v29 = vld [vmem:[%s3501_s0 + $0x40] sm:$0xff] }
  0xd9   :  { %1361 = vmatpush.msrb.mxu1 %v393_v20  ;;  %1384 = vmatpush.msrb.mxu3 %v505_v21  ;;  %v184_v19 = vld [vmem:[#allocation3 + $0x288] sm:$0xff]  ;;  %v2999_v20 = vld [vmem:[%s3501_s0 + $0x20] sm:$0xff] }
  0xda   :  { %1259 = vmatmul.f32.gmra.mxu1 %v2917_v50  ;;  %1347 = vmatpush.msra.mxu0 %v218_v22  ;;  %v365_v50 = vld [vmem:[#allocation3 + $0x830] sm:$0xff]  ;;  %v680_v21 = vld [vmem:[#allocation3 + $0x1208] sm:$0xff] }
  0xdb   :  { %1404 = vmatpush.msra.mxu2 %v638_v23  ;;  %1362 = vmatpush.msrb.mxu1 %v386_v24  ;;  %v317_v22 = vld [vmem:[#allocation3 + $0x6b0] sm:$0xff] }
  0xdc   :  { %1385 = vmatpush.msrb.mxu3 %v498_v4  ;;  %1424 = vmatpush.msrb.mxu0 %v771_v25  ;;  %v429_v23 = vld [vmem:[#allocation3 + $0xa30] sm:$0xff]  ;;  %v3005_v4 = vld [vmem:[%s3501_s0 + $0x48] sm:$0xff] }
  0xdd   :  { %1405 = vmatpush.msra.mxu2 %v631_v26  ;;  %1363 = vmatpush.msrb.mxu1 %v379_v27  ;;  %v177_v24 = vld [vmem:[#allocation3 + $0x250] sm:$0xff]  ;;  %v310_v26 = vld [vmem:[#allocation3 + $0x678] sm:$0xff] }
  0xde   :  { %1386 = vmatpush.msrb.mxu3 %v491_v57  ;;  %1425 = vmatpush.msrb.mxu0 %v764_v28  ;;  %v673_v25 = vld [vmem:[#allocation3 + $0x11d0] sm:$0xff]  ;;  %v422_v27 = vld [vmem:[#allocation3 + $0x9f8] sm:$0xff] }
  0xdf   :  { %2556 = vmatmul.msk.f32.gmra.mxu0 %vm819_vm0, %v2912_v44  ;;  %1406 = vmatpush.msra.mxu2 %v624_v30  ;;  %v2963_v44 = vld [vmem:[%s3501_s0] sm:$0xff] }
  0xe0   :  { %1364 = vmatpush.msrb.mxu1 %v372_v31  ;;  %1387 = vmatpush.msrb.mxu3 %v484_v32  ;;  %v170_v57 = vld [vmem:[#allocation3 + $0x218] sm:$0xff]  ;;  %v303_v30 = vld [vmem:[#allocation3 + $0x640] sm:$0xff] }
  0xe1   :  { %1426 = vmatpush.msrb.mxu0 %v757_v33  ;;  %1407 = vmatpush.msra.mxu2 %v617_v17  ;;  %v666_v28 = vld [vmem:[#allocation3 + $0x1198] sm:$0xff]  ;;  %v415_v31 = vld [vmem:[#allocation3 + $0x9c0] sm:$0xff]  ;;  %v548_v33 = vld [vmem:[#allocation3 + $0xde8] sm:$0xff] }
  0xe2   :  { %1365 = vmatpush.msrb.mxu1 %v365_v50  ;;  %1388 = vmatpush.msrb.mxu3 %v477_v35  ;;  %v163_v32 = vld [vmem:[#allocation3 + $0x1e0] sm:$0xff]  ;;  %v296_v17 = vld [vmem:[#allocation3 + $0x608] sm:$0xff] }
  0xe3   :  { %1427 = vmatpush.msrb.mxu0 %v750_v36  ;;  %1408 = vmatpush.msra.mxu2 %v610_v37  ;;  %v408_v50 = vld [vmem:[#allocation3 + $0x988] sm:$0xff]  ;;  %v541_v36 = vld [vmem:[#allocation3 + $0xdb0] sm:$0xff] }
  0xe4   :  { %1325 = vmatmul.f32.vlgmr.msrb.gmra.mxu2 %v2963_v44  ;;  %1366 = vmatpush.msrb.mxu1 %v358_v39  ;;  %v156_v35 = vld [vmem:[#allocation3 + $0x1a8] sm:$0xff]  ;;  %v289_v39 = vld [vmem:[#allocation3 + $0x5d0] sm:$0xff] }
  0xe5   :  { %1389 = vmatpush.msrb.mxu3 %v470_v38  ;;  %1428 = vmatpush.msrb.mxu0 %v743_v40  ;;  %v3011_v37 = vld [vmem:[%s3501_s0 + $0x28] sm:$0xff]  ;;  %v401_v38 = vld [vmem:[#allocation3 + $0x950] sm:$0xff] }
  0xe6   :  { %1409 = vmatpush.msra.mxu2 %v603_v41  ;;  %1367 = vmatpush.msrb.mxu1 %v351_v42  ;;  %v149_v40 = vld [vmem:[#allocation3 + $0x170] sm:$0xff]  ;;  %v534_v41 = vld [vmem:[#allocation3 + $0xd78] sm:$0xff] }
  0xe7   :  { %1390 = vmatpush.msrb.mxu3 %v463_v34  ;;  %1429 = vmatpush.msrb.mxu0 %v736_v43  ;;  %v3017_v42 = vld [vmem:[%s3501_s0 + $0x50] sm:$0xff]  ;;  %v282_v43 = vld [vmem:[#allocation3 + $0x598] sm:$0xff] }
  0xe8   :  { %1410 = vmatpush.msra.mxu2 %v596_v45  ;;  %1368 = vmatpush.msrb.mxu1 %v344_v46  ;;  %v3023_v34 = vld [vmem:[%s3501_s0 + $0x30] sm:$0xff]  ;;  %v394_v45 = vld [vmem:[#allocation3 + $0x918] sm:$0xff] }
  0xe9   :  { %1391 = vmatpush.msrb.mxu3 %v456_v47  ;;  %1430 = vmatpush.msrb.mxu0 %v729_v49  ;;  %v142_v46 = vld [vmem:[#allocation3 + $0x138] sm:$0xff]  ;;  %v527_v47 = vld [vmem:[#allocation3 + $0xd40] sm:$0xff] }
  0xea   :  { %1411 = vmatpush.msra.mxu2 %v589_v51  ;;  %1369 = vmatpush.msrb.mxu1 %v337_v52  ;;  %v275_v49 = vld [vmem:[#allocation3 + $0x560] sm:$0xff]  ;;  %v3030_v51 = vld [vmem:[%s3501_s0 + $0x58] sm:$0xff] }
  0xeb   :  { %1392 = vmatpush.msrb.mxu3 %v449_v55  ;;  %1431 = vmatpush.msrb.mxu0 %v722_v56  ;;  %v387_v52 = vld [vmem:[#allocation3 + $0x8e0] sm:$0xff]  ;;  %v520_v56 = vld [vmem:[#allocation3 + $0xd08] sm:$0xff] }
  0xec   :  { %1412 = vmatpush.msra.mxu2 %v582_v59  ;;  %1348 = vmatmul.f32.vlgmr.msra.gmra.mxu0 %v2969_v53  ;;  %v135_v55 = vld [vmem:[#allocation3 + $0x100] sm:$0xff]  ;;  %v268_v59 = vld [vmem:[#allocation3 + $0x528] sm:$0xff] }
  0xed   :  { %1328 = vmatmul.f32.gmra.mxu2 %v2975_v63  ;;  %1370 = vmatpush.msrb.mxu1 %v330_v58  ;;  %v380_v58 = vld [vmem:[#allocation3 + $0x8a8] sm:$0xff] }
  0xee   :  { %1393 = vmatpush.msrb.mxu3 %v442_v60  ;;  %1432 = vmatpush.msrb.mxu0 %v715_v61  ;;  %v128_v60 = vld [vmem:[#allocation3 + $0xc8] sm:$0xff]  ;;  %v513_v61 = vld [vmem:[#allocation3 + $0xcd0] sm:$0xff] }
  0xef   :  { %1413 = vmatpush.msra.mxu2 %v575_v54  ;;  %1459 = vmatpush.msra.mxu1 %v799_v62  ;;  %v261_v54 = vld [vmem:[#allocation3 + $0x4f0] sm:$0xff] }
  0xf0   :  { %1470 = vmatpush.msra.mxu3 %v212_v0  ;;  %1371 = vmatmul.f32.vlgmr.msrb.gmra.mxu1 %v2981_v6  ;;  %v373_v62 = vld [vmem:[#allocation3 + $0x870] sm:$0xff] }
  0xf1   :  { %1433 = vmatpush.msrb.mxu0 %v708_v1  ;;  %1414 = vmatpush.msra.mxu2 %v568_v2  ;;  %v121_v0 = vld [vmem:[#allocation3 + $0x90] sm:$0xff]  ;;  %v506_v1 = vld [vmem:[#allocation3 + $0xc98] sm:$0xff] }
  0xf2   :  { %1460 = vmatpush.msra.mxu1 %v792_v3  ;;  %1471 = vmatpush.msra.mxu3 %v205_v5  ;;  %v254_v2 = vld [vmem:[#allocation3 + $0x4b8] sm:$0xff] }
  0xf3   :  { %1434 = vmatpush.msrb.mxu0 %v701_v14  ;;  %1415 = vmatpush.msra.mxu2 %v561_v7  ;;  %v366_v3 = vld [vmem:[#allocation3 + $0x838] sm:$0xff]  ;;  %v499_v14 = vld [vmem:[#allocation3 + $0xc60] sm:$0xff] }
  0xf4   :  { %1461 = vmatpush.msra.mxu1 %v785_v48  ;;  %1472 = vmatpush.msra.mxu3 %v198_v8  ;;  %v114_v5 = vld [vmem:[#allocation3 + $0x58] sm:$0xff]  ;;  %v359_v7 = vld [vmem:[#allocation3 + $0x800] sm:$0xff] }
  0xf5   :  { %1394 = vmatmul.f32.vlgmr.msrb.gmra.mxu3 %v2987_v15  ;;  %1435 = vmatpush.msrb.mxu0 %v694_v10  ;;  %v3036_v48 = vld [vmem:[%s3501_s0 + $0x60] sm:$0xff] }
  0xf6   :  { %1416 = vmatpush.msra.mxu2 %v554_v11  ;;  %1462 = vmatpush.msra.mxu1 %v778_v12  ;;  %v247_v8 = vld [vmem:[#allocation3 + $0x480] sm:$0xff]  ;;  %v492_v11 = vld [vmem:[#allocation3 + $0xc28] sm:$0xff] }
  0xf7   :  { %1473 = vmatpush.msra.mxu3 %v191_v13  ;;  %1351 = vmatmul.f32.gmra.mxu0 %v2993_v29  ;;  %v107_v10 = vld [vmem:[#allocation3 + $0x20] sm:$0xff]  ;;  %v352_v12 = vld [vmem:[#allocation3 + $0x7c8] sm:$0xff] }
  0xf8   :  { %1417 = vmatmul.f32.vlgmr.msra.gmra.mxu2 %v2999_v20  ;;  %1436 = vmatpush.msrb.mxu0 %v687_v9  ;;  %v3042_v13 = vld [vmem:[%s3501_s0 + $0x68] sm:$0xff] }
  0xf9   :  { %1493 = vmatpush.msrb.mxu1 %v324_v16  ;;  %1516 = vmatpush.msrb.mxu2 %v436_v18  ;;  %v240_v9 = vld [vmem:[#allocation3 + $0x448] sm:$0xff]  ;;  %v485_v18 = vld [vmem:[#allocation3 + $0xbf0] sm:$0xff] }
  0xfa   :  { %1474 = vmatpush.msra.mxu3 %v184_v19  ;;  %1374 = vmatmul.f32.gmra.mxu1 %v3005_v4  ;;  %v660_v16 = vld [vmem:[#allocation3 + $0x1168] sm:$0xff]  ;;  %v345_v19 = vld [vmem:[#allocation3 + $0x790] sm:$0xff] }
  0xfb   :  { %1437 = vmatpush.msrb.mxu0 %v680_v21  ;;  %1494 = vmatpush.msrb.mxu1 %v317_v22  ;;  %v233_v21 = vld [vmem:[#allocation3 + $0x410] sm:$0xff] }
  0xfc   :  { %1517 = vmatpush.msrb.mxu2 %v429_v23  ;;  %1475 = vmatpush.msra.mxu3 %v177_v24  ;;  %v653_v22 = vld [vmem:[#allocation3 + $0x1130] sm:$0xff]  ;;  %v478_v23 = vld [vmem:[#allocation3 + $0xbb8] sm:$0xff] }
  0xfd   :  { %1438 = vmatpush.msrb.mxu0 %v673_v25  ;;  %1495 = vmatpush.msrb.mxu1 %v310_v26  ;;  %v338_v24 = vld [vmem:[#allocation3 + $0x758] sm:$0xff] }
  0xfe   :  { %1518 = vmatpush.msrb.mxu2 %v422_v27  ;;  %1476 = vmatpush.msra.mxu3 %v170_v57  ;;  %v226_v25 = vld [vmem:[#allocation3 + $0x3d8] sm:$0xff]  ;;  %v3046_v27 = vpop.f32.mrf.mxu0  ;;  %v471_v57 = vld [vmem:[#allocation3 + $0xb80] sm:$0xff] }
  0xff   :  { %1439 = vmatpush.msrb.mxu0 %v666_v28  ;;  %1496 = vmatpush.msrb.mxu1 %v303_v30  ;;  %v646_v26 = vld [vmem:[#allocation3 + $0x10f8] sm:$0xff]  ;;  %v331_v28 = vld [vmem:[#allocation3 + $0x720] sm:$0xff] }
 0x100   :  { %1519 = vmatpush.msrb.mxu2 %v415_v31  ;;  %1477 = vmatpush.msra.mxu3 %v163_v32  ;;  %v219_v30 = vld [vmem:[#allocation3 + $0x3a0] sm:$0xff]  ;;  %v464_v32 = vld [vmem:[#allocation3 + $0xb48] sm:$0xff] }
 0x101   :  { %1539 = vmatpush.msra.mxu0 %v548_v33  ;;  %1497 = vmatpush.msrb.mxu1 %v296_v17  ;;  %v639_v31 = vld [vmem:[#allocation3 + $0x10c0] sm:$0xff]  ;;  %v772_v33 = vld [vmem:[#allocation3 + $0x14e8] sm:$0xff] }
 0x102   :  { %1440 = vmatmul.f32.vlgmr.msrb.gmra.mxu0 %v3011_v37  ;;  %1520 = vmatpush.msrb.mxu2 %v408_v50  ;;  %v800_v17 = vld [vmem:[#allocation3 + $0x15c8] sm:$0xff] }
 0x103   :  { %1478 = vmatpush.msra.mxu3 %v156_v35  ;;  %1540 = vmatpush.msra.mxu0 %v541_v36  ;;  %v632_v50 = vld [vmem:[#allocation3 + $0x1088] sm:$0xff]  ;;  %v457_v35 = vld [vmem:[#allocation3 + $0xb10] sm:$0xff] }
 0x104   :  { %1397 = vmatmul.f32.gmra.mxu3 %v3017_v42  ;;  %2557 = vmatmul.msk.f32.vlgmr.msra.gmra.mxu1 %vm819_vm0, %v3023_v34  ;;  %v765_v36 = vld [vmem:[#allocation3 + $0x14b0] sm:$0xff] }
 0x105   :  { %1498 = vmatpush.msrb.mxu1 %v289_v39  ;;  %1521 = vmatpush.msrb.mxu2 %v401_v38  ;;  %v793_v39 = vld [vmem:[#allocation3 + $0x1590] sm:$0xff] }
 0x106   :  { %1479 = vmatpush.msra.mxu3 %v149_v40  ;;  %1541 = vmatpush.msra.mxu0 %v534_v41  ;;  %v625_v38 = vld [vmem:[#allocation3 + $0x1050] sm:$0xff]  ;;  %v450_v40 = vld [vmem:[#allocation3 + $0xad8] sm:$0xff] }
 0x107   :  { %1420 = vmatmul.f32.gmra.mxu2 %v3030_v51  ;;  %1499 = vmatpush.msrb.mxu1 %v282_v43  ;;  %v758_v41 = vld [vmem:[#allocation3 + $0x1478] sm:$0xff] }
 0x108   :  { %1522 = vmatpush.msrb.mxu2 %v394_v45  ;;  %1480 = vmatpush.msra.mxu3 %v142_v46  ;;  %v786_v43 = vld [vmem:[#allocation3 + $0x1558] sm:$0xff]  ;;  %v443_v46 = vld [vmem:[#allocation3 + $0xaa0] sm:$0xff] }
 0x109   :  { %1542 = vmatpush.msra.mxu0 %v527_v47  ;;  %1500 = vmatpush.msrb.mxu1 %v275_v49  ;;  %v618_v45 = vld [vmem:[#allocation3 + $0x1018] sm:$0xff]  ;;  %v751_v47 = vld [vmem:[#allocation3 + $0x1440] sm:$0xff] }
 0x10a   :  { %1523 = vmatpush.msrb.mxu2 %v387_v52  ;;  %1481 = vmatpush.msra.mxu3 %v135_v55  ;;  %v779_v49 = vld [vmem:[#allocation3 + $0x1520] sm:$0xff]  ;;  %v3048_v55 = vpop.f32.mrf.mxu0 }
 0x10b   :  { %1543 = vmatpush.msra.mxu0 %v520_v56  ;;  %1501 = vmatpush.msrb.mxu1 %v268_v59  ;;  %v611_v52 = vld [vmem:[#allocation3 + $0xfe0] sm:$0xff]  ;;  %v213_v56 = vld [vmem:[#allocation3 + $0x370] sm:$0xff] }
 0x10c   :  { %1524 = vmatpush.msrb.mxu2 %v380_v58  ;;  %1482 = vmatpush.msra.mxu3 %v128_v60  ;;  %v325_v59 = vld [vmem:[#allocation3 + $0x6f0] sm:$0xff]  ;;  %v744_v58 = vld [vmem:[#allocation3 + $0x1408] sm:$0xff] }
 0x10d   :  { %1544 = vmatpush.msra.mxu0 %v513_v61  ;;  %1502 = vmatpush.msrb.mxu1 %v261_v54  ;;  %v604_v60 = vld [vmem:[#allocation3 + $0xfa8] sm:$0xff]  ;;  %v206_v61 = vld [vmem:[#allocation3 + $0x338] sm:$0xff] }
 0x10e   :  { %1525 = vmatpush.msrb.mxu2 %v373_v62  ;;  %1483 = vmatpush.msra.mxu3 %v121_v0  ;;  %v318_v54 = vld [vmem:[#allocation3 + $0x6b8] sm:$0xff]  ;;  %v737_v62 = vld [vmem:[#allocation3 + $0x13d0] sm:$0xff] }
 0x10f   :  { %1545 = vmatpush.msra.mxu0 %v506_v1  ;;  %1503 = vmatpush.msrb.mxu1 %v254_v2  ;;  %v597_v0 = vld [vmem:[#allocation3 + $0xf70] sm:$0xff]  ;;  %v199_v1 = vld [vmem:[#allocation3 + $0x300] sm:$0xff] }
 0x110   :  { %1443 = vmatmul.f32.gmra.mxu0 %v3036_v48  ;;  %1526 = vmatpush.msrb.mxu2 %v366_v3  ;;  %v311_v2 = vld [vmem:[#allocation3 + $0x680] sm:$0xff]  ;;  %v3052_v3 = vpop.f32.mrf.mxu2 }
 0x111   :  { %1484 = vmatpush.msra.mxu3 %v114_v5  ;;  %1546 = vmatpush.msra.mxu0 %v499_v14  ;;  %v730_v5 = vld [vmem:[#allocation3 + $0x1398] sm:$0xff] }
 0x112   :  { %2558 = vmatmul.msk.f32.gmra.mxu1 %vm819_vm0, %v3042_v13  ;;  %1527 = vmatpush.msrb.mxu2 %v359_v7  ;;  %v590_v14 = vld [vmem:[#allocation3 + $0xf38] sm:$0xff]  ;;  %v192_v7 = vld [vmem:[#allocation3 + $0x2c8] sm:$0xff] }
 0x113   :  { %1504 = vmatpush.msrb.mxu1 %v247_v8  ;;  %1485 = vmatpush.msra.mxu3 %v107_v10  ;;  %v304_v8 = vld [vmem:[#allocation3 + $0x648] sm:$0xff]  ;;  %v723_v10 = vld [vmem:[#allocation3 + $0x1360] sm:$0xff] }
 0x114   :  { %1547 = vmatpush.msra.mxu0 %v492_v11  ;;  %1528 = vmatpush.msrb.mxu2 %v352_v12  ;;  %v583_v11 = vld [vmem:[#allocation3 + $0xf00] sm:$0xff]  ;;  %v185_v12 = vld [vmem:[#allocation3 + $0x290] sm:$0xff] }
 0x115   :  { %1505 = vmatpush.msrb.mxu1 %v240_v9  ;;  %1562 = vmatpush.msrb.mxu3 %v660_v16  ;;  %v297_v9 = vld [vmem:[#allocation3 + $0x610] sm:$0xff]  ;;  %v3054_v16 = vpop.f32.mrf.mxu0 }
 0x116   :  { %1548 = vmatpush.msra.mxu0 %v485_v18  ;;  %1529 = vmatpush.msrb.mxu2 %v345_v19  ;;  %v716_v18 = vld [vmem:[#allocation3 + $0x1328] sm:$0xff] }
 0x117   :  { %1506 = vmatpush.msrb.mxu1 %v233_v21  ;;  %1563 = vmatpush.msrb.mxu3 %v653_v22  ;;  %v576_v19 = vld [vmem:[#allocation3 + $0xec8] sm:$0xff]  ;;  %v178_v21 = vld [vmem:[#allocation3 + $0x258] sm:$0xff] }
 0x118   :  { %1549 = vmatpush.msra.mxu0 %v478_v23  ;;  %1530 = vmatpush.msrb.mxu2 %v338_v24  ;;  %v290_v22 = vld [vmem:[#allocation3 + $0x5d8] sm:$0xff]  ;;  %v709_v23 = vld [vmem:[#allocation3 + $0x12f0] sm:$0xff] }
 0x119   :  { %1507 = vmatpush.msrb.mxu1 %v226_v25  ;;  %1564 = vmatpush.msrb.mxu3 %v646_v26  ;;  %v569_v24 = vld [vmem:[#allocation3 + $0xe90] sm:$0xff]  ;;  %v3058_v25 = vpop.f32.mrf.mxu1  ;;  %v171_v26 = vld [vmem:[#allocation3 + $0x220] sm:$0xff] }
 0x11a   :  { %1550 = vmatpush.msra.mxu0 %v471_v57  ;;  %1531 = vmatpush.msrb.mxu2 %v331_v28  ;;  %v283_v57 = vld [vmem:[#allocation3 + $0x5a0] sm:$0xff]  ;;  %v702_v28 = vld [vmem:[#allocation3 + $0x12b8] sm:$0xff] }
 0x11b   :  { %1508 = vmatpush.msrb.mxu1 %v219_v30  ;;  %1565 = vmatpush.msrb.mxu3 %v639_v31  ;;  %v3060_v30 = vpop.f32.mrf.mxu2  ;;  %v562_v31 = vld [vmem:[#allocation3 + $0xe58] sm:$0xff] }
 0x11c   :  { %1551 = vmatpush.msra.mxu0 %v464_v32  ;;  %1620 = vmatpush.msra.mxu2 %v800_v17  ;;  %v164_v32 = vld [vmem:[#allocation3 + $0x1e8] sm:$0xff]  ;;  %v695_v17 = vld [vmem:[#allocation3 + $0x1280] sm:$0xff] }
 0x11d   :  { %1585 = vmatpush.msra.mxu1 %v772_v33  ;;  %1566 = vmatpush.msrb.mxu3 %v632_v50  ;;  %v276_v33 = vld [vmem:[#allocation3 + $0x568] sm:$0xff]  ;;  %v3062_v50 = vpop.f32.mrf.mxu0 }
 0x11e   :  { %1552 = vmatpush.msra.mxu0 %v457_v35  ;;  %1621 = vmatpush.msra.mxu2 %v793_v39  ;;  %v555_v35 = vld [vmem:[#allocation3 + $0xe20] sm:$0xff]  ;;  %v269_v39 = vld [vmem:[#allocation3 + $0x530] sm:$0xff] }
 0x11f   :  { %1586 = vmatpush.msra.mxu1 %v765_v36  ;;  %1567 = vmatpush.msrb.mxu3 %v625_v38  ;;  %v157_v36 = vld [vmem:[#allocation3 + $0x1b0] sm:$0xff]  ;;  %v688_v38 = vld [vmem:[#allocation3 + $0x1248] sm:$0xff] }
 0x120   :  { %1553 = vmatpush.msra.mxu0 %v450_v40  ;;  %1622 = vmatpush.msra.mxu2 %v786_v43  ;;  %v437_v40 = vld [vmem:[#allocation3 + $0xa70] sm:$0xff]  ;;  %v3065_v43 = vpop.f32.mrf.mxu3 }
 0x121   :  { %1587 = vmatpush.msra.mxu1 %v758_v41  ;;  %1568 = vmatpush.msrb.mxu3 %v618_v45  ;;  %v150_v41 = vld [vmem:[#allocation3 + $0x178] sm:$0xff] }
 0x122   :  { %1554 = vmatpush.msra.mxu0 %v443_v46  ;;  %1623 = vmatpush.msra.mxu2 %v779_v49  ;;  %v262_v45 = vld [vmem:[#allocation3 + $0x4f8] sm:$0xff]  ;;  %v681_v46 = vld [vmem:[#allocation3 + $0x1210] sm:$0xff]  ;;  %v143_v49 = vld [vmem:[#allocation3 + $0x140] sm:$0xff] }
 0x123   :  { %1588 = vmatpush.msra.mxu1 %v751_v47  ;;  %1569 = vmatpush.msrb.mxu3 %v611_v52  ;;  %v430_v47 = vld [vmem:[#allocation3 + $0xa38] sm:$0xff]  ;;  %v3069_v52 = vpop.f32.mrf.mxu1 }
 0x124   :  { %1532 = vmatmul.f32.vlgmr.msrb.gmra.mxu2 %v2981_v6  ;;  %1631 = vmatpush.msrb.mxu0 %v213_v56  ;;  %v255_v56 = vld [vmem:[#allocation3 + $0x4c0] sm:$0xff] }
 0x125   :  { %1654 = vmatpush.msrb.mxu2 %v325_v59  ;;  %1486 = vmatmul.f32.vlgmr.msra.gmra.mxu3 %v2963_v44  ;;  %v674_v59 = vld [vmem:[#allocation3 + $0x11d8] sm:$0xff] }
 0x126   :  { %1589 = vmatpush.msra.mxu1 %v744_v58  ;;  %1570 = vmatpush.msrb.mxu3 %v604_v60  ;;  %v3071_v58 = vpop.f32.mrf.mxu2  ;;  %v3073_v60 = vpop.f32.mrf.mxu0 }
 0x127   :  { %1632 = vmatpush.msrb.mxu0 %v206_v61  ;;  %1655 = vmatpush.msrb.mxu2 %v318_v54  ;;  %v423_v61 = vld [vmem:[#allocation3 + $0xa00] sm:$0xff]  ;;  %v136_v54 = vld [vmem:[#allocation3 + $0x108] sm:$0xff] }
 0x128   :  { %1590 = vmatpush.msra.mxu1 %v737_v62  ;;  %1571 = vmatpush.msrb.mxu3 %v597_v0  ;;  %v248_v62 = vld [vmem:[#allocation3 + $0x488] sm:$0xff]  ;;  %v667_v0 = vld [vmem:[#allocation3 + $0x11a0] sm:$0xff] }
 0x129   :  { %1633 = vmatpush.msrb.mxu0 %v199_v1  ;;  %1656 = vmatpush.msrb.mxu2 %v311_v2  ;;  %v416_v1 = vld [vmem:[#allocation3 + $0x9c8] sm:$0xff]  ;;  %v129_v2 = vld [vmem:[#allocation3 + $0xd0] sm:$0xff] }
 0x12a   :  { %1591 = vmatpush.msra.mxu1 %v730_v5  ;;  %1572 = vmatpush.msrb.mxu3 %v590_v14  ;;  %v241_v5 = vld [vmem:[#allocation3 + $0x450] sm:$0xff] }
 0x12b   :  { %1634 = vmatpush.msrb.mxu0 %v192_v7  ;;  %1657 = vmatpush.msrb.mxu2 %v304_v8  ;;  %v549_v14 = vld [vmem:[#allocation3 + $0xdf0] sm:$0xff]  ;;  %v3078_v7 = vpop.f32.mrf.mxu3 }
 0x12c   :  { %1592 = vmatpush.msra.mxu1 %v723_v10  ;;  %1573 = vmatpush.msrb.mxu3 %v583_v11  ;;  %v409_v8 = vld [vmem:[#allocation3 + $0x990] sm:$0xff]  ;;  %v122_v10 = vld [vmem:[#allocation3 + $0x98] sm:$0xff] }
 0x12d   :  { %1635 = vmatpush.msrb.mxu0 %v185_v12  ;;  %1658 = vmatpush.msrb.mxu2 %v297_v9  ;;  %v234_v11 = vld [vmem:[#allocation3 + $0x418] sm:$0xff] }
 0x12e   :  { %1489 = vmatmul.f32.gmra.mxu3 %v2975_v63  ;;  %1509 = vmatmul.f32.vlgmr.msrb.gmra.mxu1 %v2969_v53  ;;  %v542_v12 = vld [vmem:[#allocation3 + $0xdb8] sm:$0xff] }
 0x12f   :  { %1593 = vmatpush.msra.mxu1 %v716_v18  ;;  %1574 = vmatpush.msrb.mxu3 %v576_v19  ;;  %v402_v9 = vld [vmem:[#allocation3 + $0x958] sm:$0xff]  ;;  %v115_v18 = vld [vmem:[#allocation3 + $0x60] sm:$0xff]  ;;  %v3082_v19 = vpop.f32.mrf.mxu1 }
 0x130   :  { %1636 = vmatpush.msrb.mxu0 %v178_v21  ;;  %1659 = vmatpush.msrb.mxu2 %v290_v22  ;;  %v3084_v21 = vpop.f32.mrf.mxu2  ;;  %v227_v22 = vld [vmem:[#allocation3 + $0x3e0] sm:$0xff] }
 0x131   :  { %1594 = vmatpush.msra.mxu1 %v709_v23  ;;  %1575 = vmatpush.msrb.mxu3 %v569_v24  ;;  %v535_v23 = vld [vmem:[#allocation3 + $0xd80] sm:$0xff]  ;;  %v3086_v24 = vpop.f32.mrf.mxu0 }
 0x132   :  { %1637 = vmatpush.msrb.mxu0 %v171_v26  ;;  %1660 = vmatpush.msrb.mxu2 %v283_v57  ;;  %v395_v26 = vld [vmem:[#allocation3 + $0x920] sm:$0xff]  ;;  %v108_v57 = vld [vmem:[#allocation3 + $0x28] sm:$0xff] }
 0x133   :  { %1535 = vmatmul.f32.gmra.mxu2 %v3005_v4  ;;  %1595 = vmatpush.msra.mxu1 %v702_v28  ;;  %v220_v28 = vld [vmem:[#allocation3 + $0x3a8] sm:$0xff] }
 0x134   :  { %1576 = vmatpush.msrb.mxu3 %v562_v31  ;;  %1638 = vmatpush.msrb.mxu0 %v164_v32  ;;  %v528_v31 = vld [vmem:[#allocation3 + $0xd48] sm:$0xff]  ;;  %v3088_v32 = vpop.f32.mrf.mxu3 }
 0x135   :  { %1661 = vmatpush.msrb.mxu2 %v276_v33  ;;  %1596 = vmatpush.msra.mxu1 %v695_v17  ;;  %v388_v33 = vld [vmem:[#allocation3 + $0x8e8] sm:$0xff]  ;;  %v661_v17 = vld [vmem:[#allocation3 + $0x1170] sm:$0xff] }
 0x136   :  { %1577 = vmatpush.msrb.mxu3 %v555_v35  ;;  %1639 = vmatpush.msrb.mxu0 %v157_v36  ;;  %v773_v35 = vld [vmem:[#allocation3 + $0x14f0] sm:$0xff] }
 0x137   :  { %1662 = vmatpush.msrb.mxu2 %v269_v39  ;;  %1512 = vmatmul.f32.gmra.mxu1 %v2993_v29  ;;  %v521_v36 = vld [vmem:[#allocation3 + $0xd10] sm:$0xff] }
 0x138   :  { %1578 = vmatmul.f32.vlgmr.msrb.gmra.mxu3 %v2999_v20  ;;  %1597 = vmatpush.msra.mxu1 %v688_v38  ;;  %v381_v39 = vld [vmem:[#allocation3 + $0x8b0] sm:$0xff]  ;;  %v654_v38 = vld [vmem:[#allocation3 + $0x1138] sm:$0xff] }
 0x139   :  { %1677 = vmatpush.msra.mxu3 %v437_v40  ;;  %1640 = vmatpush.msrb.mxu0 %v150_v41  ;;  %v766_v40 = vld [vmem:[#allocation3 + $0x14b8] sm:$0xff]  ;;  %v3093_v41 = vpop.f32.mrf.mxu1 }
 0x13a   :  { %1663 = vmatpush.msrb.mxu2 %v262_v45  ;;  %1598 = vmatpush.msra.mxu1 %v681_v46  ;;  %v514_v45 = vld [vmem:[#allocation3 + $0xcd8] sm:$0xff] }
 0x13b   :  { %1678 = vmatpush.msra.mxu3 %v430_v47  ;;  %1641 = vmatpush.msrb.mxu0 %v143_v49  ;;  %v374_v46 = vld [vmem:[#allocation3 + $0x878] sm:$0xff]  ;;  %v647_v47 = vld [vmem:[#allocation3 + $0x1100] sm:$0xff] }
 0x13c   :  { %1664 = vmatpush.msrb.mxu2 %v255_v56  ;;  %1555 = vmatmul.f32.vlgmr.msra.gmra.mxu0 %v2987_v15  ;;  %v759_v49 = vld [vmem:[#allocation3 + $0x1480] sm:$0xff]  ;;  %v3096_v56 = vpop.f32.mrf.mxu2 }
 0x13d   :  { %1599 = vmatpush.msra.mxu1 %v674_v59  ;;  %2559 = vmatmul.msk.f32.vlgmr.msra.gmra.mxu2 %vm819_vm0, %v3023_v34  ;;  %v507_v59 = vld [vmem:[#allocation3 + $0xca0] sm:$0xff] }
 0x13e   :  { %1679 = vmatpush.msra.mxu3 %v423_v61  ;;  %1642 = vmatpush.msrb.mxu0 %v136_v54  ;;  %v367_v61 = vld [vmem:[#allocation3 + $0x840] sm:$0xff]  ;;  %v640_v54 = vld [vmem:[#allocation3 + $0x10c8] sm:$0xff] }
 0x13f   :  { %1665 = vmatpush.msrb.mxu2 %v248_v62  ;;  %1600 = vmatpush.msra.mxu1 %v667_v0  ;;  %v752_v62 = vld [vmem:[#allocation3 + $0x1448] sm:$0xff]  ;;  %v3098_v0 = vpop.f32.mrf.mxu0 }
 0x140   :  { %1680 = vmatpush.msra.mxu3 %v416_v1  ;;  %1643 = vmatpush.msrb.mxu0 %v129_v2  ;;  %v500_v1 = vld [vmem:[#allocation3 + $0xc68] sm:$0xff] }
 0x141   :  { %1666 = vmatpush.msrb.mxu2 %v241_v5  ;;  %1700 = vmatpush.msrb.mxu1 %v549_v14  ;;  %v360_v2 = vld [vmem:[#allocation3 + $0x808] sm:$0xff]  ;;  %v633_v5 = vld [vmem:[#allocation3 + $0x1090] sm:$0xff] }
 0x142   :  { %1581 = vmatmul.f32.gmra.mxu3 %v3030_v51  ;;  %1601 = vmatmul.f32.vlgmr.msra.gmra.mxu1 %v3011_v37  ;;  %v745_v14 = vld [vmem:[#allocation3 + $0x1410] sm:$0xff] }
 0x143   :  { %1681 = vmatpush.msra.mxu3 %v409_v8  ;;  %1644 = vmatpush.msrb.mxu0 %v122_v10  ;;  %v3100_v8 = vpop.f32.mrf.mxu3  ;;  %v493_v10 = vld [vmem:[#allocation3 + $0xc30] sm:$0xff] }
 0x144   :  { %1667 = vmatpush.msrb.mxu2 %v234_v11  ;;  %1701 = vmatpush.msrb.mxu1 %v542_v12  ;;  %v353_v11 = vld [vmem:[#allocation3 + $0x7d0] sm:$0xff]  ;;  %v626_v12 = vld [vmem:[#allocation3 + $0x1058] sm:$0xff] }
 0x145   :  { %1682 = vmatpush.msra.mxu3 %v402_v9  ;;  %1645 = vmatpush.msrb.mxu0 %v115_v18  ;;  %v738_v9 = vld [vmem:[#allocation3 + $0x13d8] sm:$0xff]  ;;  %v3102_v18 = vpop.f32.mrf.mxu1 }
 0x146   :  { %1668 = vmatpush.msrb.mxu2 %v227_v22  ;;  %1702 = vmatpush.msrb.mxu1 %v535_v23  ;;  %v486_v22 = vld [vmem:[#allocation3 + $0xbf8] sm:$0xff] }
 0x147   :  { %1558 = vmatmul.f32.gmra.mxu0 %v3017_v42  ;;  %2560 = vmatmul.msk.f32.gmra.mxu2 %vm819_vm0, %v3042_v13  ;;  %v346_v23 = vld [vmem:[#allocation3 + $0x798] sm:$0xff] }
 0x148   :  { %1683 = vmatpush.msra.mxu3 %v395_v26  ;;  %1646 = vmatpush.msrb.mxu0 %v108_v57  ;;  %v619_v26 = vld [vmem:[#allocation3 + $0x1020] sm:$0xff] }
 0x149   :  { %1669 = vmatpush.msrb.mxu2 %v220_v28  ;;  %1703 = vmatpush.msrb.mxu1 %v528_v31  ;;  %v731_v57 = vld [vmem:[#allocation3 + $0x13a0] sm:$0xff] }
 0x14a   :  { %1684 = vmatpush.msra.mxu3 %v388_v33  ;;  %1723 = vmatpush.msra.mxu0 %v661_v17  ;;  %v479_v28 = vld [vmem:[#allocation3 + $0xbc0] sm:$0xff]  ;;  %v612_v33 = vld [vmem:[#allocation3 + $0xfe8] sm:$0xff] }
 0x14b   :  { %1746 = vmatpush.msra.mxu2 %v773_v35  ;;  %1704 = vmatpush.msrb.mxu1 %v521_v36  ;;  %v339_v31 = vld [vmem:[#allocation3 + $0x760] sm:$0xff]  ;;  %v724_v17 = vld [vmem:[#allocation3 + $0x1368] sm:$0xff]  ;;  %v3104_v35 = vpop.f32.mrf.mxu2  ;;  %v3106_v36 = vpop.f32.mrf.mxu0 }
 0x14c   :  { %1604 = vmatmul.f32.gmra.mxu1 %v3036_v48  ;;  %1685 = vmatpush.msra.mxu3 %v381_v39  ;;  %v472_v39 = vld [vmem:[#allocation3 + $0xb88] sm:$0xff] }
 0x14d   :  { %1724 = vmatpush.msra.mxu0 %v654_v38  ;;  %1747 = vmatpush.msra.mxu2 %v766_v40  ;;  %v332_v38 = vld [vmem:[#allocation3 + $0x728] sm:$0xff]  ;;  %v605_v40 = vld [vmem:[#allocation3 + $0xfb0] sm:$0xff] }
 0x14e   :  { %1705 = vmatpush.msrb.mxu1 %v514_v45  ;;  %1686 = vmatpush.msra.mxu3 %v374_v46  ;;  %v717_v45 = vld [vmem:[#allocation3 + $0x1330] sm:$0xff] }
 0x14f   :  { %1725 = vmatpush.msra.mxu0 %v647_v47  ;;  %1748 = vmatpush.msra.mxu2 %v759_v49  ;;  %v465_v46 = vld [vmem:[#allocation3 + $0xb50] sm:$0xff]  ;;  %v3109_v49 = vpop.f32.mrf.mxu3 }
 0x150   :  { %1706 = vmatpush.msrb.mxu1 %v507_v59  ;;  %1687 = vmatpush.msra.mxu3 %v367_v61  ;;  %v801_v47 = vld [vmem:[#allocation3 + $0x15d0] sm:$0xff]  ;;  %v3111_v59 = vpop.f32.mrf.mxu1  ;;  %v710_v61 = vld [vmem:[#allocation3 + $0x12f8] sm:$0xff] }
 0x151   :  { %1726 = vmatpush.msra.mxu0 %v640_v54  ;;  %1749 = vmatpush.msra.mxu2 %v752_v62  ;;  %v598_v54 = vld [vmem:[#allocation3 + $0xf78] sm:$0xff] }
 0x152   :  { %1707 = vmatpush.msrb.mxu1 %v500_v1  ;;  %1688 = vmatpush.msra.mxu3 %v360_v2  ;;  %v458_v62 = vld [vmem:[#allocation3 + $0xb18] sm:$0xff]  ;;  %v703_v2 = vld [vmem:[#allocation3 + $0x12c0] sm:$0xff] }
 0x153   :  { %1727 = vmatpush.msra.mxu0 %v633_v5  ;;  %1750 = vmatpush.msra.mxu2 %v745_v14  ;;  %v794_v1 = vld [vmem:[#allocation3 + $0x1598] sm:$0xff]  ;;  %v451_v5 = vld [vmem:[#allocation3 + $0xae0] sm:$0xff]  ;;  %v3115_v14 = vpop.f32.mrf.mxu0 }
 0x154   :  { %1708 = vmatpush.msrb.mxu1 %v493_v10  ;;  %1689 = vmatpush.msra.mxu3 %v353_v11  ;;  %v787_v10 = vld [vmem:[#allocation3 + $0x1560] sm:$0xff]  ;;  %v696_v11 = vld [vmem:[#allocation3 + $0x1288] sm:$0xff] }
 0x155   :  { %1728 = vmatpush.msra.mxu0 %v626_v12  ;;  %1751 = vmatpush.msra.mxu2 %v738_v9  ;;  %v3117_v12 = vpop.f32.mrf.mxu2  ;;  %v444_v9 = vld [vmem:[#allocation3 + $0xaa8] sm:$0xff] }
 0x156   :  { %1709 = vmatpush.msrb.mxu1 %v486_v22  ;;  %1690 = vmatpush.msra.mxu3 %v346_v23  ;;  %v780_v22 = vld [vmem:[#allocation3 + $0x1528] sm:$0xff]  ;;  %v689_v23 = vld [vmem:[#allocation3 + $0x1250] sm:$0xff] }
 0x157   :  { %1729 = vmatpush.msra.mxu0 %v619_v26  ;;  %1752 = vmatpush.msra.mxu2 %v731_v57  ;;  %v3119_v26 = vpop.f32.mrf.mxu3 }
 0x158   :  { %1710 = vmatpush.msrb.mxu1 %v479_v28  ;;  %1691 = vmatpush.msra.mxu3 %v339_v31  ;;  %v3121_v57 = vpop.f32.mrf.mxu1  ;;  %v214_v28 = vld [vmem:[#allocation3 + $0x378] sm:$0xff] }
 0x159   :  { %1730 = vmatpush.msra.mxu0 %v612_v33  ;;  %1753 = vmatpush.msra.mxu2 %v724_v17  ;;  %v326_v31 = vld [vmem:[#allocation3 + $0x6f8] sm:$0xff] }
 0x15a   :  { %1670 = vmatmul.f32.vlgmr.msrb.gmra.mxu2 %v2969_v53  ;;  %1711 = vmatpush.msrb.mxu1 %v472_v39  ;;  %v591_v53 = vld [vmem:[#allocation3 + $0xf40] sm:$0xff]  ;;  %v570_v33 = vld [vmem:[#allocation3 + $0xe98] sm:$0xff] }
 0x15b   :  { %1692 = vmatpush.msra.mxu3 %v332_v38  ;;  %1731 = vmatpush.msra.mxu0 %v605_v40  ;;  %v682_v17 = vld [vmem:[#allocation3 + $0x1218] sm:$0xff]  ;;  %v207_v39 = vld [vmem:[#allocation3 + $0x340] sm:$0xff] }
 0x15c   :  { %1754 = vmatpush.msra.mxu2 %v717_v45  ;;  %1693 = vmatmul.f32.vlgmr.msra.gmra.mxu3 %v2981_v6  ;;  %v584_v6 = vld [vmem:[#allocation3 + $0xf08] sm:$0xff]  ;;  %v319_v38 = vld [vmem:[#allocation3 + $0x6c0] sm:$0xff] }
 0x15d   :  { %1712 = vmatpush.msrb.mxu1 %v465_v46  ;;  %1781 = vmatpush.msrb.mxu3 %v801_v47  ;;  %v3124_v40 = vld [vmem:[#allocation5] sm:$0x7f]  ;;  %v200_v46 = vld [vmem:[#allocation3 + $0x308] sm:$0xff] }
 0x15e   :  { %1647 = vmatmul.f32.vlgmr.msrb.gmra.mxu0 %v2963_v44  ;;  %1755 = vmatpush.msra.mxu2 %v710_v61  ;;  %v577_v44 = vld [vmem:[#allocation3 + $0xed0] sm:$0xff]  ;;  %v563_v45 = vld [vmem:[#allocation3 + $0xe60] sm:$0xff]  ;;  %v312_v47 = vld [vmem:[#allocation3 + $0x688] sm:$0xff]  ;;  %v3128_v61 = vpop.f32.mrf.mxu2 }
 0x15f   :  { %1732 = vmatpush.msra.mxu0 %v598_v54  ;;  %1713 = vmatpush.msrb.mxu1 %v458_v62  ;;  %v3130_v54 = vpop.f32.mrf.mxu0  ;;  %v556_v62 = vld [vmem:[#allocation3 + $0xe28] sm:$0xff] }
 0x160   :  { %1782 = vmatpush.msrb.mxu3 %v794_v1  ;;  %1756 = vmatpush.msra.mxu2 %v703_v2  ;;  %v668_v1 = vld [vmem:[#allocation3 + $0x11a8] sm:$0xff]  ;;  %v805_v2 = vperm.slane %v3124_v40, 0 }
 0x161   :  { %1733 = vmatpush.msra.mxu0 %v591_v53  ;;  %1714 = vmatpush.msrb.mxu1 %v451_v5  ;;  %v3133_v53 = vpop.f32.mrf.mxu3  ;;  %v438_v5 = vld [vmem:[#allocation3 + $0xa78] sm:$0xff] }
 0x162   :  { %1783 = vmatpush.msrb.mxu3 %v787_v10  ;;  %1757 = vmatpush.msra.mxu2 %v696_v11  ;;  %v550_v10 = vld [vmem:[#allocation3 + $0xdf8] sm:$0xff]  ;;  %v3135_v11 = vpop.f32.mrf.mxu1 }
 0x163   :  { %1734 = vmatpush.msra.mxu0 %v584_v6  ;;  %1673 = vmatmul.f32.gmra.mxu2 %v2993_v29  ;;  %v675_v29 = vld [vmem:[#allocation3 + $0x11e0] sm:$0xff]  ;;  %v186_v6 = vld [vmem:[#allocation3 + $0x298] sm:$0xff] }
 0x164   :  { %1715 = vmatpush.msrb.mxu1 %v444_v9  ;;  %1784 = vmatpush.msrb.mxu3 %v780_v22  ;;  %v298_v9 = vld [vmem:[#allocation3 + $0x618] sm:$0xff]  ;;  %v844_v22 = vadd.f32 %v3046_v27, %v805_v2  ;;  %v536_v27 = vld [vmem:[#allocation3 + $0xd88] sm:$0xff] }
 0x165   :  { %1735 = vmatpush.msra.mxu0 %v577_v44  ;;  %1758 = vmatpush.msra.mxu2 %v689_v23  ;;  %v431_v44 = vld [vmem:[#allocation3 + $0xa40] sm:$0xff] }
 0x166   :  { %1792 = vmatpush.msra.mxu1 %v214_v28  ;;  %1815 = vmatpush.msra.mxu3 %v326_v31  ;;  %v543_v23 = vld [vmem:[#allocation3 + $0xdc0] sm:$0xff] }
 0x167   :  { %1696 = vmatmul.f32.gmra.mxu3 %v3005_v4  ;;  %1650 = vmatmul.f32.gmra.mxu0 %v2975_v63  ;;  %v193_v4 = vld [vmem:[#allocation3 + $0x2d0] sm:$0xff]  ;;  %v179_v28 = vld [vmem:[#allocation3 + $0x260] sm:$0xff] }
 0x168   :  { %1736 = vmatpush.msra.mxu0 %v570_v33  ;;  %1759 = vmatpush.msra.mxu2 %v682_v17  ;;  %v305_v63 = vld [vmem:[#allocation3 + $0x650] sm:$0xff]  ;;  %v291_v31 = vld [vmem:[#allocation3 + $0x5e0] sm:$0xff]  ;;  %v3140_v33 = vpop.f32.mrf.mxu2  ;;  %v424_v17 = vld [vmem:[#allocation3 + $0xa08] sm:$0xff] }
 0x169   :  { %1793 = vmatpush.msra.mxu1 %v207_v39  ;;  %1816 = vmatpush.msra.mxu3 %v319_v38  ;;  %v806_v39 = vperm.slane %v3124_v40, 1  ;;  %v284_v38 = vld [vmem:[#allocation3 + $0x5a8] sm:$0xff] }
 0x16a   :  { %1737 = vmatpush.msra.mxu0 %v563_v45  ;;  %1760 = vmatpush.msra.mxu2 %v675_v29  ;;  %v3147_v45 = vpop.f32.mrf.mxu0  ;;  %v417_v29 = vld [vmem:[#allocation3 + $0x9d0] sm:$0xff] }
 0x16b   :  { %1794 = vmatpush.msra.mxu1 %v200_v46  ;;  %1817 = vmatpush.msra.mxu3 %v312_v47  ;;  %v529_v46 = vld [vmem:[#allocation3 + $0xd50] sm:$0xff] }
 0x16c   :  { %1738 = vmatpush.msra.mxu0 %v556_v62  ;;  %1761 = vmatpush.msra.mxu2 %v668_v1  ;;  %v277_v47 = vld [vmem:[#allocation3 + $0x570] sm:$0xff]  ;;  %v847_v62 = vadd.f32 %v3048_v55, %v805_v2  ;;  %v410_v1 = vld [vmem:[#allocation3 + $0x998] sm:$0xff]  ;;  %v403_v55 = vld [vmem:[#allocation3 + $0x960] sm:$0xff] }
 0x16d   :  { %1795 = vmatpush.msra.mxu1 %v193_v4  ;;  %1818 = vmatpush.msra.mxu3 %v305_v63  ;;  %v1005_v4 = vadd.f32 %v3088_v32, %v806_v39  ;;  %v522_v63 = vld [vmem:[#allocation3 + $0xd18] sm:$0xff]  ;;  %v151_v32 = vld [vmem:[#allocation3 + $0x180] sm:$0xff] }
 0x16e   :  { %1762 = vmatmul.f32.vlgmr.msra.gmra.mxu2 %v3011_v37  ;;  %1838 = vmatpush.msrb.mxu0 %v438_v5  ;;  %v867_v37 = vadd.f32 %v3058_v25, %v844_v22  ;;  %v3150_v25 = vpop.f32.mrf.mxu3  ;;  %v158_v5 = vld [vmem:[#allocation3 + $0x1b8] sm:$0xff]  ;;  %v870_v2 = vadd.f32 %v3069_v52, %v847_v62  ;;  %v508_v52 = vld [vmem:[#allocation3 + $0xca8] sm:$0xff]  ;;  %v375_v62 = vld [vmem:[#allocation3 + $0x880] sm:$0xff] }
 0x16f   :  { %1861 = vmatpush.msrb.mxu2 %v550_v10  ;;  %1716 = vmatmul.f32.vlgmr.msrb.gmra.mxu1 %v2987_v15  ;;  %v172_v15 = vld [vmem:[#allocation3 + $0x228] sm:$0xff]  ;;  %v3154_v10 = vpop.f32.mrf.mxu1 }
 0x170   :  { %1796 = vmatpush.msra.mxu1 %v186_v6  ;;  %1819 = vmatpush.msra.mxu3 %v298_v9  ;;  %v270_v6 = vld [vmem:[#allocation3 + $0x538] sm:$0xff]  ;;  %v3158_v9 = vpop.f32.mrf.mxu2 }
 0x171   :  { %2561 = vmatmul.msk.f32.vlgmr.msrb.gmra.mxu3 %vm819_vm0, %v3023_v34  ;;  %1839 = vmatpush.msrb.mxu0 %v431_v44  ;;  %v165_v34 = vld [vmem:[#allocation3 + $0x1f0] sm:$0xff]  ;;  %v1028_v44 = vadd.f32 %v3096_v56, %v1005_v4 }
 0x172   :  { %1862 = vmatpush.msrb.mxu2 %v543_v23  ;;  %1739 = vmatmul.f32.vlgmr.msra.gmra.mxu0 %v2999_v20  ;;  %v890_v20 = vadd.f32 %v3052_v3, %v867_v37  ;;  %v515_v3 = vld [vmem:[#allocation3 + $0xce0] sm:$0xff]  ;;  %v501_v56 = vld [vmem:[#allocation3 + $0xc70] sm:$0xff] }
 0x173   :  { %1797 = vmatpush.msra.mxu1 %v179_v28  ;;  %1820 = vmatpush.msra.mxu3 %v291_v31  ;;  %v263_v23 = vld [vmem:[#allocation3 + $0x500] sm:$0xff]  ;;  %v144_v28 = vld [vmem:[#allocation3 + $0x148] sm:$0xff]  ;;  %v1051_v37 = vadd.f32 %v3073_v60, %v1028_v44 }
 0x174   :  { %1840 = vmatpush.msrb.mxu0 %v424_v17  ;;  %1863 = vmatpush.msrb.mxu2 %v536_v27  ;;  %v913_v22 = vadd.f32 %v3065_v43, %v890_v20  ;;  %v256_v31 = vld [vmem:[#allocation3 + $0x4c8] sm:$0xff]  ;;  %v893_v17 = vadd.f32 %v3060_v30, %v870_v2  ;;  %v807_v43 = vperm.slane %v3124_v40, 2  ;;  %v3167_v27 = vpop.f32.mrf.mxu0 }
 0x175   :  { %1798 = vmatpush.msra.mxu1 %v172_v15  ;;  %1821 = vmatpush.msra.mxu3 %v284_v38  ;;  %v1008_v15 = vadd.f32 %v3100_v8, %v806_v39  ;;  %v137_v38 = vld [vmem:[#allocation3 + $0x110] sm:$0xff]  ;;  %v116_v2 = vld [vmem:[#allocation3 + $0x68] sm:$0xff] }
 0x176   :  { %1841 = vmatpush.msrb.mxu0 %v417_v29  ;;  %1864 = vmatpush.msrb.mxu2 %v529_v46  ;;  %v249_v29 = vld [vmem:[#allocation3 + $0x490] sm:$0xff]  ;;  %v3173_v30 = vpop.f32.mrf.mxu3  ;;  %v916_v60 = vadd.f32 %v3078_v7, %v893_v17  ;;  %v1166_v8 = vadd.f32 %v3121_v57, %v807_v43  ;;  %v368_v7 = vld [vmem:[#allocation3 + $0x848] sm:$0xff]  ;;  %v808_v57 = vperm.slane %v3124_v40, 3 }
 0x177   :  { %1799 = vmatpush.msra.mxu1 %v165_v34  ;;  %1822 = vmatpush.msra.mxu3 %v277_v47  ;;  %v3175_v46 = vpop.f32.mrf.mxu1  ;;  %v382_v34 = vld [vmem:[#allocation3 + $0x8b8] sm:$0xff]  ;;  %v1031_v4 = vadd.f32 %v3104_v35, %v1008_v15 }
 0x178   :  { %1765 = vmatmul.f32.gmra.mxu2 %v3036_v48  ;;  %1842 = vmatpush.msrb.mxu0 %v410_v1  ;;  %v396_v48 = vld [vmem:[#allocation3 + $0x928] sm:$0xff]  ;;  %v130_v47 = vld [vmem:[#allocation3 + $0xd8] sm:$0xff]  ;;  %v1326_v39 = vpop.f32.mrf.mxu2  ;;  %v487_v1 = vld [vmem:[#allocation3 + $0xc00] sm:$0xff]  ;;  %v1189_v35 = vadd.f32 %v3133_v53, %v1166_v8 }
 0x179   :  { %1865 = vmatpush.msrb.mxu2 %v522_v63  ;;  %1800 = vmatpush.msra.mxu1 %v158_v5  ;;  %v1074_v63 = vadd.f32 %v3102_v18, %v1051_v37  ;;  %v123_v5 = vld [vmem:[#allocation3 + $0xa0] sm:$0xff]  ;;  %v361_v18 = vld [vmem:[#allocation3 + $0x810] sm:$0xff]  ;;  %v466_v53 = vld [vmem:[#allocation3 + $0xb58] sm:$0xff]  ;;  %v1327_v17 = vadd.f32 %v1326_v39, %v808_v57 }
 0x17a   :  { %1823 = vmatpush.msra.mxu3 %v270_v6  ;;  %1719 = vmatmul.f32.gmra.mxu1 %v3017_v42  ;;  %v389_v42 = vld [vmem:[#allocation3 + $0x8f0] sm:$0xff]  ;;  %v235_v6 = vld [vmem:[#allocation3 + $0x420] sm:$0xff]  ;;  %v760_v8 = vld [vmem:[#allocation3 + $0x1488] sm:$0xff] }
 0x17b   :  { %2562 = vmatmul.msk.f32.gmra.mxu3 %vm819_vm0, %v3042_v13  ;;  %1843 = vmatpush.msrb.mxu0 %v403_v55  ;;  %v936_v13 = vadd.f32 %v3054_v16, %v913_v22  ;;  %v242_v16 = vld [vmem:[#allocation3 + $0x458] sm:$0xff]  ;;  %v480_v55 = vld [vmem:[#allocation3 + $0xbc8] sm:$0xff]  ;;  %v473_v22 = vld [vmem:[#allocation3 + $0xb90] sm:$0xff] }
 0x17c   :  { %1866 = vmatpush.msrb.mxu2 %v515_v3  ;;  %1801 = vmatpush.msra.mxu1 %v151_v32  ;;  %v228_v3 = vld [vmem:[#allocation3 + $0x3e8] sm:$0xff]  ;;  %v1349_v32 = vpop.f32.mrf.mxu0  ;;  %v459_v37 = vld [vmem:[#allocation3 + $0xb20] sm:$0xff] }
 0x17d   :  { %1824 = vmatpush.msra.mxu3 %v263_v23  ;;  %1742 = vmatmul.f32.gmra.mxu0 %v3030_v51  ;;  %v494_v51 = vld [vmem:[#allocation3 + $0xc38] sm:$0xff]  ;;  %v959_v20 = vadd.f32 %v3082_v19, %v936_v13  ;;  %v939_v19 = vadd.f32 %v3062_v50, %v916_v60  ;;  %v1054_v23 = vadd.f32 %v3086_v24, %v1031_v4  ;;  %v347_v13 = vld [vmem:[#allocation3 + $0x7a0] sm:$0xff]  ;;  %v648_v60 = vld [vmem:[#allocation3 + $0x1108] sm:$0xff] }
 0x17e   :  { %1844 = vmatpush.msrb.mxu0 %v396_v48  ;;  %1867 = vmatpush.msrb.mxu2 %v508_v52  ;;  %v1097_v48 = vadd.f32 %v3109_v49, %v1074_v63  ;;  %v109_v52 = vld [vmem:[#allocation3 + $0x30] sm:$0xff]  ;;  %v354_v50 = vld [vmem:[#allocation3 + $0x7d8] sm:$0xff]  ;;  %v1212_v49 = vadd.f32 %v3115_v14, %v1189_v35  ;;  %v452_v14 = vld [vmem:[#allocation3 + $0xae8] sm:$0xff] }
 0x17f   :  { %1802 = vmatpush.msra.mxu1 %v144_v28  ;;  %1825 = vmatpush.msra.mxu3 %v256_v31  ;;  %v982_v44 = vadd.f32 %v3071_v58, %v959_v20  ;;  %v221_v28 = vld [vmem:[#allocation3 + $0x3b0] sm:$0xff]  ;;  %v1372_v31 = vpop.f32.mrf.mxu1  ;;  %v774_v58 = vld [vmem:[#allocation3 + $0x14f8] sm:$0xff]  ;;  %v962_v24 = vadd.f32 %v3093_v41, %v939_v19  ;;  %v340_v41 = vld [vmem:[#allocation3 + $0x768] sm:$0xff] }
 0x180   :  { %1845 = vmatpush.msrb.mxu0 %v389_v42  ;;  %1868 = vmatpush.msrb.mxu2 %v501_v56  ;;  %v662_v42 = vld [vmem:[#allocation3 + $0x1178] sm:$0xff]  ;;  %v3194_v56 = vpop.f32.mrf.mxu3  ;;  %v641_v4 = vld [vmem:[#allocation3 + $0x10d0] sm:$0xff] }
 0x181   :  { %1803 = vmatpush.msra.mxu1 %v137_v38  ;;  %1826 = vmatpush.msra.mxu3 %v249_v29  ;;  %v2565_v15 = vmul.f32 -1.442695, %v982_v44  ;;  %v1120_v38 = vadd.f32 %v3117_v12, %v1097_v48  ;;  %v1077_v29 = vadd.f32 %v3111_v59, %v1054_v23  ;;  %v985_v39 = vadd.f32 %v3084_v21, %v962_v24  ;;  %v333_v59 = vld [vmem:[#allocation3 + $0x730] sm:$0xff]  ;;  %v788_v23 = vld [vmem:[#allocation3 + $0x1568] sm:$0xff] }
 0x182   :  { %1846 = vmatpush.msrb.mxu0 %v382_v34  ;;  %1869 = vmatpush.msrb.mxu2 %v494_v51  ;;  %v655_v34 = vld [vmem:[#allocation3 + $0x1140] sm:$0xff]  ;;  %v1235_v12 = vadd.f32 %v3140_v33, %v1212_v49  ;;  %v753_v63 = vld [vmem:[#allocation3 + $0x1450] sm:$0xff]  ;;  %v802_v33 = vld [vmem:[#allocation3 + $0x15d8] sm:$0xff] }
 0x183   :  { %1804 = vmatpush.msra.mxu1 %v130_v47  ;;  %1827 = vmatpush.msra.mxu3 %v242_v16  ;;  %v767_v51 = vld [vmem:[#allocation3 + $0x14c0] sm:$0xff]  ;;  %v1329_v47 = vpop.f32.mrf.mxu2  ;;  %v1350_v16 = vadd.f32 %v1349_v32, %v1327_v17  ;;  %2592 = vpow2.f32 %v2565_v15  ;;  %v1100_v20 = vadd.f32 %v3119_v26, %v1077_v29  ;;  %v746_v26 = vld [vmem:[#allocation3 + $0x1418] sm:$0xff]  ;;  %v2232_v48 = vld [vmem:[#allocation7 + $0x68] sm:$0xff] }
 0x184   :  { %1847 = vmatpush.msrb.mxu0 %v375_v62  ;;  %1870 = vmatpush.msrb.mxu2 %v487_v1  ;;  %v445_v62 = vld [vmem:[#allocation3 + $0xab0] sm:$0xff]  ;;  %v1143_v1 = vadd.f32 %v3098_v0, %v1120_v38  ;;  %v1352_v21 = vpop.f32.mrf.mxu0  ;;  %v634_v0 = vld [vmem:[#allocation3 + $0x1098] sm:$0xff]  ;;  %v2231_v17 = vld [vmem:[#allocation7 + $0x60] sm:$0xff] }
 0x185   :  { %1805 = vmatpush.msra.mxu1 %v123_v5  ;;  %1828 = vmatpush.msra.mxu3 %v235_v6  ;;  %v1169_v5 = vadd.f32 %v3135_v11, %v807_v43  ;;  %v2234_v6 = vld [vmem:[#allocation7 + $0x78] sm:$0xff]  ;;  %v2233_v43 = vld [vmem:[#allocation7 + $0x70] sm:$0xff]  ;;  %v2662_v38 = vld [vmem:[%s3501_s0 + $0x10] sm:$0xff] }
 0x186   :  { %1848 = vmatpush.msrb.mxu0 %v368_v7  ;;  %1871 = vmatpush.msrb.mxu2 %v480_v55  ;;  %v1373_v7 = vadd.f32 %v1372_v31, %v1350_v16  ;;  %v1330_v55 = vadd.f32 %v1329_v47, %v808_v57  ;;  %v795_v11 = vld [vmem:[#allocation3 + $0x15a0] sm:$0xff]  ;;  %v2566_v32 = vmul.f32 -1.442695, %v1143_v1  ;;  %v620_v31 = vld [vmem:[#allocation3 + $0x1028] sm:$0xff] }
 0x187   :  { %1806 = vmatpush.msra.mxu1 %v116_v2  ;;  %1829 = vmatpush.msra.mxu3 %v228_v3  ;;  %v2572_v2 = vmul.f32 -1.442695, %v985_v39  ;;  %v1258_v3 = vadd.f32 %v3154_v10, %v1235_v12  ;;  %v1375_v19 = vpop.f32.mrf.mxu1  ;;  %v739_v57 = vld [vmem:[#allocation3 + $0x13e0] sm:$0xff]  ;;  %v1192_v44 = vadd.f32 %v3150_v25, %v1169_v5  ;;  %v2229_v12 = vld [vmem:[#allocation7 + $0x50] sm:$0xff] }
 0x188   :  { %1849 = vmatpush.msrb.mxu0 %v361_v18  ;;  %1872 = vmatpush.msrb.mxu2 %v473_v22  ;;  %v1395_v35 = vpop.f32.mrf.mxu3  ;;  %v1123_v18 = vadd.f32 %v3128_v61, %v1100_v20  ;;  %v627_v22 = vld [vmem:[#allocation3 + $0x1060] sm:$0xff] }
 0x189   :  { %1807 = vmatpush.msra.mxu1 %v109_v52  ;;  %1830 = vmatpush.msra.mxu3 %v221_v28  ;;  %v2593_v10 = vpop.eup %2592  ;;  %v1353_v52 = vadd.f32 %v1352_v21, %v1330_v55  ;;  %v1396_v28 = vadd.f32 %v1395_v35, %v1373_v7  ;;  %2594 = vpow2.f32 %v2572_v2  ;;  %v1281_v61 = vadd.f32 %v3173_v30, %v1258_v3  ;;  %v2664_v39 = vld [vmem:[%s3501_s0 + $0x8] sm:$0xff]  ;;  %v585_v2 = vld [vmem:[#allocation3 + $0xf10] sm:$0xff] }
 0x18a   :  { %1850 = vmatpush.msrb.mxu0 %v354_v50  ;;  %1873 = vmatpush.msrb.mxu2 %v466_v53  ;;  %v732_v50 = vld [vmem:[#allocation3 + $0x13a8] sm:$0xff]  ;;  %2596 = vpow2.f32 %v2566_v32  ;;  %v1146_v25 = vadd.f32 %v3106_v36, %v1123_v18  ;;  %v3212_v24 = vadd.f32 1.0, %v2593_v10  ;;  %v1215_v49 = vadd.f32 %v3130_v54, %v1192_v44  ;;  %v2665_v35 = vld [vmem:[%s3501_s0 + $0x18] sm:$0xff]  ;;  %v2246_v18 = vld [vmem:[#allocation7 + $0xd8] sm:$0xff] }
 0x18b   :  { %1884 = vmatpush.msrb.mxu1 %v662_v42  ;;  %1907 = vmatpush.msrb.mxu3 %v774_v58  ;;  %v1418_v53 = vpop.f32.mrf.mxu2  ;;  %v781_v42 = vld [vmem:[#allocation3 + $0x1530] sm:$0xff]  ;;  %v1376_v30 = vadd.f32 %v1375_v19, %v1353_v52  ;;  %v1304_v36 = vadd.f32 %v3147_v45, %v1281_v61  ;;  %v2663_v45 = vld [vmem:[%s3501_s0] sm:$0xff]  ;;  %v592_v21 = vld [vmem:[#allocation3 + $0xf48] sm:$0xff] }
 0x18c   :  { %1851 = vmatpush.msrb.mxu0 %v347_v13  ;;  %1874 = vmatpush.msrb.mxu2 %v459_v37  ;;  %v613_v58 = vld [vmem:[#allocation3 + $0xff0] sm:$0xff]  ;;  %v2250_v37 = vld [vmem:[#allocation7 + $0xf8] sm:$0xff]  ;;  %v1419_v15 = vadd.f32 %v1418_v53, %v1396_v28  ;;  %v1441_v29 = vpop.f32.mrf.mxu0  ;;  %v2573_v47 = vmul.f32 -1.442695, %v1146_v25  ;;  %2598 = vrcp.f32 %v3212_v24  ;;  %v704_v7 = vld [vmem:[#allocation3 + $0x12c8] sm:$0xff]  ;;  %vm2014_vm1 = vweird.f32 %v3212_v24 }
 0x18d   :  { %1885 = vmatpush.msrb.mxu1 %v655_v34  ;;  %1908 = vmatpush.msrb.mxu3 %v767_v51  ;;  %v725_v13 = vld [vmem:[#allocation3 + $0x1370] sm:$0xff]  ;;  %v2230_v34 = vld [vmem:[#allocation7 + $0x58] sm:$0xff]  ;;  %v606_v51 = vld [vmem:[#allocation3 + $0xfb8] sm:$0xff] }
 0x18e   :  { %1852 = vmatpush.msrb.mxu0 %v340_v41  ;;  %1875 = vmatpush.msrb.mxu2 %v452_v14  ;;  %v718_v41 = vld [vmem:[#allocation3 + $0x1338] sm:$0xff]  ;;  %v1442_v1 = vadd.f32 %v1441_v29, %v1419_v15  ;;  %2600 = vpow2.f32 %v2573_v47  ;;  %v571_v25 = vld [vmem:[#allocation3 + $0xea0] sm:$0xff]  ;;  %v676_v29 = vld [vmem:[#allocation3 + $0x11e8] sm:$0xff] }
 0x18f   :  { %1886 = vmatpush.msrb.mxu1 %v648_v60  ;;  %1909 = vmatpush.msrb.mxu3 %v760_v8  ;;  %v2249_v14 = vld [vmem:[#allocation7 + $0xf0] sm:$0xff]  ;;  %v2595_v16 = vpop.eup %2594  ;;  %v1238_v60 = vadd.f32 %v3158_v9, %v1215_v49  ;;  %v1464_v8 = vpop.f32.mrf.mxu1  ;;  %v2248_v9 = vld [vmem:[#allocation7 + $0xe8] sm:$0xff]  ;;  %v2243_v47 = vld [vmem:[#allocation7 + $0xc0] sm:$0xff] }
 0x190   :  { %1853 = vmatpush.msrb.mxu0 %v333_v59  ;;  %1876 = vmatpush.msrb.mxu2 %v445_v62  ;;  %v1398_v54 = vpop.f32.mrf.mxu3  ;;  %v599_v59 = vld [vmem:[#allocation3 + $0xf80] sm:$0xff]  ;;  %v2597_v62 = vpop.eup %2596  ;;  %v1465_v3 = vadd.f32 %v1464_v8, %v1442_v1 }
 0x191   :  { %1887 = vmatpush.msrb.mxu1 %v641_v4  ;;  %1910 = vmatpush.msrb.mxu3 %v753_v63  ;;  %v1399_v20 = vadd.f32 %v1398_v54, %v1376_v30  ;;  %v711_v4 = vld [vmem:[#allocation3 + $0x1300] sm:$0xff]  ;;  %v2567_v63 = vmul.f32 -1.442695, %v1304_v36  ;;  %v3229_v55 = vadd.f32 1.0, %v2597_v62  ;;  %v564_v30 = vld [vmem:[#allocation3 + $0xe68] sm:$0xff]  ;;  %v2224_v36 = vld [vmem:[#allocation7 + $0x28] sm:$0xff] }
 0x192   :  { %1942 = vmatpush.msra.mxu0 %v802_v33  ;;  %2325 = vmatpush.msra.mxu2 %v2234_v6  ;;  %v3227_v33 = vadd.f32 1.0, %v2595_v16  ;;  %v2228_v6 = vld [vmem:[#allocation7 + $0x48] sm:$0xff]  ;;  %v2568_v52 = vmul.f32 -1.442695, %v1465_v3  ;;  %v2668_v53 = vld [vmem:[%s3501_s0 + $0x40] sm:$0xff]  ;;  %v2223_v16 = vld [vmem:[#allocation7 + $0x20] sm:$0xff] }
 0x193   :  { %1888 = vmatpush.msrb.mxu1 %v634_v0  ;;  %1911 = vmatpush.msrb.mxu3 %v746_v26  ;;  %v1421_v5 = vpop.f32.mrf.mxu2  ;;  %v1261_v0 = vadd.f32 %v3175_v46, %v1238_v60  ;;  %v2247_v26 = vld [vmem:[#allocation7 + $0xe0] sm:$0xff]  ;;  %2602 = vpow2.f32 %v2567_v63  ;;  %v697_v46 = vld [vmem:[#allocation3 + $0x1290] sm:$0xff]  ;;  %v809_v60 = vperm.slane %v3124_v40, 4  ;;  %v2222_v63 = vld [vmem:[#allocation7 + $0x18] sm:$0xff]  ;;  %vm2029_vm9 = vweird.f32 %v3229_v55 }
 0x194   :  { %1943 = vmatpush.msra.mxu0 %v795_v11  ;;  %2326 = vmatpush.msra.mxu2 %v2233_v43  ;;  %v1422_v19 = vadd.f32 %v1421_v5, %v1399_v20  ;;  %v2227_v11 = vld [vmem:[#allocation7 + $0x40] sm:$0xff]  ;;  %v3235_v43 = vpop.eup %2598  ;;  %v1444_v32 = vpop.f32.mrf.mxu0  ;;  %2604 = vrcp.f32 %v3227_v33  ;;  %v2266_v5 = vld [vmem:[#allocation7 + $0x178] sm:$0xff]  ;;  %v2221_v3 = vld [vmem:[#allocation7 + $0x10] sm:$0xff]  ;;  %vm2119_vm4 = vweird.f32 %v3227_v33 }
 0x195   :  { %1889 = vmatpush.msrb.mxu1 %v627_v22  ;;  %1912 = vmatpush.msrb.mxu3 %v739_v57  ;;  %2606 = vrcp.f32 %v3229_v55  ;;  %v1284_v22 = vadd.f32 %v3194_v56, %v1261_v0  ;;  %v2666_v57 = vld [vmem:[%s3501_s0 + $0x48] sm:$0xff]  ;;  %v2601_v10 = vpop.eup %2600  ;;  %v2010_v61 = vmul.f32 %v3235_v43, %v3212_v24  ;;  %v2667_v56 = vld [vmem:[%s3501_s0 + $0x38] sm:$0xff]  ;;  %vm2015_vm2 = vweird.f32 %v3235_v43 }
 0x196   :  { %1944 = vmatpush.msra.mxu0 %v788_v23  ;;  %2327 = vmatpush.msra.mxu2 %v2232_v48  ;;  %v2226_v23 = vld [vmem:[#allocation7 + $0x38] sm:$0xff]  ;;  %v578_v48 = vld [vmem:[#allocation3 + $0xed8] sm:$0xff]  ;;  %v1445_v28 = vadd.f32 %v1444_v32, %v1422_v19  ;;  %2608 = vpow2.f32 %v2568_v52  ;;  %v2280_v52 = vld [vmem:[#allocation7 + $0x1e8] sm:$0xff] }
 0x197   :  { %1890 = vmatpush.msrb.mxu1 %v620_v31  ;;  %1913 = vmatpush.msrb.mxu3 %v732_v50  ;;  %v1467_v44 = vpop.f32.mrf.mxu1  ;;  %v690_v31 = vld [vmem:[#allocation3 + $0x1258] sm:$0xff]  ;;  %vm3298_vm3 = vmor %vm2014_vm1, %vm2015_vm2  ;;  %v2270_v40 = vld [vmem:[#allocation7 + $0x198] sm:$0xff] }
 0x198   :  { %1854 = vmatmul.f32.vlgmr.msrb.gmra.mxu0 %v2662_v38  ;;  %2328 = vmatpush.msra.mxu2 %v2231_v17  ;;  %v2245_v50 = vld [vmem:[#allocation7 + $0xd0] sm:$0xff]  ;;  %v1468_v38 = vadd.f32 %v1467_v44, %v1445_v28  ;;  %v2220_v44 = vld [vmem:[#allocation7 + $0x8] sm:$0xff]  ;;  %v2239_v28 = vld [vmem:[#allocation7 + $0xa0] sm:$0xff] }
 0x199   :  { %1945 = vmatpush.msra.mxu0 %v781_v42  ;;  %1891 = vmatpush.msrb.mxu1 %v613_v58  ;;  %v2225_v17 = vld [vmem:[#allocation7 + $0x30] sm:$0xff]  ;;  %v683_v42 = vld [vmem:[#allocation3 + $0x1220] sm:$0xff]  ;;  %v2244_v58 = vld [vmem:[#allocation7 + $0xc8] sm:$0xff]  ;;  %v2603_v49 = vpop.eup %2602 }
 0x19a   :  { %1914 = vmatpush.msrb.mxu3 %v725_v13  ;;  %1808 = vmatmul.f32.vlgmr.msra.gmra.mxu1 %v2663_v45  ;;  %v3251_v13 = vadd.f32 1.0, %v2601_v10  ;;  %v3254_v15 = vpop.eup %2604  ;;  %v669_v45 = vld [vmem:[#allocation3 + $0x11b0] sm:$0xff]  ;;  %v2575_v1 = vmul.f32 -1.442695, %v1468_v38  ;;  %v2265_v19 = vld [vmem:[#allocation7 + $0x170] sm:$0xff]  ;;  %v2238_v38 = vld [vmem:[#allocation7 + $0x98] sm:$0xff] }
 0x19b   :  { %2348 = vmatpush.msrb.mxu0 %v2250_v37  ;;  %1831 = vmatmul.f32.vlgmr.msra.gmra.mxu3 %v2664_v39  ;;  %v1307_v37 = vadd.f32 %v3167_v27, %v1284_v22  ;;  %v3256_v54 = vpop.eup %2606  ;;  %v3258_v27 = vadd.f32 1.0, %v2603_v49  ;;  %v2242_v39 = vld [vmem:[#allocation7 + $0xb8] sm:$0xff]  ;;  %v2281_v32 = vld [vmem:[#allocation7 + $0x1f0] sm:$0xff]  ;;  %vm2120_vm5 = vweird.f32 %v3254_v15 }
 0x19c   :  { %2329 = vmatpush.msra.mxu2 %v2230_v34  ;;  %1892 = vmatpush.msrb.mxu1 %v606_v51  ;;  %v2011_v34 = vsub.f32 1.0, %v2010_v61  ;;  %2610 = vrcp.f32 %v3251_v13  ;;  %v2025_v62 = vmul.f32 %v3256_v54, %v3229_v55  ;;  %v2219_v61 = vld [vmem:[#allocation7] sm:$0xff]  ;;  %vm2030_vm7 = vweird.f32 %v3256_v54  ;;  %vm3338_vm8 = vmor %vm2119_vm4, %vm2120_vm5 }
 0x19d   :  { %1915 = vmatpush.msrb.mxu3 %v718_v41  ;;  %2349 = vmatpush.msrb.mxu0 %v2249_v14  ;;  %v557_v41 = vld [vmem:[#allocation3 + $0xe30] sm:$0xff]  ;;  %v2574_v8 = vmul.f32 -1.442695, %v1307_v37  ;;  %2612 = vrcp.f32 %v3258_v27  ;;  %vm3364_vm10 = vmor %vm2029_vm9, %vm2030_vm7  ;;  %vm2134_vm13 = vweird.f32 %v3251_v13 }
 0x19e   :  { %2330 = vmatpush.msra.mxu2 %v2229_v12  ;;  %1893 = vmatpush.msrb.mxu1 %v599_v59  ;;  %v2669_v14 = vld [vmem:[%s3501_s0 + $0x50] sm:$0xff]  ;;  %v2115_v12 = vmul.f32 %v3254_v15, %v3227_v33  ;;  %v2012_v20 = vmul.f32 %v3235_v43, %v2011_v34 }
 0x19f   :  { %1916 = vmatpush.msrb.mxu3 %v711_v4  ;;  %2350 = vmatpush.msrb.mxu0 %v2248_v9  ;;  %v2670_v9 = vld [vmem:[%s3501_s0 + $0x30] sm:$0xff]  ;;  %2614 = vpow2.f32 %v2574_v8  ;;  %v2123_v8 = vand.u32 2147483647, %v3227_v33 }
 0x1a0   :  { %1877 = vmatmul.f32.vlgmr.msrb.gmra.mxu2 %v2665_v35  ;;  %1894 = vmatpush.msrb.mxu1 %v592_v21  ;;  %v2609_v21 = vpop.eup %2608  ;;  %v2116_v35 = vsub.f32 1.0, %v2115_v12  ;;  %2616 = vpow2.f32 %v2575_v1  ;;  %v2237_v12 = vld [vmem:[#allocation7 + $0x90] sm:$0xff] }
 0x1a1   :  { %2331 = vmatpush.msra.mxu2 %v2228_v6  ;;  %1917 = vmatpush.msrb.mxu3 %v704_v7  ;;  %v2282_v6 = vld [vmem:[#allocation7 + $0x1f8] sm:$0xff]  ;;  %v2241_v7 = vld [vmem:[#allocation7 + $0xb0] sm:$0xff]  ;;  %vm3372_vm11 = vcmp.eq.f32.partialorder %v2123_v8, 8.507059e+37 }
 0x1a2   :  { %2351 = vmatpush.msrb.mxu0 %v2247_v26  ;;  %1895 = vmatpush.msrb.mxu1 %v585_v2  ;;  %v2671_v26 = vld [vmem:[%s3501_s0 + $0x20] sm:$0xff]  ;;  %v2672_v2 = vld [vmem:[%s3501_s0 + $0x28] sm:$0xff]  ;;  %v3288_v22 = vpop.eup %2610 }
 0x1a3   :  { %1857 = vmatmul.f32.gmra.mxu0 %v2666_v57  ;;  %2332 = vmatpush.msra.mxu2 %v2227_v11  ;;  %v2026_v11 = vsub.f32 1.0, %v2025_v62  ;;  %v3290_v57 = vadd.f32 1.0, %v2609_v21  ;;  %v2277_v21 = vld [vmem:[#allocation7 + $0x1d0] sm:$0xff]  ;;  %vm2135_vm14 = vweird.f32 %v3288_v22 }
 0x1a4   :  { %1918 = vmatpush.msrb.mxu3 %v697_v46  ;;  %2352 = vmatpush.msrb.mxu0 %v2246_v18  ;;  %v2240_v46 = vld [vmem:[#allocation7 + $0xa8] sm:$0xff]  ;;  %v2013_v18 = vadd.f32 %v3235_v43, %v2012_v20  ;;  %v2298_v20 = vld [vmem:[#allocation7 + $0x278] sm:$0xff]  ;;  %vm3397_vm15 = vmor %vm2134_vm13, %vm2135_vm14 }
 0x1a5   :  { %1811 = vmatmul.f32.gmra.mxu1 %v2667_v56  ;;  %1834 = vmatmul.f32.gmra.mxu3 %v2668_v53  ;;  %v2117_v53 = vmul.f32 %v3254_v15, %v2116_v35  ;;  %v2027_v49 = vmul.f32 %v3256_v54, %v2026_v11  ;;  %2618 = vrcp.f32 %v3290_v57  ;;  %v2260_v11 = vld [vmem:[#allocation7 + $0x148] sm:$0xff]  ;;  %v2273_v8 = vld [vmem:[#allocation7 + $0x1b0] sm:$0xff]  ;;  %vm2059_vm7 = vweird.f32 %v3290_v57 }
 0x1a6   :  { %2333 = vmatpush.msra.mxu2 %v2226_v23  ;;  %1896 = vmatpush.msrb.mxu1 %v578_v48  ;;  %v2264_v23 = vld [vmem:[#allocation7 + $0x168] sm:$0xff]  ;;  %v2020_v48 = vand.u32 2147483648, %v3212_v24  ;;  %v2293_v62 = vld [vmem:[#allocation7 + $0x250] sm:$0xff] }
 0x1a7   :  { %1919 = vmatpush.msrb.mxu3 %v690_v31  ;;  %2353 = vmatpush.msrb.mxu0 %v2245_v50  ;;  %v3270_v4 = vpop.f32.mrf.mxu2  ;;  %v2018_v31 = vand.u32 2147483647, %v3212_v24  ;;  %v3311_v24 = vmul.f32 %v3288_v22, %v3251_v13 }
 0x1a8   :  { %2334 = vmatpush.msra.mxu2 %v2225_v17  ;;  %1897 = vmatpush.msrb.mxu1 %v571_v25  ;;  %v1487_v51 = vpop.f32.mrf.mxu3  ;;  %v3303_v17 = vpop.eup %2612  ;;  %v2263_v25 = vld [vmem:[#allocation7 + $0x160] sm:$0xff] }
 0x1a9   :  { %1920 = vmatpush.msrb.mxu3 %v683_v42  ;;  %2354 = vmatpush.msrb.mxu0 %v2244_v58  ;;  %v1488_v0 = vadd.f32 %v1487_v51, %v809_v60  ;;  %v2279_v42 = vld [vmem:[#allocation7 + $0x1e0] sm:$0xff]  ;;  %v2017_v58 = vsel %vm3298_vm3, %v3235_v43, %v2013_v18  ;;  %v2615_v37 = vpop.eup %2614  ;;  %vm2019_vm6 = vcmp.eq.f32.partialorder %v2018_v31, 8.507059e+37  ;;  %v2131_v1 = vsub.f32 1.0, %v3311_v24  ;;  %v2274_v24 = vld [vmem:[#allocation7 + $0x1b8] sm:$0xff] }
 0x1aa   :  { %1880 = vmatmul.f32.gmra.mxu2 %v2669_v14  ;;  %1898 = vmatpush.msrb.mxu1 %v564_v30  ;;  %v2021_v30 = vor.u32 1.1754944e-38, %v2020_v48  ;;  %v2617_v43 = vpop.eup %2616  ;;  %v2278_v14 = vld [vmem:[#allocation7 + $0x1d8] sm:$0xff]  ;;  %v2259_v31 = vld [vmem:[#allocation7 + $0x140] sm:$0xff]  ;;  %vm2045_vm2 = vweird.f32 %v3303_v17  ;;  %vm2044_vm3 = vweird.f32 %v3258_v27 }
 0x1ab   :  { %2335 = vmatpush.msra.mxu2 %v2224_v36  ;;  %1921 = vmatpush.msrb.mxu3 %v676_v29  ;;  %v1510_v59 = vpop.f32.mrf.mxu1  ;;  %v2673_v29 = vld [vmem:[%s3501_s0 + $0x68] sm:$0xff]  ;;  %v3360_v35 = vpop.eup %2618  ;;  %v2132_v48 = vmul.f32 %v3288_v22, %v2131_v1  ;;  %v2272_v1 = vld [vmem:[#allocation7 + $0x1a8] sm:$0xff]  ;;  %vm3427_vm4 = vmor %vm2044_vm3, %vm2045_vm2 }
 0x1ac   :  { %2355 = vmatpush.msrb.mxu0 %v2243_v47  ;;  %1899 = vmatpush.msrb.mxu1 %v557_v41  ;;  %v1511_v50 = vadd.f32 %v1510_v59, %v1488_v0  ;;  %v2022_v47 = vsel %vm2019_vm6, %v2021_v30, %v2017_v58  ;;  %v2262_v41 = vld [vmem:[#allocation7 + $0x158] sm:$0xff]  ;;  %v2028_v59 = vadd.f32 %v3256_v54, %v2027_v49  ;;  %v2295_v58 = vld [vmem:[#allocation7 + $0x260] sm:$0xff]  ;;  %v2138_v30 = vand.u32 2147483647, %v3251_v13 }
 0x1ad   :  { %2563 = vmatmul.msk.f32.vlgmr.msra.gmra.mxu0 %vm819_vm0, %v2670_v9  ;;  %2336 = vmatpush.msra.mxu2 %v2223_v16  ;;  %v3326_v16 = vadd.f32 %v3254_v15, %v2117_v53  ;;  %v3347_v9 = vadd.f32 1.0, %v2617_v43  ;;  %v2258_v53 = vld [vmem:[#allocation7 + $0x138] sm:$0xff]  ;;  %v2257_v43 = vld [vmem:[#allocation7 + $0x130] sm:$0xff]  ;;  %vm2060_vm5 = vweird.f32 %v3360_v35 }
 0x1ae   :  { %1922 = vmatpush.msrb.mxu3 %v669_v45  ;;  %2356 = vmatpush.msrb.mxu0 %v2242_v39  ;;  %v1534_v34 = vadd.f32 %v3270_v4, %v1511_v50  ;;  %v2125_v45 = vand.u32 2147483648, %v3227_v33  ;;  %v3330_v39 = vadd.f32 1.0, %v2615_v37  ;;  %v3345_v4 = vmul.f32 %v3303_v17, %v3258_v27  ;;  %v2675_v33 = vld [vmem:[%s3501_s0 + $0x60] sm:$0xff] }
 0x1af   :  { %1900 = vmatmul.f32.vlgmr.msrb.gmra.mxu1 %v2671_v26  ;;  %1923 = vmatmul.f32.vlgmr.msrb.gmra.mxu3 %v2672_v2  ;;  %v2236_v26 = vld [vmem:[#allocation7 + $0x88] sm:$0xff]  ;;  %v2033_v2 = vand.u32 2147483647, %v3229_v55  ;;  %v2133_v37 = vadd.f32 %v3288_v22, %v2132_v48  ;;  %vm3410_vm1 = vcmp.eq.f32.partialorder %v2138_v30, 8.507059e+37 }
 0x1b0   :  { %2337 = vmatpush.msra.mxu2 %v2222_v63  ;;  %2371 = vmatpush.msra.mxu1 %v2266_v5  ;;  %v2674_v63 = vld [vmem:[%s3501_s0 + $0x58] sm:$0xff]  ;;  %2620 = vrcp.f32 %v3330_v39  ;;  %vm2149_vm9 = vweird.f32 %v3330_v39 }
 0x1b1   :  { %2394 = vmatpush.msra.mxu3 %v2282_v6  ;;  %2357 = vmatpush.msrb.mxu0 %v2241_v7  ;;  %v1490_v10 = vpop.f32.mrf.mxu3  ;;  %v2261_v5 = vld [vmem:[#allocation7 + $0x150] sm:$0xff]  ;;  %v2035_v6 = vand.u32 2147483648, %v3229_v55  ;;  %2622 = vrcp.f32 %v3347_v9  ;;  %vm2034_vm12 = vcmp.eq.f32.partialorder %v2033_v2, 8.507059e+37  ;;  %v2292_v2 = vld [vmem:[#allocation7 + $0x248] sm:$0xff]  ;;  %v2048_v55 = vand.u32 2147483647, %v3258_v27 }
 0x1b2   :  { %2338 = vmatpush.msra.mxu2 %v2221_v3  ;;  %2372 = vmatpush.msra.mxu1 %v2265_v19  ;;  %v1491_v7 = vadd.f32 %v1490_v10, %v809_v60  ;;  %v2297_v19 = vld [vmem:[#allocation7 + $0x270] sm:$0xff]  ;;  %v2122_v60 = vsel %vm3338_vm8, %v3254_v15, %v3326_v16  ;;  %v2296_v15 = vld [vmem:[#allocation7 + $0x268] sm:$0xff]  ;;  %vm3442_vm8 = vmor %vm2059_vm7, %vm2060_vm5 }
 0x1b3   :  { %2395 = vmatpush.msra.mxu3 %v2281_v32  ;;  %2358 = vmatpush.msrb.mxu0 %v2240_v46  ;;  %v2276_v32 = vld [vmem:[#allocation7 + $0x1c8] sm:$0xff]  ;;  %v2126_v46 = vor.u32 1.1754944e-38, %v2125_v45  ;;  %vm2049_vm6 = vcmp.eq.f32.partialorder %v2048_v55, 8.507059e+37 }
 0x1b4   :  { %2339 = vmatpush.msra.mxu2 %v2220_v44  ;;  %2373 = vmatpush.msra.mxu1 %v2264_v23  ;;  %v3316_v36 = vpop.f32.mrf.mxu1  ;;  %v2235_v44 = vld [vmem:[#allocation7 + $0x80] sm:$0xff]  ;;  %v2032_v23 = vsel %vm3364_vm10, %v3256_v54, %v2028_v59 }
 0x1b5   :  { %2396 = vmatpush.msra.mxu3 %v2280_v52  ;;  %2359 = vmatpush.msrb.mxu0 %v2239_v28  ;;  %v2041_v52 = vsub.f32 1.0, %v3345_v4  ;;  %v2036_v28 = vor.u32 1.1754944e-38, %v2035_v6  ;;  %v1514_v50 = vadd.f32 %v3316_v36, %v1491_v7  ;;  %v2275_v54 = vld [vmem:[#allocation7 + $0x1c0] sm:$0xff]  ;;  %v2127_v49 = vsel %vm3372_vm11, %v2126_v46, %v2122_v60 }
 0x1b6   :  { %2564 = vmatmul.msk.f32.gmra.mxu0 %vm819_vm0, %v2673_v29  ;;  %2340 = vmatpush.msra.mxu2 %v2219_v61  ;;  %v3323_v51 = vpop.f32.mrf.mxu2  ;;  %v2055_v61 = vmul.f32 %v3360_v35, %v3290_v57  ;;  %v2291_v46 = vld [vmem:[#allocation7 + $0x240] sm:$0xff] }
 0x1b7   :  { %2374 = vmatpush.msra.mxu1 %v2263_v25  ;;  %2397 = vmatpush.msra.mxu3 %v2279_v42  ;;  %v2037_v56 = vsel %vm2034_vm12, %v2036_v28, %v2032_v23  ;;  %v2140_v25 = vand.u32 2147483648, %v3251_v13  ;;  %v2256_v13 = vld [vmem:[#allocation7 + $0x128] sm:$0xff]  ;;  %vm2164_vm12 = vweird.f32 %v3347_v9 }
 0x1b8   :  { %2341 = vmatmul.f32.vlgmr.msra.gmra.mxu2 %v2022_v47  ;;  %2360 = vmatpush.msrb.mxu0 %v2238_v38  ;;  %v2042_v47 = vmul.f32 %v3303_v17, %v2041_v52  ;;  %v2056_v16 = vsub.f32 1.0, %v2055_v61 }
 0x1b9   :  { %1903 = vmatmul.f32.gmra.mxu1 %v2674_v63  ;;  %1926 = vmatmul.f32.gmra.mxu3 %v2675_v33  ;;  %v1556_v0 = vpop.f32.mrf.mxu0  ;;  %v2141_v59 = vor.u32 1.1754944e-38, %v2140_v25  ;;  %v2255_v33 = vld [vmem:[#allocation7 + $0x120] sm:$0xff] }
 0x1ba   :  { %2375 = vmatpush.msra.mxu1 %v2262_v41  ;;  %2398 = vmatpush.msra.mxu3 %v2278_v14  ;;  %v1557_v3 = vadd.f32 %v1556_v0, %v1534_v34  ;;  %v1537_v34 = vadd.f32 %v3323_v51, %v1514_v50  ;;  %v2294_v41 = vld [vmem:[#allocation7 + $0x258] sm:$0xff]  ;;  %v3403_v14 = vpop.eup %2620  ;;  %v2137_v51 = vsel %vm3397_vm15, %v3288_v22, %v2133_v37  ;;  %v2271_v22 = vld [vmem:[#allocation7 + $0x1a0] sm:$0xff]  ;;  %v2252_v50 = vld [vmem:[#allocation7 + $0x108] sm:$0xff] }
 0x1bb   :  { %2361 = vmatpush.msrb.mxu0 %v2237_v12  ;;  %v1579_v18 = vpop.f32.mrf.mxu3  ;;  %2417 = vmatpush.msrb.mxu2 %v2298_v20  ;;  %v3405_v12 = vpop.eup %2622  ;;  %v2145_v7 = vmul.f32 %v3403_v14, %v3330_v39  ;;  %v2057_v0 = vmul.f32 %v3360_v35, %v2056_v16  ;;  %vm2150_vm10 = vweird.f32 %v3403_v14  ;;  %v2153_v16 = vand.u32 2147483647, %v3330_v39 }
 0x1bc   :  { %2376 = vmatpush.msra.mxu1 %v2261_v5  ;;  %2399 = vmatpush.msra.mxu3 %v2277_v21  ;;  %v1580_v10 = vadd.f32 %v1579_v18, %v1557_v3  ;;  %v2043_v5 = vadd.f32 %v3303_v17, %v2042_v47  ;;  %v2142_v3 = vsel %vm3410_vm1, %v2141_v59, %v2137_v51  ;;  %v2253_v18 = vld [vmem:[#allocation7 + $0x110] sm:$0xff]  ;;  %v2288_v47 = vld [vmem:[#allocation7 + $0x228] sm:$0xff]  ;;  %vm2165_vm13 = vweird.f32 %v3405_v12  ;;  %vm3466_vm14 = vmor %vm2149_vm9, %vm2150_vm10 }
 0x1bd   :  { %2362 = vmatpush.msrb.mxu0 %v2236_v26  ;;  %2418 = vmatpush.msrb.mxu2 %v2297_v19  ;;  %v2160_v26 = vmul.f32 %v3405_v12, %v3347_v9  ;;  %v2254_v19 = vld [vmem:[#allocation7 + $0x118] sm:$0xff]  ;;  %v2146_v23 = vsub.f32 1.0, %v2145_v7  ;;  %vm3474_vm15 = vmor %vm2164_vm12, %vm2165_vm13  ;;  %vm2154_vm1 = vcmp.eq.f32.partialorder %v2153_v16, 8.507059e+37  ;;  %v2284_v7 = vld [vmem:[#allocation7 + $0x208] sm:$0xff] }
 0x1be   :  { %2377 = vmatpush.msra.mxu1 %v2260_v11  ;;  %2400 = vmatpush.msra.mxu3 %v2276_v32  ;;  %v2050_v11 = vand.u32 2147483648, %v3258_v27  ;;  %v2290_v27 = vld [vmem:[#allocation7 + $0x238] sm:$0xff] }
 0x1bf   :  { %2363 = vmatpush.msrb.mxu0 %v2235_v44  ;;  %v1602_v42 = vpop.f32.mrf.mxu1  ;;  %2419 = vmatpush.msrb.mxu2 %v2296_v15  ;;  %v2047_v44 = vsel %vm3427_vm4, %v3303_v17, %v2043_v5  ;;  %v2058_v15 = vadd.f32 %v3360_v35, %v2057_v0  ;;  %v2161_v52 = vsub.f32 1.0, %v2160_v26  ;;  %v2147_v30 = vmul.f32 %v3403_v14, %v2146_v23  ;;  %v2286_v51 = vld [vmem:[#allocation7 + $0x218] sm:$0xff] }
 0x1c0   :  { %2364 = vmatmul.f32.vlgmr.msrb.gmra.mxu0 %v2037_v56  ;;  %2378 = vmatpush.msra.mxu1 %v2259_v31  ;;  %v1603_v38 = vadd.f32 %v1602_v42, %v1580_v10  ;;  %v1625_v36 = vpop.f32.mrf.mxu2  ;;  %v2269_v10 = vld [vmem:[#allocation7 + $0x190] sm:$0xff]  ;;  %v2051_v61 = vor.u32 1.1754944e-38, %v2050_v11  ;;  %v2268_v56 = vld [vmem:[#allocation7 + $0x188] sm:$0xff] }
 0x1c1   :  { %2401 = vmatpush.msra.mxu3 %v2275_v54  ;;  %2344 = vmatmul.f32.gmra.mxu2 %v2127_v49  ;;  %v2065_v54 = vand.u32 2147483648, %v3290_v57  ;;  %v2289_v42 = vld [vmem:[#allocation7 + $0x230] sm:$0xff] }
 0x1c2   :  { %2379 = vmatpush.msra.mxu1 %v2258_v53  ;;  %v1626_v45 = vadd.f32 %v1625_v36, %v1603_v38  ;;  %2420 = vmatpush.msrb.mxu2 %v2295_v58  ;;  %v2063_v53 = vand.u32 2147483647, %v3290_v57  ;;  %v2251_v58 = vld [vmem:[#allocation7 + $0x100] sm:$0xff]  ;;  %v2052_v49 = vsel %vm2049_vm6, %v2051_v61, %v2047_v44  ;;  %v2062_v57 = vsel %vm3442_vm8, %v3360_v35, %v2058_v15  ;;  %v2312_v61 = vld [vmem:[#allocation7 + $0x2e8] sm:$0xff] }
 0x1c3   :  { %2402 = vmatpush.msra.mxu3 %v2274_v24  ;;  %v2267_v38 = vld [vmem:[#allocation7 + $0x180] sm:$0xff]  ;;  %v2155_v36 = vand.u32 2147483648, %v3330_v39 }
 0x1c4   :  { %2380 = vmatpush.msra.mxu1 %v2257_v43  ;;  %v2569_v4 = vmul.f32 -1.442695, %v1626_v45  ;;  %v1559_v63 = vpop.f32.mrf.mxu0  ;;  %2421 = vmatpush.msrb.mxu2 %v2294_v41  ;;  %v2162_v43 = vmul.f32 %v3405_v12, %v2161_v52  ;;  %vm2064_vm11 = vcmp.eq.f32.partialorder %v2063_v53, 8.507059e+37  ;;  %v2148_v41 = vadd.f32 %v3403_v14, %v2147_v30  ;;  %v2287_v45 = vld [vmem:[#allocation7 + $0x220] sm:$0xff] }
 0x1c5   :  { %2403 = vmatpush.msra.mxu3 %v2273_v8  ;;  %v1560_v21 = vadd.f32 %v1559_v63, %v1537_v34  ;;  %v1582_v6 = vpop.f32.mrf.mxu3  ;;  %v2066_v34 = vor.u32 1.1754944e-38, %v2065_v54  ;;  %v2170_v8 = vand.u32 2147483648, %v3347_v9  ;;  %v2156_v20 = vor.u32 1.1754944e-38, %v2155_v36 }
 0x1c6   :  { %2381 = vmatpush.msra.mxu1 %v2256_v13  ;;  %2624 = vpow2.f32 %v2569_v4  ;;  %2422 = vmatpush.msrb.mxu2 %v2293_v62  ;;  %v2163_v59 = vadd.f32 %v3405_v12, %v2162_v43  ;;  %v2168_v62 = vand.u32 2147483647, %v3347_v9  ;;  %v2152_v39 = vsel %vm3466_vm14, %v3403_v14, %v2148_v41  ;;  %v2283_v14 = vld [vmem:[#allocation7 + $0x200] sm:$0xff]  ;;  %v2308_v43 = vld [vmem:[#allocation7 + $0x2c8] sm:$0xff] }
 0x1c7   :  { %2404 = vmatpush.msra.mxu3 %v2272_v1  ;;  %v1583_v32 = vadd.f32 %v1582_v6, %v1560_v21  ;;  %v2067_v35 = vsel %vm2064_vm11, %v2066_v34, %v2062_v57  ;;  %v2171_v63 = vor.u32 1.1754944e-38, %v2170_v8  ;;  %v2157_v0 = vsel %vm2154_vm1, %v2156_v20, %v2152_v39  ;;  %v2305_v8 = vld [vmem:[#allocation7 + $0x2b0] sm:$0xff] }
 0x1c8   :  { %2367 = vmatmul.f32.gmra.mxu0 %v2142_v3  ;;  %2382 = vmatpush.msra.mxu1 %v2255_v33  ;;  %v2285_v33 = vld [vmem:[#allocation7 + $0x210] sm:$0xff]  ;;  %v2167_v9 = vsel %vm3474_vm15, %v3405_v12, %v2163_v59  ;;  %vm2169_vm2 = vcmp.eq.f32.partialorder %v2168_v62, 8.507059e+37  ;;  %v2304_v59 = vld [vmem:[#allocation7 + $0x2a8] sm:$0xff] }
 0x1c9   :  { %2405 = vmatpush.msra.mxu3 %v2271_v22  ;;  %v1605_v48 = vpop.f32.mrf.mxu1  ;;  %2423 = vmatpush.msrb.mxu2 %v2292_v2  ;;  %v2172_v26 = vsel %vm2169_vm2, %v2171_v63, %v2167_v9  ;;  %v2300_v9 = vld [vmem:[#allocation7 + $0x288] sm:$0xff] }
 0x1ca   :  { %2383 = vmatpush.msra.mxu1 %v2254_v19  ;;  %v1606_v28 = vadd.f32 %v1605_v48, %v1583_v32  ;;  %v1628_v31 = vpop.f32.mrf.mxu2  ;;  %v3488_v32 = vld [vmem:[#allocation5] sm:$0x7f] }
 0x1cb   :  { %2406 = vmatpush.msra.mxu3 %v2270_v40  ;;  %2424 = vmatpush.msrb.mxu2 %v2291_v46  ;;  %v810_v40 = vperm.slane %v3488_v32, 5 }
 0x1cc   :  { %v2625_v17 = vpop.eup %2624  ;;  %2384 = vmatpush.msra.mxu1 %v2253_v18  ;;  %v1629_v25 = vadd.f32 %v1628_v31, %v1606_v28 }
 0x1cd   :  { %2407 = vmatpush.msra.mxu3 %v2269_v10  ;;  %v3446_v37 = vadd.f32 1.0, %v2625_v17  ;;  %2425 = vmatpush.msrb.mxu2 %v2290_v27  ;;  %v2314_v10 = vld [vmem:[#allocation7 + $0x2f8] sm:$0xff]  ;;  %v2313_v27 = vld [vmem:[#allocation7 + $0x2f0] sm:$0xff] }
 0x1ce   :  { %2385 = vmatpush.msra.mxu1 %v2252_v50  ;;  %v2576_v29 = vmul.f32 -1.442695, %v1629_v25  ;;  %2440 = vmatpush.msra.mxu0 %v2314_v10  ;;  %v2311_v25 = vld [vmem:[#allocation7 + $0x2e0] sm:$0xff] }
 0x1cf   :  { %2408 = vmatpush.msra.mxu3 %v2268_v56  ;;  %2626 = vrcp.f32 %v3446_v37  ;;  %2426 = vmatpush.msrb.mxu2 %v2289_v42  ;;  %v2080_v2 = vand.u32 2147483648, %v3446_v37  ;;  %vm2074_vm3 = vweird.f32 %v3446_v37  ;;  %v2078_v12 = vand.u32 2147483647, %v3446_v37 }
 0x1d0   :  { %2386 = vmatpush.msra.mxu1 %v2251_v58  ;;  %2628 = vpow2.f32 %v2576_v29  ;;  %2441 = vmatpush.msra.mxu0 %v2313_v27  ;;  %v2307_v29 = vld [vmem:[#allocation7 + $0x2c0] sm:$0xff] }
 0x1d1   :  { %2409 = vmatpush.msra.mxu3 %v2267_v38  ;;  %2387 = vmatmul.f32.vlgmr.msra.gmra.mxu1 %v2052_v49  ;;  %v2081_v55 = vor.u32 1.1754944e-38, %v2080_v2  ;;  %vm2079_vm6 = vcmp.eq.f32.partialorder %v2078_v12, 8.507059e+37  ;;  %v2310_v49 = vld [vmem:[#allocation7 + $0x2d8] sm:$0xff]  ;;  %v2309_v38 = vld [vmem:[#allocation7 + $0x2d0] sm:$0xff] }
 0x1d2   :  { %2410 = vmatmul.f32.vlgmr.msra.gmra.mxu3 %v2067_v35  ;;  %2427 = vmatpush.msrb.mxu2 %v2288_v47  ;;  %v2306_v47 = vld [vmem:[#allocation7 + $0x2b8] sm:$0xff] }
 0x1d3   :  { %2442 = vmatpush.msra.mxu0 %v2312_v61 }
 0x1d4   :  { %2428 = vmatpush.msrb.mxu2 %v2287_v45 }
 0x1d5   :  { %v2627_v4 = vpop.eup %2626  ;;  %2443 = vmatpush.msra.mxu0 %v2311_v25 }
 0x1d6   :  { %v2629_v5 = vpop.eup %2628  ;;  %v2070_v21 = vmul.f32 %v2627_v4, %v3446_v37  ;;  %2429 = vmatpush.msrb.mxu2 %v2286_v51  ;;  %vm2075_vm4 = vweird.f32 %v2627_v4  ;;  %v2303_v51 = vld [vmem:[#allocation7 + $0x2a0] sm:$0xff] }
 0x1d7   :  { %v2006_v6 = vadd.f32 1.0, %v2629_v5  ;;  %vm2076_vm5 = vmor %vm2074_vm3, %vm2075_vm4  ;;  %2444 = vmatpush.msra.mxu0 %v2310_v49  ;;  %v2301_v5 = vld [vmem:[#allocation7 + $0x290] sm:$0xff] }
 0x1d8   :  { %v2071_v22 = vsub.f32 1.0, %v2070_v21  ;;  %2430 = vmatpush.msrb.mxu2 %v2285_v33 }
 0x1d9   :  { %2390 = vmatmul.f32.gmra.mxu1 %v2157_v0  ;;  %2630 = vrcp.f32 %v2006_v6  ;;  %v2185_v52 = vand.u32 2147483648, %v2006_v6  ;;  %vm2179_vm7 = vweird.f32 %v2006_v6  ;;  %v2183_v31 = vand.u32 2147483647, %v2006_v6  ;;  %2445 = vmatpush.msra.mxu0 %v2309_v38 }
 0x1da   :  { %2413 = vmatmul.f32.gmra.mxu3 %v2172_v26  ;;  %2431 = vmatpush.msrb.mxu2 %v2284_v7  ;;  %v2072_v3 = vmul.f32 %v2627_v4, %v2071_v22  ;;  %v2299_v22 = vld [vmem:[#allocation7 + $0x280] sm:$0xff] }
 0x1db   :  { %v1648_v19 = vpop.f32.mrf.mxu0  ;;  %v2186_v56 = vor.u32 1.1754944e-38, %v2185_v52  ;;  %vm2184_vm10 = vcmp.eq.f32.partialorder %v2183_v31, 8.507059e+37  ;;  %2446 = vmatpush.msra.mxu0 %v2308_v43 }
 0x1dc   :  { %2432 = vmatpush.msrb.mxu2 %v2283_v14  ;;  %v2073_v11 = vadd.f32 %v2627_v4, %v2072_v3  ;;  %v1649_v15 = vadd.f32 %v1648_v19, %v810_v40 }
 0x1dd   :  { %v1671_v60 = vpop.f32.mrf.mxu2  ;;  %2447 = vmatpush.msra.mxu0 %v2307_v29 }
 0x1de   :  { %v2077_v46 = vsel %vm2076_vm5, %v2627_v4, %v2073_v11  ;;  %v1672_v54 = vadd.f32 %v1671_v60, %v1649_v15  ;;  %v2302_v4 = vld [vmem:[#allocation7 + $0x298] sm:$0xff] }
 0x1df   :  { %v2631_v18 = vpop.eup %2630  ;;  %v2082_v44 = vsel %vm2079_vm6, %v2081_v55, %v2077_v46  ;;  %v1694_v23 = vpop.f32.mrf.mxu3  ;;  %2448 = vmatpush.msra.mxu0 %v2306_v47 }
 0x1e0   :  { %2433 = vmatmul.f32.vlgmr.msrb.gmra.mxu2 %v2082_v44  ;;  %v2175_v48 = vmul.f32 %v2631_v18, %v2006_v6  ;;  %vm2180_vm8 = vweird.f32 %v2631_v18  ;;  %v1695_v24 = vadd.f32 %v1694_v23, %v1672_v54 }
 0x1e1   :  { %vm2181_vm9 = vmor %vm2179_vm7, %vm2180_vm8  ;;  %2449 = vmatpush.msra.mxu0 %v2305_v8 }
 0x1e2   :  { %v2176_v28 = vsub.f32 1.0, %v2175_v48 }
 0x1e3   :  { %2450 = vmatpush.msra.mxu0 %v2304_v59 }
 0x1e4   :  { %v2177_v50 = vmul.f32 %v2631_v18, %v2176_v28  ;;  %v1651_v17 = vpop.f32.mrf.mxu0 }
 0x1e5   :  { %v1652_v57 = vadd.f32 %v1651_v17, %v810_v40  ;;  %2451 = vmatpush.msra.mxu0 %v2303_v51  ;;  %v2315_v51 = vld [vmem:[#allocation7 + $0x300] sm:$0xff] }
 0x1e6   :  { %v2178_v53 = vadd.f32 %v2631_v18, %v2177_v50  ;;  %v1674_v42 = vpop.f32.mrf.mxu2 }
 0x1e7   :  { %v1675_v41 = vadd.f32 %v1674_v42, %v1652_v57  ;;  %2452 = vmatpush.msra.mxu0 %v2302_v4 }
 0x1e8   :  { %v2182_v58 = vsel %vm2181_vm9, %v2631_v18, %v2178_v53 }
 0x1e9   :  { %v2187_v37 = vsel %vm2184_vm10, %v2186_v56, %v2182_v58  ;;  %2453 = vmatpush.msra.mxu0 %v2301_v5  ;;  %v811_v58 = vperm.slane %v3488_v32, 6 }
 0x1ea   :  { %v1697_v30 = vpop.f32.mrf.mxu3  ;;  %2436 = vmatmul.f32.gmra.mxu2 %v2187_v37 }
 0x1eb   :  { %v1698_v62 = vadd.f32 %v1697_v30, %v1675_v41  ;;  %2454 = vmatpush.msra.mxu0 %v2300_v9  ;;  %v2317_v41 = vld [vmem:[#allocation7 + $0x310] sm:$0xff] }
 0x1ec   :  { %v1717_v36 = vpop.f32.mrf.mxu1 }
 0x1ed   :  { %v1718_v34 = vadd.f32 %v1717_v36, %v1695_v24  ;;  %2455 = vmatpush.msra.mxu0 %v2299_v22 }
 0x1ef   :  { %v1740_v35 = vpop.f32.mrf.mxu0 }
 0x1f0   :  { %v1741_v16 = vadd.f32 %v1740_v35, %v1718_v34  ;;  %v2318_v35 = vld [vmem:[#allocation7 + $0x318] sm:$0xff] }
 0x1f1   :  { %v1763_v45 = vpop.f32.mrf.mxu2  ;;  %2475 = vmatpush.msrb.mxu1 %v2318_v35 }
 0x1f2   :  { %v1764_v13 = vadd.f32 %v1763_v45, %v1741_v16  ;;  %v2316_v45 = vld [vmem:[#allocation7 + $0x308] sm:$0xff] }
 0x1f3   :  { %2476 = vmatpush.msrb.mxu1 %v2317_v41 }
 0x1f4   :  { %v1786_v1 = vpop.f32.mrf.mxu3 }
 0x1f5   :  { %v1787_v20 = vadd.f32 %v1786_v1, %v1764_v13  ;;  %2477 = vmatpush.msrb.mxu1 %v2316_v45 }
 0x1f7   :  { %v2570_v39 = vmul.f32 -1.442695, %v1787_v20  ;;  %v1720_v63 = vpop.f32.mrf.mxu1  ;;  %2478 = vmatpush.msrb.mxu1 %v2315_v51  ;;  %v2512_v51 = vld [vmem:[#allocation8 + $0x8] sm:$0xff] }
 0x1f8   :  { %v1721_v33 = vadd.f32 %v1720_v63, %v1698_v62 }
 0x1f9   :  { %2632 = vpow2.f32 %v2570_v39 }
 0x1fa   :  { %v1743_v21 = vpop.f32.mrf.mxu0 }
 0x1fb   :  { %v1744_v6 = vadd.f32 %v1743_v21, %v1721_v33  ;;  %v1766_v7 = vpop.f32.mrf.mxu2 }
 0x1fd   :  { %v1767_v0 = vadd.f32 %v1766_v7, %v1744_v6 }
 0x1fe   :  { %v1789_v26 = vpop.f32.mrf.mxu3 }
 0x1ff   :  { %v2633_v14 = vpop.eup %2632  ;;  %v1790_v2 = vadd.f32 %v1789_v26, %v1767_v0 }
 0x200   :  { %v2000_v3 = vadd.f32 1.0, %v2633_v14 }
 0x201   :  { %v2577_v12 = vmul.f32 -1.442695, %v1790_v2 }
 0x202   :  { %2634 = vrcp.f32 %v2000_v3  ;;  %v2095_v46 = vand.u32 2147483648, %v2000_v3  ;;  %v2093_v44 = vand.u32 2147483647, %v2000_v3  ;;  %vm2089_vm12 = vweird.f32 %v2000_v3 }
 0x203   :  { %2636 = vpow2.f32 %v2577_v12 }
 0x204   :  { %v2096_v48 = vor.u32 1.1754944e-38, %v2095_v46  ;;  %vm2094_vm14 = vcmp.eq.f32.partialorder %v2093_v44, 8.507059e+37 }
 0x208   :  { %v2635_v19 = vpop.eup %2634 }
 0x209   :  { %v2637_v11 = vpop.eup %2636  ;;  %v2085_v40 = vmul.f32 %v2635_v19, %v2000_v3  ;;  %vm2090_vm11 = vweird.f32 %v2635_v19 }
 0x20a   :  { %v2007_v60 = vadd.f32 1.0, %v2637_v11  ;;  %vm2091_vm13 = vmor %vm2089_vm12, %vm2090_vm11  ;;  %vm2487_vm12 = vcmask 130048  }
 0x20b   :  { %v2086_v55 = vsub.f32 1.0, %v2085_v40 }
 0x20c   :  { %2638 = vrcp.f32 %v2007_v60  ;;  %v2200_v31 = vand.u32 2147483648, %v2007_v60  ;;  %vm2194_vm15 = vweird.f32 %v2007_v60  ;;  %v2198_v50 = vand.u32 2147483647, %v2007_v60 }
 0x20d   :  { %v2087_v18 = vmul.f32 %v2635_v19, %v2086_v55 }
 0x20e   :  { %v2201_v54 = vor.u32 1.1754944e-38, %v2200_v31  ;;  %vm2199_vm3 = vcmp.eq.f32.partialorder %v2198_v50, 8.507059e+37 }
 0x20f   :  { %v2088_v23 = vadd.f32 %v2635_v19, %v2087_v18 }
 0x211   :  { %v2092_v10 = vsel %vm2091_vm13, %v2635_v19, %v2088_v23  ;;  %vm2542_vm13 = vcmask 1024  }
 0x212   :  { %v2639_v15 = vpop.eup %2638  ;;  %v2097_v52 = vsel %vm2094_vm14, %v2096_v48, %v2092_v10 }
 0x213   :  { %2456 = vmatmul.f32.vlgmr.msra.gmra.mxu0 %v2097_v52  ;;  %v2190_v28 = vmul.f32 %v2639_v15, %v2007_v60  ;;  %vm2195_vm1 = vweird.f32 %v2639_v15 }
 0x214   :  { %vm2196_vm2 = vmor %vm2194_vm15, %vm2195_vm1 }
 0x215   :  { %v2191_v27 = vsub.f32 1.0, %v2190_v28  ;;  %v1855_v49 = vpop.f32.mrf.mxu0 }
 0x217   :  { %v2192_v61 = vmul.f32 %v2639_v15, %v2191_v27  ;;  %v1809_v56 = vpop.f32.mrf.mxu1 }
 0x218   :  { %v1810_v24 = vadd.f32 %v1809_v56, %v811_v58 }
 0x219   :  { %v2193_v17 = vadd.f32 %v2639_v15, %v2192_v61 }
 0x21b   :  { %v2197_v53 = vsel %vm2196_vm2, %v2639_v15, %v2193_v17 }
 0x21c   :  { %v2202_v25 = vsel %vm2199_vm3, %v2201_v54, %v2197_v53 }
 0x21d   :  { %2459 = vmatmul.f32.gmra.mxu0 %v2202_v25 }
 0x21e   :  { %v1832_v42 = vpop.f32.mrf.mxu3 }
 0x21f   :  { %v1833_v30 = vadd.f32 %v1832_v42, %v1810_v24 }
 0x220   :  { %v1858_v57 = vpop.f32.mrf.mxu0 }
 0x221   :  { %v1856_v36 = vadd.f32 %v1855_v49, %v1833_v30 }
 0x222   :  { %v1812_v37 = vpop.f32.mrf.mxu1 }
 0x223   :  { %v1878_v43 = vpop.f32.mrf.mxu2  ;;  %v1813_v29 = vadd.f32 %v1812_v37, %v811_v58 }
 0x224   :  { %v1879_v47 = vadd.f32 %v1878_v43, %v1856_v36 }
 0x228   :  { %v1835_v38 = vpop.f32.mrf.mxu3 }
 0x229   :  { %v1836_v16 = vadd.f32 %v1835_v38, %v1813_v29 }
 0x22a   :  { %v1947_v59 = vpop.f32.mrf.mxu0 }
 0x22b   :  { %v1859_v62 = vadd.f32 %v1858_v57, %v1836_v16 }
 0x22c   :  { %v1901_v34 = vpop.f32.mrf.mxu1 }
 0x22d   :  { %v1902_v8 = vadd.f32 %v1901_v34, %v1879_v47  ;;  %v1881_v20 = vpop.f32.mrf.mxu2 }
 0x22e   :  { %v1882_v63 = vadd.f32 %v1881_v20, %v1859_v62  ;;  %v2514_v62 = vld [vmem:[#allocation8 + $0x18] sm:$0xff]  ;;  %v2511_v20 = vld [vmem:[#allocation8] sm:$0xff] }
 0x232   :  { %v1924_v13 = vpop.f32.mrf.mxu3 }
 0x233   :  { %v1925_v32 = vadd.f32 %v1924_v13, %v1902_v8  ;;  %v1950_v9 = vpop.f32.mrf.mxu0 }
 0x235   :  { %v1948_v1 = vadd.f32 %v1947_v59, %v1925_v32  ;;  %v2486_v59 = vld [vmem:[%s3505_s4] sm:$0x3] }
 0x236   :  { %v1904_v39 = vpop.f32.mrf.mxu1 }
 0x237   :  { %v2571_v4 = vmul.f32 -1.442695, %v1948_v1  ;;  %v1905_v33 = vadd.f32 %v1904_v39, %v1882_v63  ;;  %v2513_v1 = vld [vmem:[#allocation8 + $0x10] sm:$0xff] }
 0x238   :  { %v2591_v39 = vld [vmem:[#allocation2] ss:$0 sm:$0xff] }
 0x239   :  { %2640 = vpow2.f32 %v2571_v4 }
 0x23b   :  { %v2342_v61 = vpop.f32.mrf.mxu2 }
 0x23c   :  { %v1927_v5 = vpop.f32.mrf.mxu3 }
 0x23d   :  { %v1928_v21 = vadd.f32 %v1927_v5, %v1905_v33  ;;  %v2365_v54 = vpop.f32.mrf.mxu0 }
 0x23e   :  { %v2366_v38 = vadd.f32 %v2365_v54, %v2342_v61 }
 0x23f   :  { %v2641_v6 = vpop.eup %2640  ;;  %v1951_v7 = vadd.f32 %v1950_v9, %v1928_v21 }
 0x240   :  { %v2001_v22 = vadd.f32 1.0, %v2641_v6 }
 0x241   :  { %v2578_v0 = vmul.f32 -1.442695, %v1951_v7 }
 0x242   :  { %2642 = vrcp.f32 %v2001_v22  ;;  %v2110_v19 = vand.u32 2147483648, %v2001_v22  ;;  %v2108_v40 = vand.u32 2147483647, %v2001_v22  ;;  %vm2104_vm5 = vweird.f32 %v2001_v22 }
 0x243   :  { %2644 = vpow2.f32 %v2578_v0 }
 0x244   :  { %v2111_v55 = vor.u32 1.1754944e-38, %v2110_v19  ;;  %vm2109_vm7 = vcmp.eq.f32.partialorder %v2108_v40, 8.507059e+37  ;;  %v2345_v56 = vpop.f32.mrf.mxu2 }
 0x245   :  { %v2368_v53 = vpop.f32.mrf.mxu0 }
 0x246   :  { %v2369_v37 = vadd.f32 %v2368_v53, %v2345_v56 }
 0x248   :  { %v2643_v26 = vpop.eup %2642 }
 0x249   :  { %v2645_v14 = vpop.eup %2644  ;;  %v2100_v2 = vmul.f32 %v2643_v26, %v2001_v22  ;;  %vm2105_vm4 = vweird.f32 %v2643_v26 }
 0x24a   :  { %v2008_v3 = vadd.f32 1.0, %v2645_v14  ;;  %vm2106_vm6 = vmor %vm2104_vm5, %vm2105_vm4 }
 0x24b   :  { %v2101_v12 = vsub.f32 1.0, %v2100_v2 }
 0x24c   :  { %2646 = vrcp.f32 %v2008_v3  ;;  %v2215_v10 = vand.u32 2147483648, %v2008_v3  ;;  %v2213_v52 = vand.u32 2147483647, %v2008_v3  ;;  %vm2209_vm9 = vweird.f32 %v2008_v3 }
 0x24d   :  { %v2102_v11 = vmul.f32 %v2643_v26, %v2101_v12 }
 0x24e   :  { %v2216_v31 = vor.u32 1.1754944e-38, %v2215_v10  ;;  %vm2214_vm11 = vcmp.eq.f32.partialorder %v2213_v52, 8.507059e+37  ;;  %v2388_v17 = vpop.f32.mrf.mxu1 }
 0x24f   :  { %v2103_v60 = vadd.f32 %v2643_v26, %v2102_v11  ;;  %v2389_v43 = vadd.f32 %v2388_v17, %v2366_v38 }
 0x251   :  { %v2107_v46 = vsel %vm2106_vm6, %v2643_v26, %v2103_v60 }
 0x252   :  { %v2647_v18 = vpop.eup %2646  ;;  %v2112_v44 = vsel %vm2109_vm7, %v2111_v55, %v2107_v46 }
 0x253   :  { %2579 = vmatmul.msk.f32.vlgmr.msrb.gmra.mxu1 %vm819_vm0, %v2112_v44  ;;  %v2205_v23 = vmul.f32 %v2647_v18, %v2008_v3  ;;  %vm2210_vm8 = vweird.f32 %v2647_v18 }
 0x254   :  { %vm2211_vm10 = vmor %vm2209_vm9, %vm2210_vm8 }
 0x255   :  { %v2206_v48 = vsub.f32 1.0, %v2205_v23  ;;  %v2411_v25 = vpop.f32.mrf.mxu3 }
 0x256   :  { %v2391_v42 = vpop.f32.mrf.mxu1  ;;  %v2412_v47 = vadd.f32 %v2411_v25, %v2389_v43 }
 0x257   :  { %v2207_v15 = vmul.f32 %v2647_v18, %v2206_v48  ;;  %v2392_v57 = vadd.f32 %v2391_v42, %v2369_v37 }
 0x259   :  { %v2208_v28 = vadd.f32 %v2647_v18, %v2207_v15 }
 0x25b   :  { %v2212_v27 = vsel %vm2211_vm10, %v2647_v18, %v2208_v28 }
 0x25c   :  { %v2217_v50 = vsel %vm2214_vm11, %v2216_v31, %v2212_v27 }
 0x25d   :  { %2580 = vmatmul.msk.f32.gmra.mxu1 %vm819_vm0, %v2217_v50  ;;  %v2414_v30 = vpop.f32.mrf.mxu3 }
 0x25e   :  { %v2415_v29 = vadd.f32 %v2414_v30, %v2392_v57 }
 0x263   :  { %v2434_v58 = vpop.f32.mrf.mxu2 }
 0x264   :  { %v2435_v41 = vadd.f32 %v2434_v58, %v2412_v47 }
 0x26d   :  { %v2437_v36 = vpop.f32.mrf.mxu2 }
 0x26e   :  { %v2438_v35 = vadd.f32 %v2437_v36, %v2415_v29 }
 0x290   :  { %v2457_v49 = vpop.f32.mrf.mxu0 }
 0x291   :  { %v2458_v45 = vadd.f32 %v2457_v49, %v2435_v41 }
 0x29a   :  { %v2460_v34 = vpop.f32.mrf.mxu0 }
 0x29b   :  { %v2461_v16 = vadd.f32 %v2460_v34, %v2438_v35 }
 0x2d0   :  { %v2480_v24 = vpop.f32.mrf.mxu1 }
 0x2d1   :  { %v2481_v32 = vadd.f32 %v2480_v24, %v2458_v45 }
 0x2da   :  { %v2483_v8 = vpop.f32.mrf.mxu1 }
 0x2db   :  { %v2484_v13 = vadd.f32 %v2483_v8, %v2461_v16 }
 0x2dd   :  { %2505 = vmatpush.msrb.mxu3 %v2484_v13 }
 0x2df   :  { %2506 = vmatpush.msrb.mxu3 %v2481_v32 }
 0x2e0   :  { %2581 = vmatmul.msk.f32.vlgmr.msrb.gmra.mxu3 %vm2487_vm12, %v2486_v59 }
 0x2e1   :  { %2534 = vmatpush.msra.mxu3 %v2514_v62 }
 0x2e3   :  { %2535 = vmatpush.msra.mxu3 %v2513_v1 }
 0x2e5   :  { %2536 = vmatpush.msra.mxu3 %v2512_v51 }
 0x2e7   :  { %2537 = vmatpush.msra.mxu3 %v2511_v20 }
 0x363   :  { %v2508_v4 = vpop.f32.mrf.mxu3 }
 0x364   :  { %2582 = vmatmul.msk.f32.vlgmr.msra.gmra.mxu3 %vm819_vm0, %v2508_v4 }
 0x3e7   :  { %v2539_v63 = vpop.f32.mrf.mxu3 }
 0x3e8   :  { %v2540_v33 = vadd.f32 %v2591_v39, %v2539_v63 }
 0x3ea   :  { %2543 = vst.msk [vmem:[%s3508_s7] sm:$0x3] %vm2542_vm13, %v2540_v33 }
 0x3eb   :  { %2548 = vsyncpa [#allocation4], 1 }
 0x3ec   :  { %2549 = vsyncpa [#allocation6], 1 }
 0x3ed   :  { %2550 = vsyncpa [#allocation9], 1 }

</bundles_post_ra>
